<compile_context>
chip_gen: v7x
topology: tpu7x:2x2x1
jax: 0.10.0
libtpu: 0.0.40
codegen_flags: <defaults>
</compile_context>

<pallas_src>
import functools

import jax
import jax.numpy as jnp
from jax.experimental import pallas as pl
from jax.experimental.pallas import tpu as pltpu

EPS = 1e-5                    # torch.nn.InstanceNorm3d default eps
MXU_DTYPE = jnp.bfloat16      # MXU operand dtype (accumulation/stats stay f32)


def _round_up(v, m):
    return (v + m - 1) // m * m


def _resblock_kernel(x_ref, w1_ref, w2_ref, m_ref, o_ref, xe_ref, y1e_ref,
                     *, D, H, W, P, Pp, pad):
    """Fused conv1 -> IN -> ReLU -> conv2 -> IN -> (+x) -> ReLU for one sample.

    x_ref  : (1, Cp, Pp)   f32   flattened channels-first input (residual src)
    w1_ref : (27, Cm, Cp)  bf16  per-tap weight matrices of conv1
    w2_ref : (27, Cp, Cm)  bf16  per-tap weight matrices of conv2
    m_ref  : (27, 1, Pp)   f32   per-tap validity masks (zero-pad + lane pad)
    o_ref  : (1, Cp, Pp)   f32   output
    xe_ref : (Cp, Pext)    bf16  scratch: haloed copy of x   (Pext = Pp+2*pad)
    y1e_ref: (Cm, Pext)    bf16  scratch: haloed copy of stage-1 activation
    """
    HW = H * W
    offs = tuple(dd * HW + dh * W + dw
                 for dd in (-1, 0, 1) for dh in (-1, 0, 1) for dw in (-1, 0, 1))
    lane_valid = m_ref[13]            # centre tap mask == (flat position < P)
    inv_p = 1.0 / float(P)

    # Zero the halo strips.  The masks make halo values irrelevant, but
    # uninitialised VMEM could hold NaNs which a 0-multiply would not kill.
    for ref in (xe_ref, y1e_ref):
        zeros_halo = jnp.zeros((ref.shape[0], pad), ref.dtype)
        ref[:, 0:pad] = zeros_halo
        ref[:, pad + Pp:pad + Pp + pad] = zeros_halo

    def conv3x3x3(src_ref, wk_ref):
        # 27 shifted-window matmuls: bf16 operands on the MXU, f32 accumulate.
        cout = wk_ref.shape[1]
        acc = jnp.zeros((cout, Pp), jnp.float32)
        for k, off in enumerate(offs):
            win = src_ref[:, pad + off:pad + off + Pp]        # (Cin, Pp) bf16
            part = jnp.dot(wk_ref[k], win,
                           preferred_element_type=jnp.float32)
            acc = acc + part * m_ref[k]                       # zero invalid taps
        return acc

    def instance_norm(z):
        # Per-channel stats over the spatial (lane) axis, biased variance.
        # Padded lanes of z are exactly 0, so sum/P is the true mean.
        mean = jnp.sum(z, axis=1, keepdims=True) * inv_p
        cen = z - mean
        var = jnp.sum(cen * cen * lane_valid, axis=1, keepdims=True) * inv_p
        return cen * jax.lax.rsqrt(var + EPS)

    x = x_ref[0]                                              # (Cp, Pp) f32
    xe_ref[:, pad:pad + Pp] = x.astype(MXU_DTYPE)

    # stage 1: conv1 -> InstanceNorm -> ReLU   (kept on-chip, never to HBM)
    y1 = jnp.maximum(instance_norm(conv3x3x3(xe_ref, w1_ref)), 0.0)
    y1e_ref[:, pad:pad + Pp] = y1.astype(MXU_DTYPE)

    # stage 2: conv2 -> InstanceNorm -> residual add -> ReLU
    z2 = instance_norm(conv3x3x3(y1e_ref, w2_ref))
    o_ref[0] = jnp.maximum(x + z2, 0.0)


def resblock3d_forward(x, params):
    """x: (N, Cin, D, H, W) float32 (NCDHW). Returns (N, Cout, D, H, W)."""
    N, Cin, D, H, W = x.shape
    Cmid = params["w1"].shape[0]
    Cout = params["w2"].shape[0]
    assert Cin == Cout, "residual connection requires in_ch == out_ch"

    P = D * H * W
    Pp = _round_up(P, 128)                   # lane-dense spatial axis
    pad = _round_up(H * W + W + 1, 128)      # halo >= max flat shift, aligned
    Pext = Pp + 2 * pad
    Cp = _round_up(Cin, 8)                   # sublane-aligned channel counts
    Cm = _round_up(Cmid, 8)

    # ---- cheap host-side prep (no 27x im2col materialisation) ----
    x_flat = x.reshape(N, Cin, P)
    x_flat = jnp.pad(x_flat, ((0, 0), (0, Cp - Cin), (0, Pp - P)))

    def prep_w(w, co_p, ci_p):
        # PyTorch (Cout, Cin, 3, 3, 3) -> (27, Cout_p, Cin_p) bf16, tap-major.
        co, ci = w.shape[0], w.shape[1]
        wk = jnp.transpose(w, (2, 3, 4, 0, 1)).reshape(27, co, ci)
        wk = jnp.pad(wk, ((0, 0), (0, co_p - co), (0, ci_p - ci)))
        return wk.astype(MXU_DTYPE)

    w1k = prep_w(params["w1"], Cm, Cp)
    w2k = prep_w(params["w2"], Cp, Cm)
    # Biases b1/b2 are intentionally unused: they cancel through
    # InstanceNorm(affine=False) (constant per-channel shift of the mean).

    # Per-tap validity masks (conv zero-padding + lane round-up), {0,1} f32.
    p_idx = jnp.arange(Pp)
    d_i, h_i, w_i = p_idx // (H * W), (p_idx // W) % H, p_idx % W
    in_p = p_idx < P
    masks = []
    for dd in (-1, 0, 1):
        for dh in (-1, 0, 1):
            for dw in (-1, 0, 1):
                m = (in_p
                     & (d_i + dd >= 0) & (d_i + dd < D)
                     & (h_i + dh >= 0) & (h_i + dh < H)
                     & (w_i + dw >= 0) & (w_i + dw < W))
                masks.append(m)
    masks = jnp.stack(masks).astype(jnp.float32).reshape(27, 1, Pp)

    kernel = functools.partial(_resblock_kernel,
                               D=D, H=H, W=W, P=P, Pp=Pp, pad=pad)
    out = pl.pallas_call(
        kernel,
        out_shape=jax.ShapeDtypeStruct((N, Cp, Pp), jnp.float32),
        grid=(N,),
        in_specs=[
            pl.BlockSpec((1, Cp, Pp), lambda n: (n, 0, 0)),
            pl.BlockSpec((27, Cm, Cp), lambda n: (0, 0, 0)),
            pl.BlockSpec((27, Cp, Cm), lambda n: (0, 0, 0)),
            pl.BlockSpec((27, 1, Pp), lambda n: (0, 0, 0)),
        ],
        out_specs=pl.BlockSpec((1, Cp, Pp), lambda n: (n, 0, 0)),
        scratch_shapes=[
            pltpu.VMEM((Cp, Pext), MXU_DTYPE),
            pltpu.VMEM((Cm, Pext), MXU_DTYPE),
        ],
        compiler_params=pltpu.CompilerParams(
            dimension_semantics=("parallel",),
            vmem_limit_bytes=32 * 1024 * 1024,
        ),
    )(x_flat, w1k, w2k, masks)

    return out[:, :Cout, :P].reshape(N, Cout, D, H, W)


# --------------------------- pure-JAX reference ------------------------------

def _reference(x, params, operand_dtype=jnp.float32):
    """Reference forward (residual interpretation of the PyTorch module).

    operand_dtype=bfloat16 reproduces the kernel's MXU operand precision
    (bf16 inputs/weights, f32 accumulation); f32 gives the exact reference.
    """
    def conv(t, w, b):
        t = t.astype(operand_dtype).astype(jnp.float32)
        w = w.astype(operand_dtype).astype(jnp.float32)
        y = jax.lax.conv_general_dilated(
            t, w, (1, 1, 1), [(1, 1), (1, 1), (1, 1)],
            dimension_numbers=("NCDHW", "OIDHW", "NCDHW"),
            precision=jax.lax.Precision.HIGHEST)
        return y + b[None, :, None, None, None]

    def inorm(t):
        mean = t.mean(axis=(2, 3, 4), keepdims=True)
        var = ((t - mean) ** 2).mean(axis=(2, 3, 4), keepdims=True)
        return (t - mean) * jax.lax.rsqrt(var + EPS)

    y = jax.nn.relu(inorm(conv(x, params["w1"], params["b1"])))
    y = inorm(conv(y, params["w2"], params["b2"]))
    return jax.nn.relu(x + y)


if __name__ == "__main__":
    # in_ch == out_ch is required by the residual connection.
    N, Cin, Cmid, Cout, D, H, W = 2, 4, 8, 4, 8, 8, 8
    key = jax.random.PRNGKey(0)
    k1, k2, k3, k4, kx = jax.random.split(key, 5)
    params = {
        "w1": 0.1 * jax.random.normal(k1, (Cmid, Cin, 3, 3, 3), jnp.float32),
        "b1": 0.1 * jax.random.normal(k2, (Cmid,), jnp.float32),
        "w2": 0.1 * jax.random.normal(k3, (Cout, Cmid, 3, 3, 3), jnp.float32),
        "b2": 0.1 * jax.random.normal(k4, (Cout,), jnp.float32),
    }
    x = jax.random.normal(kx, (N, Cin, D, H, W), jnp.float32)

    out = jax.block_until_ready(resblock3d_forward(x, params))
    ref_mxu = jax.block_until_ready(_reference(x, params, MXU_DTYPE))
    ref_f32 = jax.block_until_ready(_reference(x, params, jnp.float32))

    assert out.shape == (N, Cout, D, H, W)
    # Tight check vs. a reference at the same MXU operand precision; loose
    # sanity check vs. full f32 (difference = inherent bf16 input rounding).
    err_mxu = float(jnp.max(jnp.abs(out - ref_mxu)))
    err_f32 = float(jnp.max(jnp.abs(out - ref_f32)))
    if err_mxu < 5e-3 and err_f32 < 1e-1:
        print("KERNEL_OK")
    else:
        print(f"MISMATCH matched_err={err_mxu} f32_err={err_f32}")
</pallas_src>

<mosaic_0001>
module attributes {stable_mosaic.version = 11 : i64} {
  func.func @_resblock_kernel(%arg0: i32, %arg1: memref<1x8x512xf32, #tpu.memory_space<vmem>>, %arg2: memref<27x8x8xbf16, #tpu.memory_space<vmem>>, %arg3: memref<27x8x8xbf16, #tpu.memory_space<vmem>>, %arg4: memref<27x1x512xf32, #tpu.memory_space<vmem>>, %arg5: memref<1x8x512xf32, #tpu.memory_space<vmem>>, %arg6: memref<8x768xbf16, #tpu.memory_space<vmem>>, %arg7: memref<8x768xbf16, #tpu.memory_space<vmem>>) attributes {dimension_semantics = [#tpu.dimension_semantics<parallel>], iteration_bounds = array<i64: 2>, scalar_prefetch = 0 : i64, scratch_operands = 2 : i64, tpu.core_type = #tpu.core_type<tc>, window_params = [{transform_indices = @transform_0, window_bounds = array<i64: 1, 8, 512>}, {pipeline_mode = #tpu.pipeline_mode<synchronous>, transform_indices = @transform_1, window_bounds = array<i64: 27, 8, 8>}, {pipeline_mode = #tpu.pipeline_mode<synchronous>, transform_indices = @transform_2, window_bounds = array<i64: 27, 8, 8>}, {pipeline_mode = #tpu.pipeline_mode<synchronous>, transform_indices = @transform_3, window_bounds = array<i64: 27, 1, 512>}, {transform_indices = @transform_4, window_bounds = array<i64: 1, 8, 512>}]} {
    %c13 = arith.constant 13 : index
    %c0 = arith.constant 0 : index
    %c0_0 = arith.constant 0 : index
    %0 = vector.load %arg4[%c13, %c0, %c0_0] : memref<27x1x512xf32, #tpu.memory_space<vmem>>, vector<1x1x512xf32>
    %1 = vector.shape_cast %0 : vector<1x1x512xf32> to vector<1x512xf32>
    %cst = arith.constant 0.000000e+00 : bf16
    %2 = vector.broadcast %cst : bf16 to vector<8x128xbf16>
    %c0_1 = arith.constant 0 : index
    %c0_2 = arith.constant 0 : index
    %3 = vector.load %arg6[%c0_1, %c0_2] : memref<8x768xbf16, #tpu.memory_space<vmem>>, vector<8x128xbf16>
    tpu.vector_store %arg6[%c0_1, %c0_2], %2 {strides = array<i32>} : memref<8x768xbf16, #tpu.memory_space<vmem>>, vector<8x128xbf16>,
    %c0_3 = arith.constant 0 : index
    %c640 = arith.constant 640 : index
    %4 = vector.load %arg6[%c0_3, %c640] : memref<8x768xbf16, #tpu.memory_space<vmem>>, vector<8x128xbf16>
    tpu.vector_store %arg6[%c0_3, %c640], %2 {strides = array<i32>} : memref<8x768xbf16, #tpu.memory_space<vmem>>, vector<8x128xbf16>,
    %cst_4 = arith.constant 0.000000e+00 : bf16
    %5 = vector.broadcast %cst_4 : bf16 to vector<8x128xbf16>
    %c0_5 = arith.constant 0 : index
    %c0_6 = arith.constant 0 : index
    %6 = vector.load %arg7[%c0_5, %c0_6] : memref<8x768xbf16, #tpu.memory_space<vmem>>, vector<8x128xbf16>
    tpu.vector_store %arg7[%c0_5, %c0_6], %5 {strides = array<i32>} : memref<8x768xbf16, #tpu.memory_space<vmem>>, vector<8x128xbf16>,
    %c0_7 = arith.constant 0 : index
    %c640_8 = arith.constant 640 : index
    %7 = vector.load %arg7[%c0_7, %c640_8] : memref<8x768xbf16, #tpu.memory_space<vmem>>, vector<8x128xbf16>
    tpu.vector_store %arg7[%c0_7, %c640_8], %5 {strides = array<i32>} : memref<8x768xbf16, #tpu.memory_space<vmem>>, vector<8x128xbf16>,
    %c0_9 = arith.constant 0 : index
    %c0_10 = arith.constant 0 : index
    %c0_11 = arith.constant 0 : index
    %8 = vector.load %arg1[%c0_9, %c0_10, %c0_11] : memref<1x8x512xf32, #tpu.memory_space<vmem>>, vector<1x8x512xf32>
    %9 = vector.shape_cast %8 : vector<1x8x512xf32> to vector<8x512xf32>
    %10 = arith.truncf %9 : vector<8x512xf32> to vector<8x512xbf16>
    %c0_12 = arith.constant 0 : index
    %c128 = arith.constant 128 : index
    %11 = vector.load %arg6[%c0_12, %c128] : memref<8x768xbf16, #tpu.memory_space<vmem>>, vector<8x512xbf16>
    tpu.vector_store %arg6[%c0_12, %c128], %10 {strides = array<i32>} : memref<8x768xbf16, #tpu.memory_space<vmem>>, vector<8x512xbf16>,
    %cst_13 = arith.constant 0.000000e+00 : f32
    %12 = vector.broadcast %cst_13 : f32 to vector<8x512xf32>
    %c0_14 = arith.constant 0 : index
    %c55 = arith.constant 55 : index
    %13 = vector.load %arg6[%c0_14, %c55] : memref<8x768xbf16, #tpu.memory_space<vmem>>, vector<8x512xbf16>
    %c0_15 = arith.constant 0 : index
    %c0_16 = arith.constant 0 : index
    %c0_17 = arith.constant 0 : index
    %14 = vector.load %arg2[%c0_15, %c0_16, %c0_17] : memref<27x8x8xbf16, #tpu.memory_space<vmem>>, vector<1x8x8xbf16>
    %15 = vector.shape_cast %14 : vector<1x8x8xbf16> to vector<8x8xbf16>
    %cst_18 = arith.constant dense<0.000000e+00> : vector<8x512xf32>
    %16 = tpu.matmul %15, %13, %cst_18 {dimension_numbers = #tpu.dot_dimension_numbers<[1], [0], [0], [1], [0, 0, 1, 1], [], []>} : vector<8x8xbf16>, vector<8x512xbf16>, vector<8x512xf32> -> vector<8x512xf32>
    %c0_19 = arith.constant 0 : index
    %c0_20 = arith.constant 0 : index
    %c0_21 = arith.constant 0 : index
    %17 = vector.load %arg4[%c0_19, %c0_20, %c0_21] : memref<27x1x512xf32, #tpu.memory_space<vmem>>, vector<1x1x512xf32>
    %18 = vector.shape_cast %17 : vector<1x1x512xf32> to vector<1x512xf32>
    %19 = vector.broadcast %18 : vector<1x512xf32> to vector<8x512xf32>
    %20 = arith.mulf %16, %19 : vector<8x512xf32>
    %21 = arith.addf %12, %20 : vector<8x512xf32>
    %c0_22 = arith.constant 0 : index
    %c56 = arith.constant 56 : index
    %22 = vector.load %arg6[%c0_22, %c56] : memref<8x768xbf16, #tpu.memory_space<vmem>>, vector<8x512xbf16>
    %c1 = arith.constant 1 : index
    %c0_23 = arith.constant 0 : index
    %c0_24 = arith.constant 0 : index
    %23 = vector.load %arg2[%c1, %c0_23, %c0_24] : memref<27x8x8xbf16, #tpu.memory_space<vmem>>, vector<1x8x8xbf16>
    %24 = vector.shape_cast %23 : vector<1x8x8xbf16> to vector<8x8xbf16>
    %cst_25 = arith.constant dense<0.000000e+00> : vector<8x512xf32>
    %25 = tpu.matmul %24, %22, %cst_25 {dimension_numbers = #tpu.dot_dimension_numbers<[1], [0], [0], [1], [0, 0, 1, 1], [], []>} : vector<8x8xbf16>, vector<8x512xbf16>, vector<8x512xf32> -> vector<8x512xf32>
    %c1_26 = arith.constant 1 : index
    %c0_27 = arith.constant 0 : index
    %c0_28 = arith.constant 0 : index
    %26 = vector.load %arg4[%c1_26, %c0_27, %c0_28] : memref<27x1x512xf32, #tpu.memory_space<vmem>>, vector<1x1x512xf32>
    %27 = vector.shape_cast %26 : vector<1x1x512xf32> to vector<1x512xf32>
    %28 = vector.broadcast %27 : vector<1x512xf32> to vector<8x512xf32>
    %29 = arith.mulf %25, %28 : vector<8x512xf32>
    %30 = arith.addf %21, %29 : vector<8x512xf32>
    %c0_29 = arith.constant 0 : index
    %c57 = arith.constant 57 : index
    %31 = vector.load %arg6[%c0_29, %c57] : memref<8x768xbf16, #tpu.memory_space<vmem>>, vector<8x512xbf16>
    %c2 = arith.constant 2 : index
    %c0_30 = arith.constant 0 : index
    %c0_31 = arith.constant 0 : index
    %32 = vector.load %arg2[%c2, %c0_30, %c0_31] : memref<27x8x8xbf16, #tpu.memory_space<vmem>>, vector<1x8x8xbf16>
    %33 = vector.shape_cast %32 : vector<1x8x8xbf16> to vector<8x8xbf16>
    %cst_32 = arith.constant dense<0.000000e+00> : vector<8x512xf32>
    %34 = tpu.matmul %33, %31, %cst_32 {dimension_numbers = #tpu.dot_dimension_numbers<[1], [0], [0], [1], [0, 0, 1, 1], [], []>} : vector<8x8xbf16>, vector<8x512xbf16>, vector<8x512xf32> -> vector<8x512xf32>
    %c2_33 = arith.constant 2 : index
    %c0_34 = arith.constant 0 : index
    %c0_35 = arith.constant 0 : index
    %35 = vector.load %arg4[%c2_33, %c0_34, %c0_35] : memref<27x1x512xf32, #tpu.memory_space<vmem>>, vector<1x1x512xf32>
    %36 = vector.shape_cast %35 : vector<1x1x512xf32> to vector<1x512xf32>
    %37 = vector.broadcast %36 : vector<1x512xf32> to vector<8x512xf32>
    %38 = arith.mulf %34, %37 : vector<8x512xf32>
    %39 = arith.addf %30, %38 : vector<8x512xf32>
    %c0_36 = arith.constant 0 : index
    %c63 = arith.constant 63 : index
    %40 = vector.load %arg6[%c0_36, %c63] : memref<8x768xbf16, #tpu.memory_space<vmem>>, vector<8x512xbf16>
    %c3 = arith.constant 3 : index
    %c0_37 = arith.constant 0 : index
    %c0_38 = arith.constant 0 : index
    %41 = vector.load %arg2[%c3, %c0_37, %c0_38] : memref<27x8x8xbf16, #tpu.memory_space<vmem>>, vector<1x8x8xbf16>
    %42 = vector.shape_cast %41 : vector<1x8x8xbf16> to vector<8x8xbf16>
    %cst_39 = arith.constant dense<0.000000e+00> : vector<8x512xf32>
    %43 = tpu.matmul %42, %40, %cst_39 {dimension_numbers = #tpu.dot_dimension_numbers<[1], [0], [0], [1], [0, 0, 1, 1], [], []>} : vector<8x8xbf16>, vector<8x512xbf16>, vector<8x512xf32> -> vector<8x512xf32>
    %c3_40 = arith.constant 3 : index
    %c0_41 = arith.constant 0 : index
    %c0_42 = arith.constant 0 : index
    %44 = vector.load %arg4[%c3_40, %c0_41, %c0_42] : memref<27x1x512xf32, #tpu.memory_space<vmem>>, vector<1x1x512xf32>
    %45 = vector.shape_cast %44 : vector<1x1x512xf32> to vector<1x512xf32>
    %46 = vector.broadcast %45 : vector<1x512xf32> to vector<8x512xf32>
    %47 = arith.mulf %43, %46 : vector<8x512xf32>
    %48 = arith.addf %39, %47 : vector<8x512xf32>
    %c0_43 = arith.constant 0 : index
    %c64 = arith.constant 64 : index
    %49 = vector.load %arg6[%c0_43, %c64] : memref<8x768xbf16, #tpu.memory_space<vmem>>, vector<8x512xbf16>
    %c4 = arith.constant 4 : index
    %c0_44 = arith.constant 0 : index
    %c0_45 = arith.constant 0 : index
    %50 = vector.load %arg2[%c4, %c0_44, %c0_45] : memref<27x8x8xbf16, #tpu.memory_space<vmem>>, vector<1x8x8xbf16>
    %51 = vector.shape_cast %50 : vector<1x8x8xbf16> to vector<8x8xbf16>
    %cst_46 = arith.constant dense<0.000000e+00> : vector<8x512xf32>
    %52 = tpu.matmul %51, %49, %cst_46 {dimension_numbers = #tpu.dot_dimension_numbers<[1], [0], [0], [1], [0, 0, 1, 1], [], []>} : vector<8x8xbf16>, vector<8x512xbf16>, vector<8x512xf32> -> vector<8x512xf32>
    %c4_47 = arith.constant 4 : index
    %c0_48 = arith.constant 0 : index
    %c0_49 = arith.constant 0 : index
    %53 = vector.load %arg4[%c4_47, %c0_48, %c0_49] : memref<27x1x512xf32, #tpu.memory_space<vmem>>, vector<1x1x512xf32>
    %54 = vector.shape_cast %53 : vector<1x1x512xf32> to vector<1x512xf32>
    %55 = vector.broadcast %54 : vector<1x512xf32> to vector<8x512xf32>
    %56 = arith.mulf %52, %55 : vector<8x512xf32>
    %57 = arith.addf %48, %56 : vector<8x512xf32>
    %c0_50 = arith.constant 0 : index
    %c65 = arith.constant 65 : index
    %58 = vector.load %arg6[%c0_50, %c65] : memref<8x768xbf16, #tpu.memory_space<vmem>>, vector<8x512xbf16>
    %c5 = arith.constant 5 : index
    %c0_51 = arith.constant 0 : index
    %c0_52 = arith.constant 0 : index
    %59 = vector.load %arg2[%c5, %c0_51, %c0_52] : memref<27x8x8xbf16, #tpu.memory_space<vmem>>, vector<1x8x8xbf16>
    %60 = vector.shape_cast %59 : vector<1x8x8xbf16> to vector<8x8xbf16>
    %cst_53 = arith.constant dense<0.000000e+00> : vector<8x512xf32>
    %61 = tpu.matmul %60, %58, %cst_53 {dimension_numbers = #tpu.dot_dimension_numbers<[1], [0], [0], [1], [0, 0, 1, 1], [], []>} : vector<8x8xbf16>, vector<8x512xbf16>, vector<8x512xf32> -> vector<8x512xf32>
    %c5_54 = arith.constant 5 : index
    %c0_55 = arith.constant 0 : index
    %c0_56 = arith.constant 0 : index
    %62 = vector.load %arg4[%c5_54, %c0_55, %c0_56] : memref<27x1x512xf32, #tpu.memory_space<vmem>>, vector<1x1x512xf32>
    %63 = vector.shape_cast %62 : vector<1x1x512xf32> to vector<1x512xf32>
    %64 = vector.broadcast %63 : vector<1x512xf32> to vector<8x512xf32>
    %65 = arith.mulf %61, %64 : vector<8x512xf32>
    %66 = arith.addf %57, %65 : vector<8x512xf32>
    %c0_57 = arith.constant 0 : index
    %c71 = arith.constant 71 : index
    %67 = vector.load %arg6[%c0_57, %c71] : memref<8x768xbf16, #tpu.memory_space<vmem>>, vector<8x512xbf16>
    %c6 = arith.constant 6 : index
    %c0_58 = arith.constant 0 : index
    %c0_59 = arith.constant 0 : index
    %68 = vector.load %arg2[%c6, %c0_58, %c0_59] : memref<27x8x8xbf16, #tpu.memory_space<vmem>>, vector<1x8x8xbf16>
    %69 = vector.shape_cast %68 : vector<1x8x8xbf16> to vector<8x8xbf16>
    %cst_60 = arith.constant dense<0.000000e+00> : vector<8x512xf32>
    %70 = tpu.matmul %69, %67, %cst_60 {dimension_numbers = #tpu.dot_dimension_numbers<[1], [0], [0], [1], [0, 0, 1, 1], [], []>} : vector<8x8xbf16>, vector<8x512xbf16>, vector<8x512xf32> -> vector<8x512xf32>
    %c6_61 = arith.constant 6 : index
    %c0_62 = arith.constant 0 : index
    %c0_63 = arith.constant 0 : index
    %71 = vector.load %arg4[%c6_61, %c0_62, %c0_63] : memref<27x1x512xf32, #tpu.memory_space<vmem>>, vector<1x1x512xf32>
    %72 = vector.shape_cast %71 : vector<1x1x512xf32> to vector<1x512xf32>
    %73 = vector.broadcast %72 : vector<1x512xf32> to vector<8x512xf32>
    %74 = arith.mulf %70, %73 : vector<8x512xf32>
    %75 = arith.addf %66, %74 : vector<8x512xf32>
    %c0_64 = arith.constant 0 : index
    %c72 = arith.constant 72 : index
    %76 = vector.load %arg6[%c0_64, %c72] : memref<8x768xbf16, #tpu.memory_space<vmem>>, vector<8x512xbf16>
    %c7 = arith.constant 7 : index
    %c0_65 = arith.constant 0 : index
    %c0_66 = arith.constant 0 : index
    %77 = vector.load %arg2[%c7, %c0_65, %c0_66] : memref<27x8x8xbf16, #tpu.memory_space<vmem>>, vector<1x8x8xbf16>
    %78 = vector.shape_cast %77 : vector<1x8x8xbf16> to vector<8x8xbf16>
    %cst_67 = arith.constant dense<0.000000e+00> : vector<8x512xf32>
    %79 = tpu.matmul %78, %76, %cst_67 {dimension_numbers = #tpu.dot_dimension_numbers<[1], [0], [0], [1], [0, 0, 1, 1], [], []>} : vector<8x8xbf16>, vector<8x512xbf16>, vector<8x512xf32> -> vector<8x512xf32>
    %c7_68 = arith.constant 7 : index
    %c0_69 = arith.constant 0 : index
    %c0_70 = arith.constant 0 : index
    %80 = vector.load %arg4[%c7_68, %c0_69, %c0_70] : memref<27x1x512xf32, #tpu.memory_space<vmem>>, vector<1x1x512xf32>
    %81 = vector.shape_cast %80 : vector<1x1x512xf32> to vector<1x512xf32>
    %82 = vector.broadcast %81 : vector<1x512xf32> to vector<8x512xf32>
    %83 = arith.mulf %79, %82 : vector<8x512xf32>
    %84 = arith.addf %75, %83 : vector<8x512xf32>
    %c0_71 = arith.constant 0 : index
    %c73 = arith.constant 73 : index
    %85 = vector.load %arg6[%c0_71, %c73] : memref<8x768xbf16, #tpu.memory_space<vmem>>, vector<8x512xbf16>
    %c8 = arith.constant 8 : index
    %c0_72 = arith.constant 0 : index
    %c0_73 = arith.constant 0 : index
    %86 = vector.load %arg2[%c8, %c0_72, %c0_73] : memref<27x8x8xbf16, #tpu.memory_space<vmem>>, vector<1x8x8xbf16>
    %87 = vector.shape_cast %86 : vector<1x8x8xbf16> to vector<8x8xbf16>
    %cst_74 = arith.constant dense<0.000000e+00> : vector<8x512xf32>
    %88 = tpu.matmul %87, %85, %cst_74 {dimension_numbers = #tpu.dot_dimension_numbers<[1], [0], [0], [1], [0, 0, 1, 1], [], []>} : vector<8x8xbf16>, vector<8x512xbf16>, vector<8x512xf32> -> vector<8x512xf32>
    %c8_75 = arith.constant 8 : index
    %c0_76 = arith.constant 0 : index
    %c0_77 = arith.constant 0 : index
    %89 = vector.load %arg4[%c8_75, %c0_76, %c0_77] : memref<27x1x512xf32, #tpu.memory_space<vmem>>, vector<1x1x512xf32>
    %90 = vector.shape_cast %89 : vector<1x1x512xf32> to vector<1x512xf32>
    %91 = vector.broadcast %90 : vector<1x512xf32> to vector<8x512xf32>
    %92 = arith.mulf %88, %91 : vector<8x512xf32>
    %93 = arith.addf %84, %92 : vector<8x512xf32>
    %c0_78 = arith.constant 0 : index
    %c119 = arith.constant 119 : index
    %94 = vector.load %arg6[%c0_78, %c119] : memref<8x768xbf16, #tpu.memory_space<vmem>>, vector<8x512xbf16>
    %c9 = arith.constant 9 : index
    %c0_79 = arith.constant 0 : index
    %c0_80 = arith.constant 0 : index
    %95 = vector.load %arg2[%c9, %c0_79, %c0_80] : memref<27x8x8xbf16, #tpu.memory_space<vmem>>, vector<1x8x8xbf16>
    %96 = vector.shape_cast %95 : vector<1x8x8xbf16> to vector<8x8xbf16>
    %cst_81 = arith.constant dense<0.000000e+00> : vector<8x512xf32>
    %97 = tpu.matmul %96, %94, %cst_81 {dimension_numbers = #tpu.dot_dimension_numbers<[1], [0], [0], [1], [0, 0, 1, 1], [], []>} : vector<8x8xbf16>, vector<8x512xbf16>, vector<8x512xf32> -> vector<8x512xf32>
    %c9_82 = arith.constant 9 : index
    %c0_83 = arith.constant 0 : index
    %c0_84 = arith.constant 0 : index
    %98 = vector.load %arg4[%c9_82, %c0_83, %c0_84] : memref<27x1x512xf32, #tpu.memory_space<vmem>>, vector<1x1x512xf32>
    %99 = vector.shape_cast %98 : vector<1x1x512xf32> to vector<1x512xf32>
    %100 = vector.broadcast %99 : vector<1x512xf32> to vector<8x512xf32>
    %101 = arith.mulf %97, %100 : vector<8x512xf32>
    %102 = arith.addf %93, %101 : vector<8x512xf32>
    %c0_85 = arith.constant 0 : index
    %c120 = arith.constant 120 : index
    %103 = vector.load %arg6[%c0_85, %c120] : memref<8x768xbf16, #tpu.memory_space<vmem>>, vector<8x512xbf16>
    %c10 = arith.constant 10 : index
    %c0_86 = arith.constant 0 : index
    %c0_87 = arith.constant 0 : index
    %104 = vector.load %arg2[%c10, %c0_86, %c0_87] : memref<27x8x8xbf16, #tpu.memory_space<vmem>>, vector<1x8x8xbf16>
    %105 = vector.shape_cast %104 : vector<1x8x8xbf16> to vector<8x8xbf16>
    %cst_88 = arith.constant dense<0.000000e+00> : vector<8x512xf32>
    %106 = tpu.matmul %105, %103, %cst_88 {dimension_numbers = #tpu.dot_dimension_numbers<[1], [0], [0], [1], [0, 0, 1, 1], [], []>} : vector<8x8xbf16>, vector<8x512xbf16>, vector<8x512xf32> -> vector<8x512xf32>
    %c10_89 = arith.constant 10 : index
    %c0_90 = arith.constant 0 : index
    %c0_91 = arith.constant 0 : index
    %107 = vector.load %arg4[%c10_89, %c0_90, %c0_91] : memref<27x1x512xf32, #tpu.memory_space<vmem>>, vector<1x1x512xf32>
    %108 = vector.shape_cast %107 : vector<1x1x512xf32> to vector<1x512xf32>
    %109 = vector.broadcast %108 : vector<1x512xf32> to vector<8x512xf32>
    %110 = arith.mulf %106, %109 : vector<8x512xf32>
    %111 = arith.addf %102, %110 : vector<8x512xf32>
    %c0_92 = arith.constant 0 : index
    %c121 = arith.constant 121 : index
    %112 = vector.load %arg6[%c0_92, %c121] : memref<8x768xbf16, #tpu.memory_space<vmem>>, vector<8x512xbf16>
    %c11 = arith.constant 11 : index
    %c0_93 = arith.constant 0 : index
    %c0_94 = arith.constant 0 : index
    %113 = vector.load %arg2[%c11, %c0_93, %c0_94] : memref<27x8x8xbf16, #tpu.memory_space<vmem>>, vector<1x8x8xbf16>
    %114 = vector.shape_cast %113 : vector<1x8x8xbf16> to vector<8x8xbf16>
    %cst_95 = arith.constant dense<0.000000e+00> : vector<8x512xf32>
    %115 = tpu.matmul %114, %112, %cst_95 {dimension_numbers = #tpu.dot_dimension_numbers<[1], [0], [0], [1], [0, 0, 1, 1], [], []>} : vector<8x8xbf16>, vector<8x512xbf16>, vector<8x512xf32> -> vector<8x512xf32>
    %c11_96 = arith.constant 11 : index
    %c0_97 = arith.constant 0 : index
    %c0_98 = arith.constant 0 : index
    %116 = vector.load %arg4[%c11_96, %c0_97, %c0_98] : memref<27x1x512xf32, #tpu.memory_space<vmem>>, vector<1x1x512xf32>
    %117 = vector.shape_cast %116 : vector<1x1x512xf32> to vector<1x512xf32>
    %118 = vector.broadcast %117 : vector<1x512xf32> to vector<8x512xf32>
    %119 = arith.mulf %115, %118 : vector<8x512xf32>
    %120 = arith.addf %111, %119 : vector<8x512xf32>
    %c0_99 = arith.constant 0 : index
    %c127 = arith.constant 127 : index
    %121 = vector.load %arg6[%c0_99, %c127] : memref<8x768xbf16, #tpu.memory_space<vmem>>, vector<8x512xbf16>
    %c12 = arith.constant 12 : index
    %c0_100 = arith.constant 0 : index
    %c0_101 = arith.constant 0 : index
    %122 = vector.load %arg2[%c12, %c0_100, %c0_101] : memref<27x8x8xbf16, #tpu.memory_space<vmem>>, vector<1x8x8xbf16>
    %123 = vector.shape_cast %122 : vector<1x8x8xbf16> to vector<8x8xbf16>
    %cst_102 = arith.constant dense<0.000000e+00> : vector<8x512xf32>
    %124 = tpu.matmul %123, %121, %cst_102 {dimension_numbers = #tpu.dot_dimension_numbers<[1], [0], [0], [1], [0, 0, 1, 1], [], []>} : vector<8x8xbf16>, vector<8x512xbf16>, vector<8x512xf32> -> vector<8x512xf32>
    %c12_103 = arith.constant 12 : index
    %c0_104 = arith.constant 0 : index
    %c0_105 = arith.constant 0 : index
    %125 = vector.load %arg4[%c12_103, %c0_104, %c0_105] : memref<27x1x512xf32, #tpu.memory_space<vmem>>, vector<1x1x512xf32>
    %126 = vector.shape_cast %125 : vector<1x1x512xf32> to vector<1x512xf32>
    %127 = vector.broadcast %126 : vector<1x512xf32> to vector<8x512xf32>
    %128 = arith.mulf %124, %127 : vector<8x512xf32>
    %129 = arith.addf %120, %128 : vector<8x512xf32>
    %c0_106 = arith.constant 0 : index
    %c128_107 = arith.constant 128 : index
    %130 = vector.load %arg6[%c0_106, %c128_107] : memref<8x768xbf16, #tpu.memory_space<vmem>>, vector<8x512xbf16>
    %c13_108 = arith.constant 13 : index
    %c0_109 = arith.constant 0 : index
    %c0_110 = arith.constant 0 : index
    %131 = vector.load %arg2[%c13_108, %c0_109, %c0_110] : memref<27x8x8xbf16, #tpu.memory_space<vmem>>, vector<1x8x8xbf16>
    %132 = vector.shape_cast %131 : vector<1x8x8xbf16> to vector<8x8xbf16>
    %cst_111 = arith.constant dense<0.000000e+00> : vector<8x512xf32>
    %133 = tpu.matmul %132, %130, %cst_111 {dimension_numbers = #tpu.dot_dimension_numbers<[1], [0], [0], [1], [0, 0, 1, 1], [], []>} : vector<8x8xbf16>, vector<8x512xbf16>, vector<8x512xf32> -> vector<8x512xf32>
    %c13_112 = arith.constant 13 : index
    %c0_113 = arith.constant 0 : index
    %c0_114 = arith.constant 0 : index
    %134 = vector.load %arg4[%c13_112, %c0_113, %c0_114] : memref<27x1x512xf32, #tpu.memory_space<vmem>>, vector<1x1x512xf32>
    %135 = vector.shape_cast %134 : vector<1x1x512xf32> to vector<1x512xf32>
    %136 = vector.broadcast %135 : vector<1x512xf32> to vector<8x512xf32>
    %137 = arith.mulf %133, %136 : vector<8x512xf32>
    %138 = arith.addf %129, %137 : vector<8x512xf32>
    %c0_115 = arith.constant 0 : index
    %c129 = arith.constant 129 : index
    %139 = vector.load %arg6[%c0_115, %c129] : memref<8x768xbf16, #tpu.memory_space<vmem>>, vector<8x512xbf16>
    %c14 = arith.constant 14 : index
    %c0_116 = arith.constant 0 : index
    %c0_117 = arith.constant 0 : index
    %140 = vector.load %arg2[%c14, %c0_116, %c0_117] : memref<27x8x8xbf16, #tpu.memory_space<vmem>>, vector<1x8x8xbf16>
    %141 = vector.shape_cast %140 : vector<1x8x8xbf16> to vector<8x8xbf16>
    %cst_118 = arith.constant dense<0.000000e+00> : vector<8x512xf32>
    %142 = tpu.matmul %141, %139, %cst_118 {dimension_numbers = #tpu.dot_dimension_numbers<[1], [0], [0], [1], [0, 0, 1, 1], [], []>} : vector<8x8xbf16>, vector<8x512xbf16>, vector<8x512xf32> -> vector<8x512xf32>
    %c14_119 = arith.constant 14 : index
    %c0_120 = arith.constant 0 : index
    %c0_121 = arith.constant 0 : index
    %143 = vector.load %arg4[%c14_119, %c0_120, %c0_121] : memref<27x1x512xf32, #tpu.memory_space<vmem>>, vector<1x1x512xf32>
    %144 = vector.shape_cast %143 : vector<1x1x512xf32> to vector<1x512xf32>
    %145 = vector.broadcast %144 : vector<1x512xf32> to vector<8x512xf32>
    %146 = arith.mulf %142, %145 : vector<8x512xf32>
    %147 = arith.addf %138, %146 : vector<8x512xf32>
    %c0_122 = arith.constant 0 : index
    %c135 = arith.constant 135 : index
    %148 = vector.load %arg6[%c0_122, %c135] : memref<8x768xbf16, #tpu.memory_space<vmem>>, vector<8x512xbf16>
    %c15 = arith.constant 15 : index
    %c0_123 = arith.constant 0 : index
    %c0_124 = arith.constant 0 : index
    %149 = vector.load %arg2[%c15, %c0_123, %c0_124] : memref<27x8x8xbf16, #tpu.memory_space<vmem>>, vector<1x8x8xbf16>
    %150 = vector.shape_cast %149 : vector<1x8x8xbf16> to vector<8x8xbf16>
    %cst_125 = arith.constant dense<0.000000e+00> : vector<8x512xf32>
    %151 = tpu.matmul %150, %148, %cst_125 {dimension_numbers = #tpu.dot_dimension_numbers<[1], [0], [0], [1], [0, 0, 1, 1], [], []>} : vector<8x8xbf16>, vector<8x512xbf16>, vector<8x512xf32> -> vector<8x512xf32>
    %c15_126 = arith.constant 15 : index
    %c0_127 = arith.constant 0 : index
    %c0_128 = arith.constant 0 : index
    %152 = vector.load %arg4[%c15_126, %c0_127, %c0_128] : memref<27x1x512xf32, #tpu.memory_space<vmem>>, vector<1x1x512xf32>
    %153 = vector.shape_cast %152 : vector<1x1x512xf32> to vector<1x512xf32>
    %154 = vector.broadcast %153 : vector<1x512xf32> to vector<8x512xf32>
    %155 = arith.mulf %151, %154 : vector<8x512xf32>
    %156 = arith.addf %147, %155 : vector<8x512xf32>
    %c0_129 = arith.constant 0 : index
    %c136 = arith.constant 136 : index
    %157 = vector.load %arg6[%c0_129, %c136] : memref<8x768xbf16, #tpu.memory_space<vmem>>, vector<8x512xbf16>
    %c16 = arith.constant 16 : index
    %c0_130 = arith.constant 0 : index
    %c0_131 = arith.constant 0 : index
    %158 = vector.load %arg2[%c16, %c0_130, %c0_131] : memref<27x8x8xbf16, #tpu.memory_space<vmem>>, vector<1x8x8xbf16>
    %159 = vector.shape_cast %158 : vector<1x8x8xbf16> to vector<8x8xbf16>
    %cst_132 = arith.constant dense<0.000000e+00> : vector<8x512xf32>
    %160 = tpu.matmul %159, %157, %cst_132 {dimension_numbers = #tpu.dot_dimension_numbers<[1], [0], [0], [1], [0, 0, 1, 1], [], []>} : vector<8x8xbf16>, vector<8x512xbf16>, vector<8x512xf32> -> vector<8x512xf32>
    %c16_133 = arith.constant 16 : index
    %c0_134 = arith.constant 0 : index
    %c0_135 = arith.constant 0 : index
    %161 = vector.load %arg4[%c16_133, %c0_134, %c0_135] : memref<27x1x512xf32, #tpu.memory_space<vmem>>, vector<1x1x512xf32>
    %162 = vector.shape_cast %161 : vector<1x1x512xf32> to vector<1x512xf32>
    %163 = vector.broadcast %162 : vector<1x512xf32> to vector<8x512xf32>
    %164 = arith.mulf %160, %163 : vector<8x512xf32>
    %165 = arith.addf %156, %164 : vector<8x512xf32>
    %c0_136 = arith.constant 0 : index
    %c137 = arith.constant 137 : index
    %166 = vector.load %arg6[%c0_136, %c137] : memref<8x768xbf16, #tpu.memory_space<vmem>>, vector<8x512xbf16>
    %c17 = arith.constant 17 : index
    %c0_137 = arith.constant 0 : index
    %c0_138 = arith.constant 0 : index
    %167 = vector.load %arg2[%c17, %c0_137, %c0_138] : memref<27x8x8xbf16, #tpu.memory_space<vmem>>, vector<1x8x8xbf16>
    %168 = vector.shape_cast %167 : vector<1x8x8xbf16> to vector<8x8xbf16>
    %cst_139 = arith.constant dense<0.000000e+00> : vector<8x512xf32>
    %169 = tpu.matmul %168, %166, %cst_139 {dimension_numbers = #tpu.dot_dimension_numbers<[1], [0], [0], [1], [0, 0, 1, 1], [], []>} : vector<8x8xbf16>, vector<8x512xbf16>, vector<8x512xf32> -> vector<8x512xf32>
    %c17_140 = arith.constant 17 : index
    %c0_141 = arith.constant 0 : index
    %c0_142 = arith.constant 0 : index
    %170 = vector.load %arg4[%c17_140, %c0_141, %c0_142] : memref<27x1x512xf32, #tpu.memory_space<vmem>>, vector<1x1x512xf32>
    %171 = vector.shape_cast %170 : vector<1x1x512xf32> to vector<1x512xf32>
    %172 = vector.broadcast %171 : vector<1x512xf32> to vector<8x512xf32>
    %173 = arith.mulf %169, %172 : vector<8x512xf32>
    %174 = arith.addf %165, %173 : vector<8x512xf32>
    %c0_143 = arith.constant 0 : index
    %c183 = arith.constant 183 : index
    %175 = vector.load %arg6[%c0_143, %c183] : memref<8x768xbf16, #tpu.memory_space<vmem>>, vector<8x512xbf16>
    %c18 = arith.constant 18 : index
    %c0_144 = arith.constant 0 : index
    %c0_145 = arith.constant 0 : index
    %176 = vector.load %arg2[%c18, %c0_144, %c0_145] : memref<27x8x8xbf16, #tpu.memory_space<vmem>>, vector<1x8x8xbf16>
    %177 = vector.shape_cast %176 : vector<1x8x8xbf16> to vector<8x8xbf16>
    %cst_146 = arith.constant dense<0.000000e+00> : vector<8x512xf32>
    %178 = tpu.matmul %177, %175, %cst_146 {dimension_numbers = #tpu.dot_dimension_numbers<[1], [0], [0], [1], [0, 0, 1, 1], [], []>} : vector<8x8xbf16>, vector<8x512xbf16>, vector<8x512xf32> -> vector<8x512xf32>
    %c18_147 = arith.constant 18 : index
    %c0_148 = arith.constant 0 : index
    %c0_149 = arith.constant 0 : index
    %179 = vector.load %arg4[%c18_147, %c0_148, %c0_149] : memref<27x1x512xf32, #tpu.memory_space<vmem>>, vector<1x1x512xf32>
    %180 = vector.shape_cast %179 : vector<1x1x512xf32> to vector<1x512xf32>
    %181 = vector.broadcast %180 : vector<1x512xf32> to vector<8x512xf32>
    %182 = arith.mulf %178, %181 : vector<8x512xf32>
    %183 = arith.addf %174, %182 : vector<8x512xf32>
    %c0_150 = arith.constant 0 : index
    %c184 = arith.constant 184 : index
    %184 = vector.load %arg6[%c0_150, %c184] : memref<8x768xbf16, #tpu.memory_space<vmem>>, vector<8x512xbf16>
    %c19 = arith.constant 19 : index
    %c0_151 = arith.constant 0 : index
    %c0_152 = arith.constant 0 : index
    %185 = vector.load %arg2[%c19, %c0_151, %c0_152] : memref<27x8x8xbf16, #tpu.memory_space<vmem>>, vector<1x8x8xbf16>
    %186 = vector.shape_cast %185 : vector<1x8x8xbf16> to vector<8x8xbf16>
    %cst_153 = arith.constant dense<0.000000e+00> : vector<8x512xf32>
    %187 = tpu.matmul %186, %184, %cst_153 {dimension_numbers = #tpu.dot_dimension_numbers<[1], [0], [0], [1], [0, 0, 1, 1], [], []>} : vector<8x8xbf16>, vector<8x512xbf16>, vector<8x512xf32> -> vector<8x512xf32>
    %c19_154 = arith.constant 19 : index
    %c0_155 = arith.constant 0 : index
    %c0_156 = arith.constant 0 : index
    %188 = vector.load %arg4[%c19_154, %c0_155, %c0_156] : memref<27x1x512xf32, #tpu.memory_space<vmem>>, vector<1x1x512xf32>
    %189 = vector.shape_cast %188 : vector<1x1x512xf32> to vector<1x512xf32>
    %190 = vector.broadcast %189 : vector<1x512xf32> to vector<8x512xf32>
    %191 = arith.mulf %187, %190 : vector<8x512xf32>
    %192 = arith.addf %183, %191 : vector<8x512xf32>
    %c0_157 = arith.constant 0 : index
    %c185 = arith.constant 185 : index
    %193 = vector.load %arg6[%c0_157, %c185] : memref<8x768xbf16, #tpu.memory_space<vmem>>, vector<8x512xbf16>
    %c20 = arith.constant 20 : index
    %c0_158 = arith.constant 0 : index
    %c0_159 = arith.constant 0 : index
    %194 = vector.load %arg2[%c20, %c0_158, %c0_159] : memref<27x8x8xbf16, #tpu.memory_space<vmem>>, vector<1x8x8xbf16>
    %195 = vector.shape_cast %194 : vector<1x8x8xbf16> to vector<8x8xbf16>
    %cst_160 = arith.constant dense<0.000000e+00> : vector<8x512xf32>
    %196 = tpu.matmul %195, %193, %cst_160 {dimension_numbers = #tpu.dot_dimension_numbers<[1], [0], [0], [1], [0, 0, 1, 1], [], []>} : vector<8x8xbf16>, vector<8x512xbf16>, vector<8x512xf32> -> vector<8x512xf32>
    %c20_161 = arith.constant 20 : index
    %c0_162 = arith.constant 0 : index
    %c0_163 = arith.constant 0 : index
    %197 = vector.load %arg4[%c20_161, %c0_162, %c0_163] : memref<27x1x512xf32, #tpu.memory_space<vmem>>, vector<1x1x512xf32>
    %198 = vector.shape_cast %197 : vector<1x1x512xf32> to vector<1x512xf32>
    %199 = vector.broadcast %198 : vector<1x512xf32> to vector<8x512xf32>
    %200 = arith.mulf %196, %199 : vector<8x512xf32>
    %201 = arith.addf %192, %200 : vector<8x512xf32>
    %c0_164 = arith.constant 0 : index
    %c191 = arith.constant 191 : index
    %202 = vector.load %arg6[%c0_164, %c191] : memref<8x768xbf16, #tpu.memory_space<vmem>>, vector<8x512xbf16>
    %c21 = arith.constant 21 : index
    %c0_165 = arith.constant 0 : index
    %c0_166 = arith.constant 0 : index
    %203 = vector.load %arg2[%c21, %c0_165, %c0_166] : memref<27x8x8xbf16, #tpu.memory_space<vmem>>, vector<1x8x8xbf16>
    %204 = vector.shape_cast %203 : vector<1x8x8xbf16> to vector<8x8xbf16>
    %cst_167 = arith.constant dense<0.000000e+00> : vector<8x512xf32>
    %205 = tpu.matmul %204, %202, %cst_167 {dimension_numbers = #tpu.dot_dimension_numbers<[1], [0], [0], [1], [0, 0, 1, 1], [], []>} : vector<8x8xbf16>, vector<8x512xbf16>, vector<8x512xf32> -> vector<8x512xf32>
    %c21_168 = arith.constant 21 : index
    %c0_169 = arith.constant 0 : index
    %c0_170 = arith.constant 0 : index
    %206 = vector.load %arg4[%c21_168, %c0_169, %c0_170] : memref<27x1x512xf32, #tpu.memory_space<vmem>>, vector<1x1x512xf32>
    %207 = vector.shape_cast %206 : vector<1x1x512xf32> to vector<1x512xf32>
    %208 = vector.broadcast %207 : vector<1x512xf32> to vector<8x512xf32>
    %209 = arith.mulf %205, %208 : vector<8x512xf32>
    %210 = arith.addf %201, %209 : vector<8x512xf32>
    %c0_171 = arith.constant 0 : index
    %c192 = arith.constant 192 : index
    %211 = vector.load %arg6[%c0_171, %c192] : memref<8x768xbf16, #tpu.memory_space<vmem>>, vector<8x512xbf16>
    %c22 = arith.constant 22 : index
    %c0_172 = arith.constant 0 : index
    %c0_173 = arith.constant 0 : index
    %212 = vector.load %arg2[%c22, %c0_172, %c0_173] : memref<27x8x8xbf16, #tpu.memory_space<vmem>>, vector<1x8x8xbf16>
    %213 = vector.shape_cast %212 : vector<1x8x8xbf16> to vector<8x8xbf16>
    %cst_174 = arith.constant dense<0.000000e+00> : vector<8x512xf32>
    %214 = tpu.matmul %213, %211, %cst_174 {dimension_numbers = #tpu.dot_dimension_numbers<[1], [0], [0], [1], [0, 0, 1, 1], [], []>} : vector<8x8xbf16>, vector<8x512xbf16>, vector<8x512xf32> -> vector<8x512xf32>
    %c22_175 = arith.constant 22 : index
    %c0_176 = arith.constant 0 : index
    %c0_177 = arith.constant 0 : index
    %215 = vector.load %arg4[%c22_175, %c0_176, %c0_177] : memref<27x1x512xf32, #tpu.memory_space<vmem>>, vector<1x1x512xf32>
    %216 = vector.shape_cast %215 : vector<1x1x512xf32> to vector<1x512xf32>
    %217 = vector.broadcast %216 : vector<1x512xf32> to vector<8x512xf32>
    %218 = arith.mulf %214, %217 : vector<8x512xf32>
    %219 = arith.addf %210, %218 : vector<8x512xf32>
    %c0_178 = arith.constant 0 : index
    %c193 = arith.constant 193 : index
    %220 = vector.load %arg6[%c0_178, %c193] : memref<8x768xbf16, #tpu.memory_space<vmem>>, vector<8x512xbf16>
    %c23 = arith.constant 23 : index
    %c0_179 = arith.constant 0 : index
    %c0_180 = arith.constant 0 : index
    %221 = vector.load %arg2[%c23, %c0_179, %c0_180] : memref<27x8x8xbf16, #tpu.memory_space<vmem>>, vector<1x8x8xbf16>
    %222 = vector.shape_cast %221 : vector<1x8x8xbf16> to vector<8x8xbf16>
    %cst_181 = arith.constant dense<0.000000e+00> : vector<8x512xf32>
    %223 = tpu.matmul %222, %220, %cst_181 {dimension_numbers = #tpu.dot_dimension_numbers<[1], [0], [0], [1], [0, 0, 1, 1], [], []>} : vector<8x8xbf16>, vector<8x512xbf16>, vector<8x512xf32> -> vector<8x512xf32>
    %c23_182 = arith.constant 23 : index
    %c0_183 = arith.constant 0 : index
    %c0_184 = arith.constant 0 : index
    %224 = vector.load %arg4[%c23_182, %c0_183, %c0_184] : memref<27x1x512xf32, #tpu.memory_space<vmem>>, vector<1x1x512xf32>
    %225 = vector.shape_cast %224 : vector<1x1x512xf32> to vector<1x512xf32>
    %226 = vector.broadcast %225 : vector<1x512xf32> to vector<8x512xf32>
    %227 = arith.mulf %223, %226 : vector<8x512xf32>
    %228 = arith.addf %219, %227 : vector<8x512xf32>
    %c0_185 = arith.constant 0 : index
    %c199 = arith.constant 199 : index
    %229 = vector.load %arg6[%c0_185, %c199] : memref<8x768xbf16, #tpu.memory_space<vmem>>, vector<8x512xbf16>
    %c24 = arith.constant 24 : index
    %c0_186 = arith.constant 0 : index
    %c0_187 = arith.constant 0 : index
    %230 = vector.load %arg2[%c24, %c0_186, %c0_187] : memref<27x8x8xbf16, #tpu.memory_space<vmem>>, vector<1x8x8xbf16>
    %231 = vector.shape_cast %230 : vector<1x8x8xbf16> to vector<8x8xbf16>
    %cst_188 = arith.constant dense<0.000000e+00> : vector<8x512xf32>
    %232 = tpu.matmul %231, %229, %cst_188 {dimension_numbers = #tpu.dot_dimension_numbers<[1], [0], [0], [1], [0, 0, 1, 1], [], []>} : vector<8x8xbf16>, vector<8x512xbf16>, vector<8x512xf32> -> vector<8x512xf32>
    %c24_189 = arith.constant 24 : index
    %c0_190 = arith.constant 0 : index
    %c0_191 = arith.constant 0 : index
    %233 = vector.load %arg4[%c24_189, %c0_190, %c0_191] : memref<27x1x512xf32, #tpu.memory_space<vmem>>, vector<1x1x512xf32>
    %234 = vector.shape_cast %233 : vector<1x1x512xf32> to vector<1x512xf32>
    %235 = vector.broadcast %234 : vector<1x512xf32> to vector<8x512xf32>
    %236 = arith.mulf %232, %235 : vector<8x512xf32>
    %237 = arith.addf %228, %236 : vector<8x512xf32>
    %c0_192 = arith.constant 0 : index
    %c200 = arith.constant 200 : index
    %238 = vector.load %arg6[%c0_192, %c200] : memref<8x768xbf16, #tpu.memory_space<vmem>>, vector<8x512xbf16>
    %c25 = arith.constant 25 : index
    %c0_193 = arith.constant 0 : index
    %c0_194 = arith.constant 0 : index
    %239 = vector.load %arg2[%c25, %c0_193, %c0_194] : memref<27x8x8xbf16, #tpu.memory_space<vmem>>, vector<1x8x8xbf16>
    %240 = vector.shape_cast %239 : vector<1x8x8xbf16> to vector<8x8xbf16>
    %cst_195 = arith.constant dense<0.000000e+00> : vector<8x512xf32>
    %241 = tpu.matmul %240, %238, %cst_195 {dimension_numbers = #tpu.dot_dimension_numbers<[1], [0], [0], [1], [0, 0, 1, 1], [], []>} : vector<8x8xbf16>, vector<8x512xbf16>, vector<8x512xf32> -> vector<8x512xf32>
    %c25_196 = arith.constant 25 : index
    %c0_197 = arith.constant 0 : index
    %c0_198 = arith.constant 0 : index
    %242 = vector.load %arg4[%c25_196, %c0_197, %c0_198] : memref<27x1x512xf32, #tpu.memory_space<vmem>>, vector<1x1x512xf32>
    %243 = vector.shape_cast %242 : vector<1x1x512xf32> to vector<1x512xf32>
    %244 = vector.broadcast %243 : vector<1x512xf32> to vector<8x512xf32>
    %245 = arith.mulf %241, %244 : vector<8x512xf32>
    %246 = arith.addf %237, %245 : vector<8x512xf32>
    %c0_199 = arith.constant 0 : index
    %c201 = arith.constant 201 : index
    %247 = vector.load %arg6[%c0_199, %c201] : memref<8x768xbf16, #tpu.memory_space<vmem>>, vector<8x512xbf16>
    %c26 = arith.constant 26 : index
    %c0_200 = arith.constant 0 : index
    %c0_201 = arith.constant 0 : index
    %248 = vector.load %arg2[%c26, %c0_200, %c0_201] : memref<27x8x8xbf16, #tpu.memory_space<vmem>>, vector<1x8x8xbf16>
    %249 = vector.shape_cast %248 : vector<1x8x8xbf16> to vector<8x8xbf16>
    %cst_202 = arith.constant dense<0.000000e+00> : vector<8x512xf32>
    %250 = tpu.matmul %249, %247, %cst_202 {dimension_numbers = #tpu.dot_dimension_numbers<[1], [0], [0], [1], [0, 0, 1, 1], [], []>} : vector<8x8xbf16>, vector<8x512xbf16>, vector<8x512xf32> -> vector<8x512xf32>
    %c26_203 = arith.constant 26 : index
    %c0_204 = arith.constant 0 : index
    %c0_205 = arith.constant 0 : index
    %251 = vector.load %arg4[%c26_203, %c0_204, %c0_205] : memref<27x1x512xf32, #tpu.memory_space<vmem>>, vector<1x1x512xf32>
    %252 = vector.shape_cast %251 : vector<1x1x512xf32> to vector<1x512xf32>
    %253 = vector.broadcast %252 : vector<1x512xf32> to vector<8x512xf32>
    %254 = arith.mulf %250, %253 : vector<8x512xf32>
    %255 = arith.addf %246, %254 : vector<8x512xf32>
    %cst_206 = arith.constant dense<0.000000e+00> : vector<8xf32>
    %256 = vector.multi_reduction <add>, %255, %cst_206 [1] : vector<8x512xf32> to vector<8xf32>
    %257 = vector.shape_cast %256 : vector<8xf32> to vector<8x1xf32>
    %cst_207 = arith.constant 0.001953125 : f32
    %258 = vector.broadcast %cst_207 : f32 to vector<8x1xf32>
    %259 = arith.mulf %257, %258 : vector<8x1xf32>
    %260 = vector.broadcast %259 : vector<8x1xf32> to vector<8x512xf32>
    %261 = arith.subf %255, %260 : vector<8x512xf32>
    %262 = arith.mulf %261, %261 : vector<8x512xf32>
    %263 = vector.broadcast %1 : vector<1x512xf32> to vector<8x512xf32>
    %264 = arith.mulf %262, %263 : vector<8x512xf32>
    %cst_208 = arith.constant dense<0.000000e+00> : vector<8xf32>
    %265 = vector.multi_reduction <add>, %264, %cst_208 [1] : vector<8x512xf32> to vector<8xf32>
    %266 = vector.shape_cast %265 : vector<8xf32> to vector<8x1xf32>
    %cst_209 = arith.constant 0.001953125 : f32
    %267 = vector.broadcast %cst_209 : f32 to vector<8x1xf32>
    %268 = arith.mulf %266, %267 : vector<8x1xf32>
    %cst_210 = arith.constant 9.99999974E-6 : f32
    %269 = vector.broadcast %cst_210 : f32 to vector<8x1xf32>
    %270 = arith.addf %268, %269 : vector<8x1xf32>
    %271 = math.rsqrt %270 : vector<8x1xf32>
    %272 = vector.broadcast %271 : vector<8x1xf32> to vector<8x512xf32>
    %273 = arith.mulf %261, %272 : vector<8x512xf32>
    %cst_211 = arith.constant 0.000000e+00 : f32
    %274 = vector.broadcast %cst_211 : f32 to vector<8x512xf32>
    %275 = arith.maximumf %273, %274 : vector<8x512xf32>
    %276 = arith.truncf %275 : vector<8x512xf32> to vector<8x512xbf16>
    %c0_212 = arith.constant 0 : index
    %c128_213 = arith.constant 128 : index
    %277 = vector.load %arg7[%c0_212, %c128_213] : memref<8x768xbf16, #tpu.memory_space<vmem>>, vector<8x512xbf16>
    tpu.vector_store %arg7[%c0_212, %c128_213], %276 {strides = array<i32>} : memref<8x768xbf16, #tpu.memory_space<vmem>>, vector<8x512xbf16>,
    %cst_214 = arith.constant 0.000000e+00 : f32
    %278 = vector.broadcast %cst_214 : f32 to vector<8x512xf32>
    %c0_215 = arith.constant 0 : index
    %c55_216 = arith.constant 55 : index
    %279 = vector.load %arg7[%c0_215, %c55_216] : memref<8x768xbf16, #tpu.memory_space<vmem>>, vector<8x512xbf16>
    %c0_217 = arith.constant 0 : index
    %c0_218 = arith.constant 0 : index
    %c0_219 = arith.constant 0 : index
    %280 = vector.load %arg3[%c0_217, %c0_218, %c0_219] : memref<27x8x8xbf16, #tpu.memory_space<vmem>>, vector<1x8x8xbf16>
    %281 = vector.shape_cast %280 : vector<1x8x8xbf16> to vector<8x8xbf16>
    %cst_220 = arith.constant dense<0.000000e+00> : vector<8x512xf32>
    %282 = tpu.matmul %281, %279, %cst_220 {dimension_numbers = #tpu.dot_dimension_numbers<[1], [0], [0], [1], [0, 0, 1, 1], [], []>} : vector<8x8xbf16>, vector<8x512xbf16>, vector<8x512xf32> -> vector<8x512xf32>
    %c0_221 = arith.constant 0 : index
    %c0_222 = arith.constant 0 : index
    %c0_223 = arith.constant 0 : index
    %283 = vector.load %arg4[%c0_221, %c0_222, %c0_223] : memref<27x1x512xf32, #tpu.memory_space<vmem>>, vector<1x1x512xf32>
    %284 = vector.shape_cast %283 : vector<1x1x512xf32> to vector<1x512xf32>
    %285 = vector.broadcast %284 : vector<1x512xf32> to vector<8x512xf32>
    %286 = arith.mulf %282, %285 : vector<8x512xf32>
    %287 = arith.addf %278, %286 : vector<8x512xf32>
    %c0_224 = arith.constant 0 : index
    %c56_225 = arith.constant 56 : index
    %288 = vector.load %arg7[%c0_224, %c56_225] : memref<8x768xbf16, #tpu.memory_space<vmem>>, vector<8x512xbf16>
    %c1_226 = arith.constant 1 : index
    %c0_227 = arith.constant 0 : index
    %c0_228 = arith.constant 0 : index
    %289 = vector.load %arg3[%c1_226, %c0_227, %c0_228] : memref<27x8x8xbf16, #tpu.memory_space<vmem>>, vector<1x8x8xbf16>
    %290 = vector.shape_cast %289 : vector<1x8x8xbf16> to vector<8x8xbf16>
    %cst_229 = arith.constant dense<0.000000e+00> : vector<8x512xf32>
    %291 = tpu.matmul %290, %288, %cst_229 {dimension_numbers = #tpu.dot_dimension_numbers<[1], [0], [0], [1], [0, 0, 1, 1], [], []>} : vector<8x8xbf16>, vector<8x512xbf16>, vector<8x512xf32> -> vector<8x512xf32>
    %c1_230 = arith.constant 1 : index
    %c0_231 = arith.constant 0 : index
    %c0_232 = arith.constant 0 : index
    %292 = vector.load %arg4[%c1_230, %c0_231, %c0_232] : memref<27x1x512xf32, #tpu.memory_space<vmem>>, vector<1x1x512xf32>
    %293 = vector.shape_cast %292 : vector<1x1x512xf32> to vector<1x512xf32>
    %294 = vector.broadcast %293 : vector<1x512xf32> to vector<8x512xf32>
    %295 = arith.mulf %291, %294 : vector<8x512xf32>
    %296 = arith.addf %287, %295 : vector<8x512xf32>
    %c0_233 = arith.constant 0 : index
    %c57_234 = arith.constant 57 : index
    %297 = vector.load %arg7[%c0_233, %c57_234] : memref<8x768xbf16, #tpu.memory_space<vmem>>, vector<8x512xbf16>
    %c2_235 = arith.constant 2 : index
    %c0_236 = arith.constant 0 : index
    %c0_237 = arith.constant 0 : index
    %298 = vector.load %arg3[%c2_235, %c0_236, %c0_237] : memref<27x8x8xbf16, #tpu.memory_space<vmem>>, vector<1x8x8xbf16>
    %299 = vector.shape_cast %298 : vector<1x8x8xbf16> to vector<8x8xbf16>
    %cst_238 = arith.constant dense<0.000000e+00> : vector<8x512xf32>
    %300 = tpu.matmul %299, %297, %cst_238 {dimension_numbers = #tpu.dot_dimension_numbers<[1], [0], [0], [1], [0, 0, 1, 1], [], []>} : vector<8x8xbf16>, vector<8x512xbf16>, vector<8x512xf32> -> vector<8x512xf32>
    %c2_239 = arith.constant 2 : index
    %c0_240 = arith.constant 0 : index
    %c0_241 = arith.constant 0 : index
    %301 = vector.load %arg4[%c2_239, %c0_240, %c0_241] : memref<27x1x512xf32, #tpu.memory_space<vmem>>, vector<1x1x512xf32>
    %302 = vector.shape_cast %301 : vector<1x1x512xf32> to vector<1x512xf32>
    %303 = vector.broadcast %302 : vector<1x512xf32> to vector<8x512xf32>
    %304 = arith.mulf %300, %303 : vector<8x512xf32>
    %305 = arith.addf %296, %304 : vector<8x512xf32>
    %c0_242 = arith.constant 0 : index
    %c63_243 = arith.constant 63 : index
    %306 = vector.load %arg7[%c0_242, %c63_243] : memref<8x768xbf16, #tpu.memory_space<vmem>>, vector<8x512xbf16>
    %c3_244 = arith.constant 3 : index
    %c0_245 = arith.constant 0 : index
    %c0_246 = arith.constant 0 : index
    %307 = vector.load %arg3[%c3_244, %c0_245, %c0_246] : memref<27x8x8xbf16, #tpu.memory_space<vmem>>, vector<1x8x8xbf16>
    %308 = vector.shape_cast %307 : vector<1x8x8xbf16> to vector<8x8xbf16>
    %cst_247 = arith.constant dense<0.000000e+00> : vector<8x512xf32>
    %309 = tpu.matmul %308, %306, %cst_247 {dimension_numbers = #tpu.dot_dimension_numbers<[1], [0], [0], [1], [0, 0, 1, 1], [], []>} : vector<8x8xbf16>, vector<8x512xbf16>, vector<8x512xf32> -> vector<8x512xf32>
    %c3_248 = arith.constant 3 : index
    %c0_249 = arith.constant 0 : index
    %c0_250 = arith.constant 0 : index
    %310 = vector.load %arg4[%c3_248, %c0_249, %c0_250] : memref<27x1x512xf32, #tpu.memory_space<vmem>>, vector<1x1x512xf32>
    %311 = vector.shape_cast %310 : vector<1x1x512xf32> to vector<1x512xf32>
    %312 = vector.broadcast %311 : vector<1x512xf32> to vector<8x512xf32>
    %313 = arith.mulf %309, %312 : vector<8x512xf32>
    %314 = arith.addf %305, %313 : vector<8x512xf32>
    %c0_251 = arith.constant 0 : index
    %c64_252 = arith.constant 64 : index
    %315 = vector.load %arg7[%c0_251, %c64_252] : memref<8x768xbf16, #tpu.memory_space<vmem>>, vector<8x512xbf16>
    %c4_253 = arith.constant 4 : index
    %c0_254 = arith.constant 0 : index
    %c0_255 = arith.constant 0 : index
    %316 = vector.load %arg3[%c4_253, %c0_254, %c0_255] : memref<27x8x8xbf16, #tpu.memory_space<vmem>>, vector<1x8x8xbf16>
    %317 = vector.shape_cast %316 : vector<1x8x8xbf16> to vector<8x8xbf16>
    %cst_256 = arith.constant dense<0.000000e+00> : vector<8x512xf32>
    %318 = tpu.matmul %317, %315, %cst_256 {dimension_numbers = #tpu.dot_dimension_numbers<[1], [0], [0], [1], [0, 0, 1, 1], [], []>} : vector<8x8xbf16>, vector<8x512xbf16>, vector<8x512xf32> -> vector<8x512xf32>
    %c4_257 = arith.constant 4 : index
    %c0_258 = arith.constant 0 : index
    %c0_259 = arith.constant 0 : index
    %319 = vector.load %arg4[%c4_257, %c0_258, %c0_259] : memref<27x1x512xf32, #tpu.memory_space<vmem>>, vector<1x1x512xf32>
    %320 = vector.shape_cast %319 : vector<1x1x512xf32> to vector<1x512xf32>
    %321 = vector.broadcast %320 : vector<1x512xf32> to vector<8x512xf32>
    %322 = arith.mulf %318, %321 : vector<8x512xf32>
    %323 = arith.addf %314, %322 : vector<8x512xf32>
    %c0_260 = arith.constant 0 : index
    %c65_261 = arith.constant 65 : index
    %324 = vector.load %arg7[%c0_260, %c65_261] : memref<8x768xbf16, #tpu.memory_space<vmem>>, vector<8x512xbf16>
    %c5_262 = arith.constant 5 : index
    %c0_263 = arith.constant 0 : index
    %c0_264 = arith.constant 0 : index
    %325 = vector.load %arg3[%c5_262, %c0_263, %c0_264] : memref<27x8x8xbf16, #tpu.memory_space<vmem>>, vector<1x8x8xbf16>
    %326 = vector.shape_cast %325 : vector<1x8x8xbf16> to vector<8x8xbf16>
    %cst_265 = arith.constant dense<0.000000e+00> : vector<8x512xf32>
    %327 = tpu.matmul %326, %324, %cst_265 {dimension_numbers = #tpu.dot_dimension_numbers<[1], [0], [0], [1], [0, 0, 1, 1], [], []>} : vector<8x8xbf16>, vector<8x512xbf16>, vector<8x512xf32> -> vector<8x512xf32>
    %c5_266 = arith.constant 5 : index
    %c0_267 = arith.constant 0 : index
    %c0_268 = arith.constant 0 : index
    %328 = vector.load %arg4[%c5_266, %c0_267, %c0_268] : memref<27x1x512xf32, #tpu.memory_space<vmem>>, vector<1x1x512xf32>
    %329 = vector.shape_cast %328 : vector<1x1x512xf32> to vector<1x512xf32>
    %330 = vector.broadcast %329 : vector<1x512xf32> to vector<8x512xf32>
    %331 = arith.mulf %327, %330 : vector<8x512xf32>
    %332 = arith.addf %323, %331 : vector<8x512xf32>
    %c0_269 = arith.constant 0 : index
    %c71_270 = arith.constant 71 : index
    %333 = vector.load %arg7[%c0_269, %c71_270] : memref<8x768xbf16, #tpu.memory_space<vmem>>, vector<8x512xbf16>
    %c6_271 = arith.constant 6 : index
    %c0_272 = arith.constant 0 : index
    %c0_273 = arith.constant 0 : index
    %334 = vector.load %arg3[%c6_271, %c0_272, %c0_273] : memref<27x8x8xbf16, #tpu.memory_space<vmem>>, vector<1x8x8xbf16>
    %335 = vector.shape_cast %334 : vector<1x8x8xbf16> to vector<8x8xbf16>
    %cst_274 = arith.constant dense<0.000000e+00> : vector<8x512xf32>
    %336 = tpu.matmul %335, %333, %cst_274 {dimension_numbers = #tpu.dot_dimension_numbers<[1], [0], [0], [1], [0, 0, 1, 1], [], []>} : vector<8x8xbf16>, vector<8x512xbf16>, vector<8x512xf32> -> vector<8x512xf32>
    %c6_275 = arith.constant 6 : index
    %c0_276 = arith.constant 0 : index
    %c0_277 = arith.constant 0 : index
    %337 = vector.load %arg4[%c6_275, %c0_276, %c0_277] : memref<27x1x512xf32, #tpu.memory_space<vmem>>, vector<1x1x512xf32>
    %338 = vector.shape_cast %337 : vector<1x1x512xf32> to vector<1x512xf32>
    %339 = vector.broadcast %338 : vector<1x512xf32> to vector<8x512xf32>
    %340 = arith.mulf %336, %339 : vector<8x512xf32>
    %341 = arith.addf %332, %340 : vector<8x512xf32>
    %c0_278 = arith.constant 0 : index
    %c72_279 = arith.constant 72 : index
    %342 = vector.load %arg7[%c0_278, %c72_279] : memref<8x768xbf16, #tpu.memory_space<vmem>>, vector<8x512xbf16>
    %c7_280 = arith.constant 7 : index
    %c0_281 = arith.constant 0 : index
    %c0_282 = arith.constant 0 : index
    %343 = vector.load %arg3[%c7_280, %c0_281, %c0_282] : memref<27x8x8xbf16, #tpu.memory_space<vmem>>, vector<1x8x8xbf16>
    %344 = vector.shape_cast %343 : vector<1x8x8xbf16> to vector<8x8xbf16>
    %cst_283 = arith.constant dense<0.000000e+00> : vector<8x512xf32>
    %345 = tpu.matmul %344, %342, %cst_283 {dimension_numbers = #tpu.dot_dimension_numbers<[1], [0], [0], [1], [0, 0, 1, 1], [], []>} : vector<8x8xbf16>, vector<8x512xbf16>, vector<8x512xf32> -> vector<8x512xf32>
    %c7_284 = arith.constant 7 : index
    %c0_285 = arith.constant 0 : index
    %c0_286 = arith.constant 0 : index
    %346 = vector.load %arg4[%c7_284, %c0_285, %c0_286] : memref<27x1x512xf32, #tpu.memory_space<vmem>>, vector<1x1x512xf32>
    %347 = vector.shape_cast %346 : vector<1x1x512xf32> to vector<1x512xf32>
    %348 = vector.broadcast %347 : vector<1x512xf32> to vector<8x512xf32>
    %349 = arith.mulf %345, %348 : vector<8x512xf32>
    %350 = arith.addf %341, %349 : vector<8x512xf32>
    %c0_287 = arith.constant 0 : index
    %c73_288 = arith.constant 73 : index
    %351 = vector.load %arg7[%c0_287, %c73_288] : memref<8x768xbf16, #tpu.memory_space<vmem>>, vector<8x512xbf16>
    %c8_289 = arith.constant 8 : index
    %c0_290 = arith.constant 0 : index
    %c0_291 = arith.constant 0 : index
    %352 = vector.load %arg3[%c8_289, %c0_290, %c0_291] : memref<27x8x8xbf16, #tpu.memory_space<vmem>>, vector<1x8x8xbf16>
    %353 = vector.shape_cast %352 : vector<1x8x8xbf16> to vector<8x8xbf16>
    %cst_292 = arith.constant dense<0.000000e+00> : vector<8x512xf32>
    %354 = tpu.matmul %353, %351, %cst_292 {dimension_numbers = #tpu.dot_dimension_numbers<[1], [0], [0], [1], [0, 0, 1, 1], [], []>} : vector<8x8xbf16>, vector<8x512xbf16>, vector<8x512xf32> -> vector<8x512xf32>
    %c8_293 = arith.constant 8 : index
    %c0_294 = arith.constant 0 : index
    %c0_295 = arith.constant 0 : index
    %355 = vector.load %arg4[%c8_293, %c0_294, %c0_295] : memref<27x1x512xf32, #tpu.memory_space<vmem>>, vector<1x1x512xf32>
    %356 = vector.shape_cast %355 : vector<1x1x512xf32> to vector<1x512xf32>
    %357 = vector.broadcast %356 : vector<1x512xf32> to vector<8x512xf32>
    %358 = arith.mulf %354, %357 : vector<8x512xf32>
    %359 = arith.addf %350, %358 : vector<8x512xf32>
    %c0_296 = arith.constant 0 : index
    %c119_297 = arith.constant 119 : index
    %360 = vector.load %arg7[%c0_296, %c119_297] : memref<8x768xbf16, #tpu.memory_space<vmem>>, vector<8x512xbf16>
    %c9_298 = arith.constant 9 : index
    %c0_299 = arith.constant 0 : index
    %c0_300 = arith.constant 0 : index
    %361 = vector.load %arg3[%c9_298, %c0_299, %c0_300] : memref<27x8x8xbf16, #tpu.memory_space<vmem>>, vector<1x8x8xbf16>
    %362 = vector.shape_cast %361 : vector<1x8x8xbf16> to vector<8x8xbf16>
    %cst_301 = arith.constant dense<0.000000e+00> : vector<8x512xf32>
    %363 = tpu.matmul %362, %360, %cst_301 {dimension_numbers = #tpu.dot_dimension_numbers<[1], [0], [0], [1], [0, 0, 1, 1], [], []>} : vector<8x8xbf16>, vector<8x512xbf16>, vector<8x512xf32> -> vector<8x512xf32>
    %c9_302 = arith.constant 9 : index
    %c0_303 = arith.constant 0 : index
    %c0_304 = arith.constant 0 : index
    %364 = vector.load %arg4[%c9_302, %c0_303, %c0_304] : memref<27x1x512xf32, #tpu.memory_space<vmem>>, vector<1x1x512xf32>
    %365 = vector.shape_cast %364 : vector<1x1x512xf32> to vector<1x512xf32>
    %366 = vector.broadcast %365 : vector<1x512xf32> to vector<8x512xf32>
    %367 = arith.mulf %363, %366 : vector<8x512xf32>
    %368 = arith.addf %359, %367 : vector<8x512xf32>
    %c0_305 = arith.constant 0 : index
    %c120_306 = arith.constant 120 : index
    %369 = vector.load %arg7[%c0_305, %c120_306] : memref<8x768xbf16, #tpu.memory_space<vmem>>, vector<8x512xbf16>
    %c10_307 = arith.constant 10 : index
    %c0_308 = arith.constant 0 : index
    %c0_309 = arith.constant 0 : index
    %370 = vector.load %arg3[%c10_307, %c0_308, %c0_309] : memref<27x8x8xbf16, #tpu.memory_space<vmem>>, vector<1x8x8xbf16>
    %371 = vector.shape_cast %370 : vector<1x8x8xbf16> to vector<8x8xbf16>
    %cst_310 = arith.constant dense<0.000000e+00> : vector<8x512xf32>
    %372 = tpu.matmul %371, %369, %cst_310 {dimension_numbers = #tpu.dot_dimension_numbers<[1], [0], [0], [1], [0, 0, 1, 1], [], []>} : vector<8x8xbf16>, vector<8x512xbf16>, vector<8x512xf32> -> vector<8x512xf32>
    %c10_311 = arith.constant 10 : index
    %c0_312 = arith.constant 0 : index
    %c0_313 = arith.constant 0 : index
    %373 = vector.load %arg4[%c10_311, %c0_312, %c0_313] : memref<27x1x512xf32, #tpu.memory_space<vmem>>, vector<1x1x512xf32>
    %374 = vector.shape_cast %373 : vector<1x1x512xf32> to vector<1x512xf32>
    %375 = vector.broadcast %374 : vector<1x512xf32> to vector<8x512xf32>
    %376 = arith.mulf %372, %375 : vector<8x512xf32>
    %377 = arith.addf %368, %376 : vector<8x512xf32>
    %c0_314 = arith.constant 0 : index
    %c121_315 = arith.constant 121 : index
    %378 = vector.load %arg7[%c0_314, %c121_315] : memref<8x768xbf16, #tpu.memory_space<vmem>>, vector<8x512xbf16>
    %c11_316 = arith.constant 11 : index
    %c0_317 = arith.constant 0 : index
    %c0_318 = arith.constant 0 : index
    %379 = vector.load %arg3[%c11_316, %c0_317, %c0_318] : memref<27x8x8xbf16, #tpu.memory_space<vmem>>, vector<1x8x8xbf16>
    %380 = vector.shape_cast %379 : vector<1x8x8xbf16> to vector<8x8xbf16>
    %cst_319 = arith.constant dense<0.000000e+00> : vector<8x512xf32>
    %381 = tpu.matmul %380, %378, %cst_319 {dimension_numbers = #tpu.dot_dimension_numbers<[1], [0], [0], [1], [0, 0, 1, 1], [], []>} : vector<8x8xbf16>, vector<8x512xbf16>, vector<8x512xf32> -> vector<8x512xf32>
    %c11_320 = arith.constant 11 : index
    %c0_321 = arith.constant 0 : index
    %c0_322 = arith.constant 0 : index
    %382 = vector.load %arg4[%c11_320, %c0_321, %c0_322] : memref<27x1x512xf32, #tpu.memory_space<vmem>>, vector<1x1x512xf32>
    %383 = vector.shape_cast %382 : vector<1x1x512xf32> to vector<1x512xf32>
    %384 = vector.broadcast %383 : vector<1x512xf32> to vector<8x512xf32>
    %385 = arith.mulf %381, %384 : vector<8x512xf32>
    %386 = arith.addf %377, %385 : vector<8x512xf32>
    %c0_323 = arith.constant 0 : index
    %c127_324 = arith.constant 127 : index
    %387 = vector.load %arg7[%c0_323, %c127_324] : memref<8x768xbf16, #tpu.memory_space<vmem>>, vector<8x512xbf16>
    %c12_325 = arith.constant 12 : index
    %c0_326 = arith.constant 0 : index
    %c0_327 = arith.constant 0 : index
    %388 = vector.load %arg3[%c12_325, %c0_326, %c0_327] : memref<27x8x8xbf16, #tpu.memory_space<vmem>>, vector<1x8x8xbf16>
    %389 = vector.shape_cast %388 : vector<1x8x8xbf16> to vector<8x8xbf16>
    %cst_328 = arith.constant dense<0.000000e+00> : vector<8x512xf32>
    %390 = tpu.matmul %389, %387, %cst_328 {dimension_numbers = #tpu.dot_dimension_numbers<[1], [0], [0], [1], [0, 0, 1, 1], [], []>} : vector<8x8xbf16>, vector<8x512xbf16>, vector<8x512xf32> -> vector<8x512xf32>
    %c12_329 = arith.constant 12 : index
    %c0_330 = arith.constant 0 : index
    %c0_331 = arith.constant 0 : index
    %391 = vector.load %arg4[%c12_329, %c0_330, %c0_331] : memref<27x1x512xf32, #tpu.memory_space<vmem>>, vector<1x1x512xf32>
    %392 = vector.shape_cast %391 : vector<1x1x512xf32> to vector<1x512xf32>
    %393 = vector.broadcast %392 : vector<1x512xf32> to vector<8x512xf32>
    %394 = arith.mulf %390, %393 : vector<8x512xf32>
    %395 = arith.addf %386, %394 : vector<8x512xf32>
    %c0_332 = arith.constant 0 : index
    %c128_333 = arith.constant 128 : index
    %396 = vector.load %arg7[%c0_332, %c128_333] : memref<8x768xbf16, #tpu.memory_space<vmem>>, vector<8x512xbf16>
    %c13_334 = arith.constant 13 : index
    %c0_335 = arith.constant 0 : index
    %c0_336 = arith.constant 0 : index
    %397 = vector.load %arg3[%c13_334, %c0_335, %c0_336] : memref<27x8x8xbf16, #tpu.memory_space<vmem>>, vector<1x8x8xbf16>
    %398 = vector.shape_cast %397 : vector<1x8x8xbf16> to vector<8x8xbf16>
    %cst_337 = arith.constant dense<0.000000e+00> : vector<8x512xf32>
    %399 = tpu.matmul %398, %396, %cst_337 {dimension_numbers = #tpu.dot_dimension_numbers<[1], [0], [0], [1], [0, 0, 1, 1], [], []>} : vector<8x8xbf16>, vector<8x512xbf16>, vector<8x512xf32> -> vector<8x512xf32>
    %c13_338 = arith.constant 13 : index
    %c0_339 = arith.constant 0 : index
    %c0_340 = arith.constant 0 : index
    %400 = vector.load %arg4[%c13_338, %c0_339, %c0_340] : memref<27x1x512xf32, #tpu.memory_space<vmem>>, vector<1x1x512xf32>
    %401 = vector.shape_cast %400 : vector<1x1x512xf32> to vector<1x512xf32>
    %402 = vector.broadcast %401 : vector<1x512xf32> to vector<8x512xf32>
    %403 = arith.mulf %399, %402 : vector<8x512xf32>
    %404 = arith.addf %395, %403 : vector<8x512xf32>
    %c0_341 = arith.constant 0 : index
    %c129_342 = arith.constant 129 : index
    %405 = vector.load %arg7[%c0_341, %c129_342] : memref<8x768xbf16, #tpu.memory_space<vmem>>, vector<8x512xbf16>
    %c14_343 = arith.constant 14 : index
    %c0_344 = arith.constant 0 : index
    %c0_345 = arith.constant 0 : index
    %406 = vector.load %arg3[%c14_343, %c0_344, %c0_345] : memref<27x8x8xbf16, #tpu.memory_space<vmem>>, vector<1x8x8xbf16>
    %407 = vector.shape_cast %406 : vector<1x8x8xbf16> to vector<8x8xbf16>
    %cst_346 = arith.constant dense<0.000000e+00> : vector<8x512xf32>
    %408 = tpu.matmul %407, %405, %cst_346 {dimension_numbers = #tpu.dot_dimension_numbers<[1], [0], [0], [1], [0, 0, 1, 1], [], []>} : vector<8x8xbf16>, vector<8x512xbf16>, vector<8x512xf32> -> vector<8x512xf32>
    %c14_347 = arith.constant 14 : index
    %c0_348 = arith.constant 0 : index
    %c0_349 = arith.constant 0 : index
    %409 = vector.load %arg4[%c14_347, %c0_348, %c0_349] : memref<27x1x512xf32, #tpu.memory_space<vmem>>, vector<1x1x512xf32>
    %410 = vector.shape_cast %409 : vector<1x1x512xf32> to vector<1x512xf32>
    %411 = vector.broadcast %410 : vector<1x512xf32> to vector<8x512xf32>
    %412 = arith.mulf %408, %411 : vector<8x512xf32>
    %413 = arith.addf %404, %412 : vector<8x512xf32>
    %c0_350 = arith.constant 0 : index
    %c135_351 = arith.constant 135 : index
    %414 = vector.load %arg7[%c0_350, %c135_351] : memref<8x768xbf16, #tpu.memory_space<vmem>>, vector<8x512xbf16>
    %c15_352 = arith.constant 15 : index
    %c0_353 = arith.constant 0 : index
    %c0_354 = arith.constant 0 : index
    %415 = vector.load %arg3[%c15_352, %c0_353, %c0_354] : memref<27x8x8xbf16, #tpu.memory_space<vmem>>, vector<1x8x8xbf16>
    %416 = vector.shape_cast %415 : vector<1x8x8xbf16> to vector<8x8xbf16>
    %cst_355 = arith.constant dense<0.000000e+00> : vector<8x512xf32>
    %417 = tpu.matmul %416, %414, %cst_355 {dimension_numbers = #tpu.dot_dimension_numbers<[1], [0], [0], [1], [0, 0, 1, 1], [], []>} : vector<8x8xbf16>, vector<8x512xbf16>, vector<8x512xf32> -> vector<8x512xf32>
    %c15_356 = arith.constant 15 : index
    %c0_357 = arith.constant 0 : index
    %c0_358 = arith.constant 0 : index
    %418 = vector.load %arg4[%c15_356, %c0_357, %c0_358] : memref<27x1x512xf32, #tpu.memory_space<vmem>>, vector<1x1x512xf32>
    %419 = vector.shape_cast %418 : vector<1x1x512xf32> to vector<1x512xf32>
    %420 = vector.broadcast %419 : vector<1x512xf32> to vector<8x512xf32>
    %421 = arith.mulf %417, %420 : vector<8x512xf32>
    %422 = arith.addf %413, %421 : vector<8x512xf32>
    %c0_359 = arith.constant 0 : index
    %c136_360 = arith.constant 136 : index
    %423 = vector.load %arg7[%c0_359, %c136_360] : memref<8x768xbf16, #tpu.memory_space<vmem>>, vector<8x512xbf16>
    %c16_361 = arith.constant 16 : index
    %c0_362 = arith.constant 0 : index
    %c0_363 = arith.constant 0 : index
    %424 = vector.load %arg3[%c16_361, %c0_362, %c0_363] : memref<27x8x8xbf16, #tpu.memory_space<vmem>>, vector<1x8x8xbf16>
    %425 = vector.shape_cast %424 : vector<1x8x8xbf16> to vector<8x8xbf16>
    %cst_364 = arith.constant dense<0.000000e+00> : vector<8x512xf32>
    %426 = tpu.matmul %425, %423, %cst_364 {dimension_numbers = #tpu.dot_dimension_numbers<[1], [0], [0], [1], [0, 0, 1, 1], [], []>} : vector<8x8xbf16>, vector<8x512xbf16>, vector<8x512xf32> -> vector<8x512xf32>
    %c16_365 = arith.constant 16 : index
    %c0_366 = arith.constant 0 : index
    %c0_367 = arith.constant 0 : index
    %427 = vector.load %arg4[%c16_365, %c0_366, %c0_367] : memref<27x1x512xf32, #tpu.memory_space<vmem>>, vector<1x1x512xf32>
    %428 = vector.shape_cast %427 : vector<1x1x512xf32> to vector<1x512xf32>
    %429 = vector.broadcast %428 : vector<1x512xf32> to vector<8x512xf32>
    %430 = arith.mulf %426, %429 : vector<8x512xf32>
    %431 = arith.addf %422, %430 : vector<8x512xf32>
    %c0_368 = arith.constant 0 : index
    %c137_369 = arith.constant 137 : index
    %432 = vector.load %arg7[%c0_368, %c137_369] : memref<8x768xbf16, #tpu.memory_space<vmem>>, vector<8x512xbf16>
    %c17_370 = arith.constant 17 : index
    %c0_371 = arith.constant 0 : index
    %c0_372 = arith.constant 0 : index
    %433 = vector.load %arg3[%c17_370, %c0_371, %c0_372] : memref<27x8x8xbf16, #tpu.memory_space<vmem>>, vector<1x8x8xbf16>
    %434 = vector.shape_cast %433 : vector<1x8x8xbf16> to vector<8x8xbf16>
    %cst_373 = arith.constant dense<0.000000e+00> : vector<8x512xf32>
    %435 = tpu.matmul %434, %432, %cst_373 {dimension_numbers = #tpu.dot_dimension_numbers<[1], [0], [0], [1], [0, 0, 1, 1], [], []>} : vector<8x8xbf16>, vector<8x512xbf16>, vector<8x512xf32> -> vector<8x512xf32>
    %c17_374 = arith.constant 17 : index
    %c0_375 = arith.constant 0 : index
    %c0_376 = arith.constant 0 : index
    %436 = vector.load %arg4[%c17_374, %c0_375, %c0_376] : memref<27x1x512xf32, #tpu.memory_space<vmem>>, vector<1x1x512xf32>
    %437 = vector.shape_cast %436 : vector<1x1x512xf32> to vector<1x512xf32>
    %438 = vector.broadcast %437 : vector<1x512xf32> to vector<8x512xf32>
    %439 = arith.mulf %435, %438 : vector<8x512xf32>
    %440 = arith.addf %431, %439 : vector<8x512xf32>
    %c0_377 = arith.constant 0 : index
    %c183_378 = arith.constant 183 : index
    %441 = vector.load %arg7[%c0_377, %c183_378] : memref<8x768xbf16, #tpu.memory_space<vmem>>, vector<8x512xbf16>
    %c18_379 = arith.constant 18 : index
    %c0_380 = arith.constant 0 : index
    %c0_381 = arith.constant 0 : index
    %442 = vector.load %arg3[%c18_379, %c0_380, %c0_381] : memref<27x8x8xbf16, #tpu.memory_space<vmem>>, vector<1x8x8xbf16>
    %443 = vector.shape_cast %442 : vector<1x8x8xbf16> to vector<8x8xbf16>
    %cst_382 = arith.constant dense<0.000000e+00> : vector<8x512xf32>
    %444 = tpu.matmul %443, %441, %cst_382 {dimension_numbers = #tpu.dot_dimension_numbers<[1], [0], [0], [1], [0, 0, 1, 1], [], []>} : vector<8x8xbf16>, vector<8x512xbf16>, vector<8x512xf32> -> vector<8x512xf32>
    %c18_383 = arith.constant 18 : index
    %c0_384 = arith.constant 0 : index
    %c0_385 = arith.constant 0 : index
    %445 = vector.load %arg4[%c18_383, %c0_384, %c0_385] : memref<27x1x512xf32, #tpu.memory_space<vmem>>, vector<1x1x512xf32>
    %446 = vector.shape_cast %445 : vector<1x1x512xf32> to vector<1x512xf32>
    %447 = vector.broadcast %446 : vector<1x512xf32> to vector<8x512xf32>
    %448 = arith.mulf %444, %447 : vector<8x512xf32>
    %449 = arith.addf %440, %448 : vector<8x512xf32>
    %c0_386 = arith.constant 0 : index
    %c184_387 = arith.constant 184 : index
    %450 = vector.load %arg7[%c0_386, %c184_387] : memref<8x768xbf16, #tpu.memory_space<vmem>>, vector<8x512xbf16>
    %c19_388 = arith.constant 19 : index
    %c0_389 = arith.constant 0 : index
    %c0_390 = arith.constant 0 : index
    %451 = vector.load %arg3[%c19_388, %c0_389, %c0_390] : memref<27x8x8xbf16, #tpu.memory_space<vmem>>, vector<1x8x8xbf16>
    %452 = vector.shape_cast %451 : vector<1x8x8xbf16> to vector<8x8xbf16>
    %cst_391 = arith.constant dense<0.000000e+00> : vector<8x512xf32>
    %453 = tpu.matmul %452, %450, %cst_391 {dimension_numbers = #tpu.dot_dimension_numbers<[1], [0], [0], [1], [0, 0, 1, 1], [], []>} : vector<8x8xbf16>, vector<8x512xbf16>, vector<8x512xf32> -> vector<8x512xf32>
    %c19_392 = arith.constant 19 : index
    %c0_393 = arith.constant 0 : index
    %c0_394 = arith.constant 0 : index
    %454 = vector.load %arg4[%c19_392, %c0_393, %c0_394] : memref<27x1x512xf32, #tpu.memory_space<vmem>>, vector<1x1x512xf32>
    %455 = vector.shape_cast %454 : vector<1x1x512xf32> to vector<1x512xf32>
    %456 = vector.broadcast %455 : vector<1x512xf32> to vector<8x512xf32>
    %457 = arith.mulf %453, %456 : vector<8x512xf32>
    %458 = arith.addf %449, %457 : vector<8x512xf32>
    %c0_395 = arith.constant 0 : index
    %c185_396 = arith.constant 185 : index
    %459 = vector.load %arg7[%c0_395, %c185_396] : memref<8x768xbf16, #tpu.memory_space<vmem>>, vector<8x512xbf16>
    %c20_397 = arith.constant 20 : index
    %c0_398 = arith.constant 0 : index
    %c0_399 = arith.constant 0 : index
    %460 = vector.load %arg3[%c20_397, %c0_398, %c0_399] : memref<27x8x8xbf16, #tpu.memory_space<vmem>>, vector<1x8x8xbf16>
    %461 = vector.shape_cast %460 : vector<1x8x8xbf16> to vector<8x8xbf16>
    %cst_400 = arith.constant dense<0.000000e+00> : vector<8x512xf32>
    %462 = tpu.matmul %461, %459, %cst_400 {dimension_numbers = #tpu.dot_dimension_numbers<[1], [0], [0], [1], [0, 0, 1, 1], [], []>} : vector<8x8xbf16>, vector<8x512xbf16>, vector<8x512xf32> -> vector<8x512xf32>
    %c20_401 = arith.constant 20 : index
    %c0_402 = arith.constant 0 : index
    %c0_403 = arith.constant 0 : index
    %463 = vector.load %arg4[%c20_401, %c0_402, %c0_403] : memref<27x1x512xf32, #tpu.memory_space<vmem>>, vector<1x1x512xf32>
    %464 = vector.shape_cast %463 : vector<1x1x512xf32> to vector<1x512xf32>
    %465 = vector.broadcast %464 : vector<1x512xf32> to vector<8x512xf32>
    %466 = arith.mulf %462, %465 : vector<8x512xf32>
    %467 = arith.addf %458, %466 : vector<8x512xf32>
    %c0_404 = arith.constant 0 : index
    %c191_405 = arith.constant 191 : index
    %468 = vector.load %arg7[%c0_404, %c191_405] : memref<8x768xbf16, #tpu.memory_space<vmem>>, vector<8x512xbf16>
    %c21_406 = arith.constant 21 : index
    %c0_407 = arith.constant 0 : index
    %c0_408 = arith.constant 0 : index
    %469 = vector.load %arg3[%c21_406, %c0_407, %c0_408] : memref<27x8x8xbf16, #tpu.memory_space<vmem>>, vector<1x8x8xbf16>
    %470 = vector.shape_cast %469 : vector<1x8x8xbf16> to vector<8x8xbf16>
    %cst_409 = arith.constant dense<0.000000e+00> : vector<8x512xf32>
    %471 = tpu.matmul %470, %468, %cst_409 {dimension_numbers = #tpu.dot_dimension_numbers<[1], [0], [0], [1], [0, 0, 1, 1], [], []>} : vector<8x8xbf16>, vector<8x512xbf16>, vector<8x512xf32> -> vector<8x512xf32>
    %c21_410 = arith.constant 21 : index
    %c0_411 = arith.constant 0 : index
    %c0_412 = arith.constant 0 : index
    %472 = vector.load %arg4[%c21_410, %c0_411, %c0_412] : memref<27x1x512xf32, #tpu.memory_space<vmem>>, vector<1x1x512xf32>
    %473 = vector.shape_cast %472 : vector<1x1x512xf32> to vector<1x512xf32>
    %474 = vector.broadcast %473 : vector<1x512xf32> to vector<8x512xf32>
    %475 = arith.mulf %471, %474 : vector<8x512xf32>
    %476 = arith.addf %467, %475 : vector<8x512xf32>
    %c0_413 = arith.constant 0 : index
    %c192_414 = arith.constant 192 : index
    %477 = vector.load %arg7[%c0_413, %c192_414] : memref<8x768xbf16, #tpu.memory_space<vmem>>, vector<8x512xbf16>
    %c22_415 = arith.constant 22 : index
    %c0_416 = arith.constant 0 : index
    %c0_417 = arith.constant 0 : index
    %478 = vector.load %arg3[%c22_415, %c0_416, %c0_417] : memref<27x8x8xbf16, #tpu.memory_space<vmem>>, vector<1x8x8xbf16>
    %479 = vector.shape_cast %478 : vector<1x8x8xbf16> to vector<8x8xbf16>
    %cst_418 = arith.constant dense<0.000000e+00> : vector<8x512xf32>
    %480 = tpu.matmul %479, %477, %cst_418 {dimension_numbers = #tpu.dot_dimension_numbers<[1], [0], [0], [1], [0, 0, 1, 1], [], []>} : vector<8x8xbf16>, vector<8x512xbf16>, vector<8x512xf32> -> vector<8x512xf32>
    %c22_419 = arith.constant 22 : index
    %c0_420 = arith.constant 0 : index
    %c0_421 = arith.constant 0 : index
    %481 = vector.load %arg4[%c22_419, %c0_420, %c0_421] : memref<27x1x512xf32, #tpu.memory_space<vmem>>, vector<1x1x512xf32>
    %482 = vector.shape_cast %481 : vector<1x1x512xf32> to vector<1x512xf32>
    %483 = vector.broadcast %482 : vector<1x512xf32> to vector<8x512xf32>
    %484 = arith.mulf %480, %483 : vector<8x512xf32>
    %485 = arith.addf %476, %484 : vector<8x512xf32>
    %c0_422 = arith.constant 0 : index
    %c193_423 = arith.constant 193 : index
    %486 = vector.load %arg7[%c0_422, %c193_423] : memref<8x768xbf16, #tpu.memory_space<vmem>>, vector<8x512xbf16>
    %c23_424 = arith.constant 23 : index
    %c0_425 = arith.constant 0 : index
    %c0_426 = arith.constant 0 : index
    %487 = vector.load %arg3[%c23_424, %c0_425, %c0_426] : memref<27x8x8xbf16, #tpu.memory_space<vmem>>, vector<1x8x8xbf16>
    %488 = vector.shape_cast %487 : vector<1x8x8xbf16> to vector<8x8xbf16>
    %cst_427 = arith.constant dense<0.000000e+00> : vector<8x512xf32>
    %489 = tpu.matmul %488, %486, %cst_427 {dimension_numbers = #tpu.dot_dimension_numbers<[1], [0], [0], [1], [0, 0, 1, 1], [], []>} : vector<8x8xbf16>, vector<8x512xbf16>, vector<8x512xf32> -> vector<8x512xf32>
    %c23_428 = arith.constant 23 : index
    %c0_429 = arith.constant 0 : index
    %c0_430 = arith.constant 0 : index
    %490 = vector.load %arg4[%c23_428, %c0_429, %c0_430] : memref<27x1x512xf32, #tpu.memory_space<vmem>>, vector<1x1x512xf32>
    %491 = vector.shape_cast %490 : vector<1x1x512xf32> to vector<1x512xf32>
    %492 = vector.broadcast %491 : vector<1x512xf32> to vector<8x512xf32>
    %493 = arith.mulf %489, %492 : vector<8x512xf32>
    %494 = arith.addf %485, %493 : vector<8x512xf32>
    %c0_431 = arith.constant 0 : index
    %c199_432 = arith.constant 199 : index
    %495 = vector.load %arg7[%c0_431, %c199_432] : memref<8x768xbf16, #tpu.memory_space<vmem>>, vector<8x512xbf16>
    %c24_433 = arith.constant 24 : index
    %c0_434 = arith.constant 0 : index
    %c0_435 = arith.constant 0 : index
    %496 = vector.load %arg3[%c24_433, %c0_434, %c0_435] : memref<27x8x8xbf16, #tpu.memory_space<vmem>>, vector<1x8x8xbf16>
    %497 = vector.shape_cast %496 : vector<1x8x8xbf16> to vector<8x8xbf16>
    %cst_436 = arith.constant dense<0.000000e+00> : vector<8x512xf32>
    %498 = tpu.matmul %497, %495, %cst_436 {dimension_numbers = #tpu.dot_dimension_numbers<[1], [0], [0], [1], [0, 0, 1, 1], [], []>} : vector<8x8xbf16>, vector<8x512xbf16>, vector<8x512xf32> -> vector<8x512xf32>
    %c24_437 = arith.constant 24 : index
    %c0_438 = arith.constant 0 : index
    %c0_439 = arith.constant 0 : index
    %499 = vector.load %arg4[%c24_437, %c0_438, %c0_439] : memref<27x1x512xf32, #tpu.memory_space<vmem>>, vector<1x1x512xf32>
    %500 = vector.shape_cast %499 : vector<1x1x512xf32> to vector<1x512xf32>
    %501 = vector.broadcast %500 : vector<1x512xf32> to vector<8x512xf32>
    %502 = arith.mulf %498, %501 : vector<8x512xf32>
    %503 = arith.addf %494, %502 : vector<8x512xf32>
    %c0_440 = arith.constant 0 : index
    %c200_441 = arith.constant 200 : index
    %504 = vector.load %arg7[%c0_440, %c200_441] : memref<8x768xbf16, #tpu.memory_space<vmem>>, vector<8x512xbf16>
    %c25_442 = arith.constant 25 : index
    %c0_443 = arith.constant 0 : index
    %c0_444 = arith.constant 0 : index
    %505 = vector.load %arg3[%c25_442, %c0_443, %c0_444] : memref<27x8x8xbf16, #tpu.memory_space<vmem>>, vector<1x8x8xbf16>
    %506 = vector.shape_cast %505 : vector<1x8x8xbf16> to vector<8x8xbf16>
    %cst_445 = arith.constant dense<0.000000e+00> : vector<8x512xf32>
    %507 = tpu.matmul %506, %504, %cst_445 {dimension_numbers = #tpu.dot_dimension_numbers<[1], [0], [0], [1], [0, 0, 1, 1], [], []>} : vector<8x8xbf16>, vector<8x512xbf16>, vector<8x512xf32> -> vector<8x512xf32>
    %c25_446 = arith.constant 25 : index
    %c0_447 = arith.constant 0 : index
    %c0_448 = arith.constant 0 : index
    %508 = vector.load %arg4[%c25_446, %c0_447, %c0_448] : memref<27x1x512xf32, #tpu.memory_space<vmem>>, vector<1x1x512xf32>
    %509 = vector.shape_cast %508 : vector<1x1x512xf32> to vector<1x512xf32>
    %510 = vector.broadcast %509 : vector<1x512xf32> to vector<8x512xf32>
    %511 = arith.mulf %507, %510 : vector<8x512xf32>
    %512 = arith.addf %503, %511 : vector<8x512xf32>
    %c0_449 = arith.constant 0 : index
    %c201_450 = arith.constant 201 : index
    %513 = vector.load %arg7[%c0_449, %c201_450] : memref<8x768xbf16, #tpu.memory_space<vmem>>, vector<8x512xbf16>
    %c26_451 = arith.constant 26 : index
    %c0_452 = arith.constant 0 : index
    %c0_453 = arith.constant 0 : index
    %514 = vector.load %arg3[%c26_451, %c0_452, %c0_453] : memref<27x8x8xbf16, #tpu.memory_space<vmem>>, vector<1x8x8xbf16>
    %515 = vector.shape_cast %514 : vector<1x8x8xbf16> to vector<8x8xbf16>
    %cst_454 = arith.constant dense<0.000000e+00> : vector<8x512xf32>
    %516 = tpu.matmul %515, %513, %cst_454 {dimension_numbers = #tpu.dot_dimension_numbers<[1], [0], [0], [1], [0, 0, 1, 1], [], []>} : vector<8x8xbf16>, vector<8x512xbf16>, vector<8x512xf32> -> vector<8x512xf32>
    %c26_455 = arith.constant 26 : index
    %c0_456 = arith.constant 0 : index
    %c0_457 = arith.constant 0 : index
    %517 = vector.load %arg4[%c26_455, %c0_456, %c0_457] : memref<27x1x512xf32, #tpu.memory_space<vmem>>, vector<1x1x512xf32>
    %518 = vector.shape_cast %517 : vector<1x1x512xf32> to vector<1x512xf32>
    %519 = vector.broadcast %518 : vector<1x512xf32> to vector<8x512xf32>
    %520 = arith.mulf %516, %519 : vector<8x512xf32>
    %521 = arith.addf %512, %520 : vector<8x512xf32>
    %cst_458 = arith.constant dense<0.000000e+00> : vector<8xf32>
    %522 = vector.multi_reduction <add>, %521, %cst_458 [1] : vector<8x512xf32> to vector<8xf32>
    %523 = vector.shape_cast %522 : vector<8xf32> to vector<8x1xf32>
    %cst_459 = arith.constant 0.001953125 : f32
    %524 = vector.broadcast %cst_459 : f32 to vector<8x1xf32>
    %525 = arith.mulf %523, %524 : vector<8x1xf32>
    %526 = vector.broadcast %525 : vector<8x1xf32> to vector<8x512xf32>
    %527 = arith.subf %521, %526 : vector<8x512xf32>
    %528 = arith.mulf %527, %527 : vector<8x512xf32>
    %529 = vector.broadcast %1 : vector<1x512xf32> to vector<8x512xf32>
    %530 = arith.mulf %528, %529 : vector<8x512xf32>
    %cst_460 = arith.constant dense<0.000000e+00> : vector<8xf32>
    %531 = vector.multi_reduction <add>, %530, %cst_460 [1] : vector<8x512xf32> to vector<8xf32>
    %532 = vector.shape_cast %531 : vector<8xf32> to vector<8x1xf32>
    %cst_461 = arith.constant 0.001953125 : f32
    %533 = vector.broadcast %cst_461 : f32 to vector<8x1xf32>
    %534 = arith.mulf %532, %533 : vector<8x1xf32>
    %cst_462 = arith.constant 9.99999974E-6 : f32
    %535 = vector.broadcast %cst_462 : f32 to vector<8x1xf32>
    %536 = arith.addf %534, %535 : vector<8x1xf32>
    %537 = math.rsqrt %536 : vector<8x1xf32>
    %538 = vector.broadcast %537 : vector<8x1xf32> to vector<8x512xf32>
    %539 = arith.mulf %527, %538 : vector<8x512xf32>
    %540 = arith.addf %9, %539 : vector<8x512xf32>
    %cst_463 = arith.constant 0.000000e+00 : f32
    %541 = vector.broadcast %cst_463 : f32 to vector<8x512xf32>
    %542 = arith.maximumf %540, %541 : vector<8x512xf32>
    %c0_464 = arith.constant 0 : index
    %c0_465 = arith.constant 0 : index
    %c0_466 = arith.constant 0 : index
    %543 = vector.load %arg5[%c0_464, %c0_465, %c0_466] : memref<1x8x512xf32, #tpu.memory_space<vmem>>, vector<1x8x512xf32>
    %544 = vector.shape_cast %543 : vector<1x8x512xf32> to vector<8x512xf32>
    %545 = vector.shape_cast %542 : vector<8x512xf32> to vector<1x8x512xf32>
    tpu.vector_store %arg5[%c0_464, %c0_465, %c0_466], %545 {strides = array<i32>} : memref<1x8x512xf32, #tpu.memory_space<vmem>>, vector<1x8x512xf32>,
    return
  }
  func.func @transform_0(%arg0: i32) -> (i32, i32, i32) {
    %c0_i32 = arith.constant 0 : i32
    %c0_i32_0 = arith.constant 0 : i32
    %c0_i32_1 = arith.constant 0 : i32
    return %arg0, %c0_i32, %c0_i32_0 : i32, i32, i32
  }
  func.func @transform_1(%arg0: i32) -> (i32, i32, i32) {
    %c0_i32 = arith.constant 0 : i32
    %c0_i32_0 = arith.constant 0 : i32
    %c0_i32_1 = arith.constant 0 : i32
    %c0_i32_2 = arith.constant 0 : i32
    return %c0_i32, %c0_i32_0, %c0_i32_1 : i32, i32, i32
  }
  func.func @transform_2(%arg0: i32) -> (i32, i32, i32) {
    %c0_i32 = arith.constant 0 : i32
    %c0_i32_0 = arith.constant 0 : i32
    %c0_i32_1 = arith.constant 0 : i32
    %c0_i32_2 = arith.constant 0 : i32
    return %c0_i32, %c0_i32_0, %c0_i32_1 : i32, i32, i32
  }
  func.func @transform_3(%arg0: i32) -> (i32, i32, i32) {
    %c0_i32 = arith.constant 0 : i32
    %c0_i32_0 = arith.constant 0 : i32
    %c0_i32_1 = arith.constant 0 : i32
    %c0_i32_2 = arith.constant 0 : i32
    return %c0_i32, %c0_i32_0, %c0_i32_1 : i32, i32, i32
  }
  func.func @transform_4(%arg0: i32) -> (i32, i32, i32) {
    %c0_i32 = arith.constant 0 : i32
    %c0_i32_0 = arith.constant 0 : i32
    %c0_i32_1 = arith.constant 0 : i32
    return %arg0, %c0_i32, %c0_i32_0 : i32, i32, i32
  }
}

</mosaic_0001>

<bundles_post_ra>
// kernel: tpu_custom_call.1
= control target key start
LH: loop header
LB: loop body
LE: loop exit
PB: predicated region body
PF: predicated region fallthrough
CT: control target
= control target key end

     0   :  { %9 = vsyncpa [#allocation5], 0  ;;  %s10768_s0 = inlined_call_operand.vmem [shape: f32[2,8,512], index: 0, kind: input, shape index: {}]   ;;  %s10769_s1 = inlined_call_operand.vmem [shape: bf16[27,8,8], index: 1, kind: input, shape index: {}]   ;;  %s10770_s2 = inlined_call_operand.vmem [shape: bf16[27,8,8], index: 2, kind: input, shape index: {}]   ;;  %s10771_s3 = inlined_call_operand.vmem [shape: f32[27,1,512], index: 3, kind: input, shape index: {}]   ;;  %s10772_s4 = inlined_call_operand.hbm [shape: f32[2,8,512], index: 4, kind: output, shape index: {}]  }
   0x1   :  { %11 = vsyncpa [#allocation5 + $0x1], 0  ;;  %s8802_s15 = smov 0   ;;  %s8804_s16 = smov 0  }
   0x2   :  { %s8806_s17 = smov 0   ;;  %s8808_s18 = smov 0  }
   0x3 LB: > { %s8823_s19 = sadd.s32 4294967295, %s8756_s18   ;;  %s8238_s20 = sadd.s32 4294967294, %s8756_s18   ;;  %s8756_s18 = sphi %s8808_s18, %s10808_s18   ;;  %s8752_s17 = sphi %s8806_s17, %s10807_s17   ;;  %s8748_s16 = sphi %s8804_s16, %s10806_s16   ;;  %s8744_s15 = sphi %s8802_s15, %s10805_s15  }
   0x4   : > { %s8827_s21 = sadd.s32 1, %s8756_s18   ;;  %s113_s22 = sadd.s32 1, %s8752_s17 }
   0x5   : > { %s110_s23 = ssub.s32 %s8756_s18, %s8827_s21  ;;  %p123_p0 = scmp.ne.s32.totalorder %s8752_s17, %s8748_s16 }
   0x6   : > { %p111_p1 = scmp.eq.s32.totalorder %s110_s23, 0  ;;  %p124_p2 = scmp.eq.s32.totalorder %s8823_s19, 1 }
   0x7   : > { %p129_p3 = scmp.ne.s32.totalorder %s8748_s16, %s8744_s15  ;;  %p130_p4 = scmp.eq.s32.totalorder %s8238_s20, 1 }
   0x8   : > { %s8838_s24 = scalar_select %p111_p1, %s8752_s17, %s113_s22  }
   0x9   : > { %p8840_p5 = por %p124_p2, %p123_p0  ;;  %p8844_p6 = por %p130_p4, %p129_p3 }
   0xa   : > { %p8241_p7 = scmp.ge.s32.totalorder %s8756_s18, 1  ;;  %p165_p8 = scmp.lt.s32.totalorder %s8756_s18, 3 }
   0xc   : > { %p166_p9 = pnand %p8241_p7, %p165_p8 }
   0xd   : > { %p191_p10 = scmp.lt.s32.totalorder (!%p166_p9), %s8823_s19, 1  ;;  %v8758_v0 = vmov (!%p166_p9), 0   ;;  %s8759_s6 = smov (!%p166_p9), 73   ;;  %vm252_vm0 = vcmask (!%p166_p9), 596992   ;;  %vm261_vm1 = vcmask (!%p166_p9), 1043456   ;;  %vm257_vm2 = vcmask (!%p166_p9), 64512  }
   0xe   : > { %169 = sbr.rel (%p166_p9) target bundleno = 1878 (0x756), region = 36  ;;  %199 = vst [vmem:[#allocation2] sm:$0xf] (!%p166_p9), %v8758_v0  ;;  %200 = vst [vmem:[#allocation2 + $0x14] sm:$0xf] (!%p166_p9), %v8758_v0  ;;  %306 = vmatprep.mubr.bf16.mxu0 (!%p166_p9), %v8758_v0  ;;  %347 = vmatprep.mubr.bf16.mxu1 (!%p166_p9), %v8758_v0  ;;  %s8760_s7 = smov (!%p166_p9), 72  }
   0xf   : > { %201 = vst [vmem:[#allocation3] sm:$0xf] (!%p166_p9), %v8758_v0  ;;  %202 = vst [vmem:[#allocation3 + $0x14] sm:$0xf] (!%p166_p9), %v8758_v0  ;;  %s8761_s8 = smov (!%p166_p9), 71   ;;  %s8762_s9 = smov (!%p166_p9), 65  }
  0x10   : > { %s8763_s10 = smov (!%p166_p9), 64   ;;  %s8764_s11 = smov (!%p166_p9), 63   ;;  %v228_v25 = vld [vmem:[%s10769_s1] sm:$0xf] (!%p166_p9)  ;;  %vm398_vm3 = vcmask (!%p166_p9), 588800   ;;  %vm543_vm4 = vcmask (!%p166_p9), 580608  }
  0x11   : > { %s8765_s12 = smov (!%p166_p9), 57   ;;  %s8766_s13 = smov (!%p166_p9), 56   ;;  %v8257_v38 = vld [vmem:[%s10769_s1 + $0x4] sm:$0xf] (!%p166_p9)  ;;  %v8263_v54 = vld [vmem:[%s10769_s1 + $0x8] sm:$0xf] (!%p166_p9) }
  0x12   : > { %s10783_s14 = smov (!%p166_p9), 55   ;;  %s10781_s20 = smov (!%p166_p9), 9   ;;  %vm688_vm5 = vcmask (!%p166_p9), 531456   ;;  %vm833_vm6 = vcmask (!%p166_p9), 523264   ;;  %vm978_vm7 = vcmask (!%p166_p9), 515072   ;;  %vm1123_vm8 = vcmask (!%p166_p9), 465920  }
  0x13   : > { %s10777_s22 = smov (!%p166_p9), 8   ;;  %s10775_s23 = smov (!%p166_p9), 7   ;;  %vm1268_vm9 = vcmask (!%p166_p9), 457728   ;;  %vm10785_vm10 = vcmask (!%p166_p9), 449536   ;;  %vm1558_vm11 = vcmask (!%p166_p9), 72704   ;;  %vm1848_vm12 = vcmask (!%p166_p9), 56320  }
  0x14   : > { %s8772_s30 = smov (!%p166_p9), 127   ;;  %vm1993_vm13 = vcmask (!%p166_p9), 7168   ;;  %vm10779_vm14 = vcmask (!%p166_p9), 1039360   ;;  %vm10780_vm15 = vcmask (!%p166_p9), 990208   ;;  %s10789_s29 = smov (!%p166_p9), 9  }
  0x15   : > { %s192_s27 = scalar_select %p191_p10, %s8823_s19, 1  ;;  %v9067_v42 = vld [vmem:[#allocation2 + $0x14] ss:$0 sps:$4 sm:$0xff]  }
  0x17   : > { %s8603_s28 = sshll.u32 %s192_s27, 5  ;;  %s10773_s27 = smov 1  }
  0x18   : > { %s8861_s5 = scalar_lea.vmem %s10768_s0, %s8603_s28  ;;  %s8773_s28 = smov 121  }
  0x19   : > { %v8864_v1 = vld [vmem:[%s8861_s5] sm:$0xff]  ;;  %v8867_v2 = vld [vmem:[%s8861_s5 + $0x8] sm:$0xff]  ;;  %v8870_v3 = vld [vmem:[%s8861_s5 + $0x10] sm:$0xff] }
  0x1a   : > { %v8873_v4 = vld [vmem:[%s8861_s5 + $0x18] sm:$0xff]  ;;  %v8604_v5 = vpack.c.bf16 %v8867_v2, %v8864_v1  ;;  %v9030_v27 = vpack.c.bf16 %v8864_v1, %v8864_v1  ;;  %v9041_v33 = vpack.c.bf16 %v8867_v2, %v8867_v2  ;;  %v9049_v34 = vpack.c.bf16 %v8870_v3, %v8870_v3  ;;  %v8269_v1 = vld [vmem:[%s10769_s1 + $0xc] sm:$0xf] }
  0x1b   : > { %v8605_v6 = vpack.c.bf16 %v8873_v4, %v8870_v3  ;;  %v9062_v41 = vpack.c.bf16 %v8873_v4, %v8873_v4 }
  0x1c   : > { %223 = vst [vmem:[#allocation2 + $0x4] sm:$0xff] %v8604_v5 }
  0x1d   : > { %224 = vst [vmem:[#allocation2 + $0xc] sm:$0xff] %v8605_v6 }
  0x23   : > { %v225_v7 = vld [vmem:[#allocation2] sm:$0xff] }
  0x24   : > { %v226_v8 = vld [vmem:[#allocation2 + $0x8] sm:$0xff]  ;;  %v8879_v9 = vcombine.low %v225_v7, %v225_v7  ;;  %v8885_v11 = vcombine.high %v225_v7, %v225_v7  ;;  %v8893_v13 = vld [vmem:[#allocation2 + $0x10] ss:$0 sps:$4 sm:$0xff]  }
  0x25   : > { %v8881_v10 = vcombine.low %v226_v8, %v226_v8  ;;  %v8889_v12 = vcombine.high %v226_v8, %v226_v8 }
  0x26   : > { %242 = vrot.lane.b32.xlu0 %v8879_v9, %s8759_s6 }
  0x27   : > { %246 = vrot.lane.b32.xlu1 %v8881_v10, %s8759_s6 }
  0x2a   : > { %244 = vrot.lane.b32.xlu0 %v8885_v11, %s8759_s6 }
  0x2b   : > { %248 = vrot.lane.b32.xlu1 %v8889_v12, %s8759_s6 }
  0x2e   : > { %250 = vrot.lane.b32.xlu0 %v8893_v13, %s8759_s6 }
  0x2f   : > { %388 = vrot.lane.b32.xlu1 %v8879_v9, %s8760_s7 }
  0x32   : > { %390 = vrot.lane.b32.xlu0 %v8885_v11, %s8760_s7 }
  0x33   : > { %392 = vrot.lane.b32.xlu1 %v8881_v10, %s8760_s7 }
  0x36   : > { %394 = vrot.lane.b32.xlu0 %v8889_v12, %s8760_s7 }
  0x37   : > { %396 = vrot.lane.b32.xlu1 %v8893_v13, %s8760_s7 }
  0x3a   : > { %533 = vrot.lane.b32.xlu0 %v8879_v9, %s8761_s8 }
  0x3b   : > { %535 = vrot.lane.b32.xlu1 %v8885_v11, %s8761_s8 }
  0x3e   : > { %537 = vrot.lane.b32.xlu0 %v8881_v10, %s8761_s8 }
  0x3f   : > { %539 = vrot.lane.b32.xlu1 %v8889_v12, %s8761_s8 }
  0x42   : > { %541 = vrot.lane.b32.xlu0 %v8893_v13, %s8761_s8 }
  0x43   : > { %678 = vrot.lane.b32.xlu1 %v8879_v9, %s8762_s9 }
  0x46   : > { %680 = vrot.lane.b32.xlu0 %v8885_v11, %s8762_s9 }
  0x47   : > { %682 = vrot.lane.b32.xlu1 %v8881_v10, %s8762_s9 }
  0x4a   : > { %684 = vrot.lane.b32.xlu0 %v8889_v12, %s8762_s9 }
  0x4b   : > { %686 = vrot.lane.b32.xlu1 %v8893_v13, %s8762_s9 }
  0x4e   : > { %823 = vrot.lane.b32.xlu0 %v8879_v9, %s8763_s10 }
  0x4f   : > { %825 = vrot.lane.b32.xlu1 %v8885_v11, %s8763_s10 }
  0x52   : > { %827 = vrot.lane.b32.xlu0 %v8881_v10, %s8763_s10 }
  0x53   : > { %829 = vrot.lane.b32.xlu1 %v8889_v12, %s8763_s10 }
  0x56   : > { %831 = vrot.lane.b32.xlu0 %v8893_v13, %s8763_s10 }
  0x57   : > { %968 = vrot.lane.b32.xlu1 %v8879_v9, %s8764_s11 }
  0x5a   : > { %970 = vrot.lane.b32.xlu0 %v8885_v11, %s8764_s11 }
  0x5b   : > { %972 = vrot.lane.b32.xlu1 %v8881_v10, %s8764_s11 }
  0x5e   : > { %974 = vrot.lane.b32.xlu0 %v8889_v12, %s8764_s11 }
  0x5f   : > { %976 = vrot.lane.b32.xlu1 %v8893_v13, %s8764_s11 }
  0x62   : > { %1113 = vrot.lane.b32.xlu0 %v8879_v9, %s8765_s12 }
  0x63   : > { %1115 = vrot.lane.b32.xlu1 %v8885_v11, %s8765_s12 }
  0x66   : > { %1117 = vrot.lane.b32.xlu0 %v8881_v10, %s8765_s12 }
  0x67   : > { %1119 = vrot.lane.b32.xlu1 %v8889_v12, %s8765_s12 }
  0x6a   : > { %1121 = vrot.lane.b32.xlu0 %v8893_v13, %s8765_s12 }
  0x6b   : > { %1258 = vrot.lane.b32.xlu1 %v8879_v9, %s8766_s13 }
  0x6e   : > { %1260 = vrot.lane.b32.xlu0 %v8885_v11, %s8766_s13 }
  0x6f   : > { %1262 = vrot.lane.b32.xlu1 %v8881_v10, %s8766_s13 }
  0x72   : > { %1264 = vrot.lane.b32.xlu0 %v8889_v12, %s8766_s13 }
  0x73   : > { %1266 = vrot.lane.b32.xlu1 %v8893_v13, %s8766_s13 }
  0x76   : > { %1403 = vrot.lane.b32.xlu0 %v8879_v9, %s10783_s14 }
  0x77   : > { %1405 = vrot.lane.b32.xlu1 %v8885_v11, %s10783_s14 }
  0x7a   : > { %1407 = vrot.lane.b32.xlu0 %v8881_v10, %s10783_s14 }
  0x7b   : > { %1409 = vrot.lane.b32.xlu1 %v8889_v12, %s10783_s14 }
  0x7e   : > { %1411 = vrot.lane.b32.xlu0 %v8893_v13, %s10783_s14 }
  0x7f   : > { %1548 = vrot.lane.b32.xlu1 %v8879_v9, %s10781_s20 }
  0x82   : > { %1550 = vrot.lane.b32.xlu0 %v8885_v11, %s10781_s20 }
  0x83   : > { %1552 = vrot.lane.b32.xlu1 %v8881_v10, %s10781_s20 }
  0x86   : > { %1554 = vrot.lane.b32.xlu0 %v8889_v12, %s10781_s20 }
  0x87   : > { %1556 = vrot.lane.b32.xlu1 %v8893_v13, %s10781_s20  ;;  %s10791_s20 = smov 7  }
  0x8a   : > { %1693 = vrot.lane.b32.xlu0 %v8879_v9, %s10777_s22 }
  0x8b   : > { %1695 = vrot.lane.b32.xlu1 %v8885_v11, %s10777_s22 }
  0x8e   : > { %1697 = vrot.lane.b32.xlu0 %v8881_v10, %s10777_s22 }
  0x8f   : > { %1699 = vrot.lane.b32.xlu1 %v8889_v12, %s10777_s22 }
  0x92   : > { %1701 = vrot.lane.b32.xlu0 %v8893_v13, %s10777_s22  ;;  %s10788_s22 = smov 55  }
  0x93   : > { %1838 = vrot.lane.b32.xlu1 %v8879_v9, %s10775_s23 }
  0x96   : > { %1840 = vrot.lane.b32.xlu0 %v8885_v11, %s10775_s23 }
  0x97   : > { %1842 = vrot.lane.b32.xlu1 %v8881_v10, %s10775_s23 }
  0x98   : > { %v243_v14 = vpop.permute.xlu0 %242 }
  0x99   : > { %v247_v15 = vpop.permute.xlu1 %246 }
  0x9a   : > { %1844 = vrot.lane.b32.xlu0 %v8889_v12, %s10775_s23 }
  0x9b   : > { %1846 = vrot.lane.b32.xlu1 %v8893_v13, %s10775_s23  ;;  %s8775_s23 = smov 119  }
  0x9c   : > { %v245_v16 = vpop.permute.xlu0 %244 }
  0x9d   : > { %v249_v17 = vpop.permute.xlu1 %248  ;;  %v254_v18 = vsel %vm252_vm0, %v245_v16, %v247_v15  ;;  %v253_v19 = vsel %vm252_vm0, %v243_v14, %v245_v16 }
  0x9e   : > { %1983 = vrot.lane.b32.xlu0 %v8879_v9, %s10773_s27  ;;  %8253 = vmatprep.subr.msk.bf16.mxu0 %vm261_vm1, %v254_v18  ;;  %v263_v20 = vsel %vm261_vm1, %v253_v19, 0  ;;  %v255_v21 = vsel %vm252_vm0, %v247_v15, %v249_v17 }
  0x9f   : > { %1985 = vrot.lane.b32.xlu1 %v8885_v11, %s10773_s27  ;;  %275 = vmatpush1.bf16.msra.mxu0 %v263_v20  ;;  %v269_v26 = vsel %vm261_vm1, %v255_v21, 0  ;;  %v8275_v11 = vld [vmem:[%s10769_s1 + $0x10] sm:$0xf] }
  0xa0   : > { %v251_v22 = vpop.permute.xlu0 %250 }
  0xa1   : > { %v389_v23 = vpop.permute.xlu1 %388  ;;  %v256_v24 = vsel %vm252_vm0, %v249_v17, %v251_v22 }
  0xa2   : > { %1987 = vrot.lane.b32.xlu0 %v8881_v10, %s10773_s27  ;;  %8255 = vmatprep.subr.msk.bf16.mxu1 %vm261_vm1, %v256_v24 }
  0xa3   : > { %1989 = vrot.lane.b32.xlu1 %v8889_v12, %s10773_s27  ;;  %316 = vmatpush1.bf16.msra.mxu1 %v269_v26 }
  0xa4   : > { %v391_v28 = vpop.permute.xlu0 %390  ;;  %8254 = vmatmul.mubr.msk.bf16.vlgmr.msra.gmra.mrb[0].mxu0 %vm257_vm2, %v228_v25 }
  0xa5   : > { %v393_v29 = vpop.permute.xlu1 %392  ;;  %v399_v30 = vsel %vm398_vm3, %v389_v23, %v391_v28  ;;  %450 = vmatprep.mubr.bf16.mxu0 %v8758_v0 }
  0xa6   : > { %1991 = vrot.lane.b32.xlu0 %v8893_v13, %s10773_s27  ;;  %v400_v31 = vsel %vm398_vm3, %v391_v28, %v393_v29  ;;  %v407_v32 = vsel %vm261_vm1, %v399_v30, 0  ;;  %8256 = vmatmul.mubr.msk.bf16.vlgmr.msra.gmra.mrb[0].mxu1 %vm257_vm2, %v228_v25  ;;  %s8774_s27 = smov 120   ;;  %v8281_v25 = vld [vmem:[%s10769_s1 + $0x14] sm:$0xf] }
  0xa7   : > { %2285 = vrot.lane.b32.xlu1 %v9030_v27, %s8772_s30  ;;  %8258 = vmatprep.subr.msk.bf16.mxu0 %vm261_vm1, %v400_v31 }
  0xa8   : > { %419 = vmatpush1.bf16.msra.mxu0 %v407_v32  ;;  %v395_v35 = vpop.permute.xlu0 %394  ;;  %491 = vmatprep.mubr.bf16.mxu1 %v8758_v0 }
  0xa9   : > { %v397_v36 = vpop.permute.xlu1 %396  ;;  %v401_v37 = vsel %vm398_vm3, %v393_v29, %v395_v35 }
  0xaa   : > { %2287 = vrot.lane.b32.xlu0 %v9041_v33, %s8772_s30  ;;  %v402_v39 = vsel %vm398_vm3, %v395_v35, %v397_v36  ;;  %v413_v40 = vsel %vm261_vm1, %v401_v37, 0 }
  0xab   : > { %2289 = vrot.lane.b32.xlu1 %v9049_v34, %s8772_s30  ;;  %8260 = vmatprep.subr.msk.bf16.mxu1 %vm261_vm1, %v402_v39 }
  0xac   : > { %460 = vmatpush1.bf16.msra.mxu1 %v413_v40  ;;  %v534_v43 = vpop.permute.xlu0 %533  ;;  %8259 = vmatmul.mubr.msk.bf16.vlgmr.msra.gmra.mrb[4].mxu0 %vm257_vm2, %v8257_v38 }
  0xad   : > { %v536_v44 = vpop.permute.xlu1 %535  ;;  %595 = vmatprep.mubr.bf16.mxu0 %v8758_v0 }
  0xae   : > { %2291 = vrot.lane.b32.xlu0 %v9062_v41, %s8772_s30  ;;  %v544_v45 = vsel %vm543_vm4, %v534_v43, %v536_v44 }
  0xaf   : > { %2293 = vrot.lane.b32.xlu1 %v9067_v42, %s8772_s30  ;;  %8261 = vmatmul.mubr.msk.bf16.vlgmr.msra.gmra.mrb[4].mxu1 %vm257_vm2, %v8257_v38  ;;  %v552_v49 = vsel %vm261_vm1, %v544_v45, 0  ;;  %v8287_v38 = vld [vmem:[%s10769_s1 + $0x18] sm:$0xf] }
  0xb0   : > { %v538_v46 = vpop.permute.xlu0 %537  ;;  %636 = vmatprep.mubr.bf16.mxu1 %v8758_v0 }
  0xb1   : > { %v540_v47 = vpop.permute.xlu1 %539  ;;  %v545_v48 = vsel %vm543_vm4, %v536_v44, %v538_v46 }
  0xb2   : > { %2430 = vrot.lane.b32.xlu0 %v9030_v27, %s8773_s28  ;;  %8264 = vmatprep.subr.msk.bf16.mxu0 %vm261_vm1, %v545_v48  ;;  %v546_v50 = vsel %vm543_vm4, %v538_v46, %v540_v47 }
  0xb3   : > { %2432 = vrot.lane.b32.xlu1 %v9041_v33, %s8773_s28  ;;  %564 = vmatpush1.bf16.msra.mxu0 %v552_v49  ;;  %v558_v55 = vsel %vm261_vm1, %v546_v50, 0 }
  0xb4   : > { %v542_v51 = vpop.permute.xlu0 %541 }
  0xb5   : > { %v679_v52 = vpop.permute.xlu1 %678  ;;  %v547_v53 = vsel %vm543_vm4, %v540_v47, %v542_v51 }
  0xb6   : > { %2434 = vrot.lane.b32.xlu0 %v9049_v34, %s8773_s28  ;;  %8266 = vmatprep.subr.msk.bf16.mxu1 %vm261_vm1, %v547_v53 }
  0xb7   : > { %2436 = vrot.lane.b32.xlu1 %v9062_v41, %s8773_s28  ;;  %605 = vmatpush1.bf16.msra.mxu1 %v558_v55 }
  0xb8   : > { %v681_v56 = vpop.permute.xlu0 %680  ;;  %8265 = vmatmul.mubr.msk.bf16.vlgmr.msra.gmra.mrb[8].mxu0 %vm257_vm2, %v8263_v54 }
  0xb9   : > { %v683_v57 = vpop.permute.xlu1 %682  ;;  %v689_v58 = vsel %vm688_vm5, %v679_v52, %v681_v56  ;;  %740 = vmatprep.mubr.bf16.mxu0 %v8758_v0 }
  0xba   : > { %2438 = vrot.lane.b32.xlu0 %v9067_v42, %s8773_s28  ;;  %v690_v59 = vsel %vm688_vm5, %v681_v56, %v683_v57  ;;  %v697_v60 = vsel %vm261_vm1, %v689_v58, 0  ;;  %8267 = vmatmul.mubr.msk.bf16.vlgmr.msra.gmra.mrb[8].mxu1 %vm257_vm2, %v8263_v54  ;;  %v8293_v54 = vld [vmem:[%s10769_s1 + $0x1c] sm:$0xf] }
  0xbb   : > { %2575 = vrot.lane.b32.xlu1 %v9030_v27, %s8774_s27  ;;  %8270 = vmatprep.subr.msk.bf16.mxu0 %vm261_vm1, %v690_v59 }
  0xbc   : > { %709 = vmatpush1.bf16.msra.mxu0 %v697_v60  ;;  %v685_v61 = vpop.permute.xlu0 %684  ;;  %781 = vmatprep.mubr.bf16.mxu1 %v8758_v0 }
  0xbd   : > { %v687_v62 = vpop.permute.xlu1 %686  ;;  %v691_v63 = vsel %vm688_vm5, %v683_v57, %v685_v61 }
  0xbe   : > { %2577 = vrot.lane.b32.xlu0 %v9041_v33, %s8774_s27  ;;  %v692_v2 = vsel %vm688_vm5, %v685_v61, %v687_v62  ;;  %v703_v3 = vsel %vm261_vm1, %v691_v63, 0 }
  0xbf   : > { %2579 = vrot.lane.b32.xlu1 %v9049_v34, %s8774_s27  ;;  %8272 = vmatprep.subr.msk.bf16.mxu1 %vm261_vm1, %v692_v2 }
  0xc0   : > { %750 = vmatpush1.bf16.msra.mxu1 %v703_v3  ;;  %v824_v4 = vpop.permute.xlu0 %823  ;;  %8271 = vmatmul.mubr.msk.bf16.vlgmr.msra.gmra.mrb[12].mxu0 %vm257_vm2, %v8269_v1 }
  0xc1   : > { %v826_v5 = vpop.permute.xlu1 %825  ;;  %885 = vmatprep.mubr.bf16.mxu0 %v8758_v0 }
  0xc2   : > { %2581 = vrot.lane.b32.xlu0 %v9062_v41, %s8774_s27  ;;  %v834_v6 = vsel %vm833_vm6, %v824_v4, %v826_v5 }
  0xc3   : > { %2583 = vrot.lane.b32.xlu1 %v9067_v42, %s8774_s27  ;;  %8273 = vmatmul.mubr.msk.bf16.vlgmr.msra.gmra.mrb[12].mxu1 %vm257_vm2, %v8269_v1  ;;  %v842_v10 = vsel %vm261_vm1, %v834_v6, 0  ;;  %v8299_v1 = vld [vmem:[%s10769_s1 + $0x20] sm:$0xf] }
  0xc4   : > { %v828_v7 = vpop.permute.xlu0 %827  ;;  %926 = vmatprep.mubr.bf16.mxu1 %v8758_v0 }
  0xc5   : > { %v830_v8 = vpop.permute.xlu1 %829  ;;  %v835_v9 = vsel %vm833_vm6, %v826_v5, %v828_v7 }
  0xc6   : > { %2720 = vrot.lane.b32.xlu0 %v9030_v27, %s8775_s23  ;;  %8276 = vmatprep.subr.msk.bf16.mxu0 %vm261_vm1, %v835_v9  ;;  %v836_v12 = vsel %vm833_vm6, %v828_v7, %v830_v8 }
  0xc7   : > { %2722 = vrot.lane.b32.xlu1 %v9041_v33, %s8775_s23  ;;  %854 = vmatpush1.bf16.msra.mxu0 %v842_v10  ;;  %v848_v16 = vsel %vm261_vm1, %v836_v12, 0 }
  0xc8   : > { %v832_v13 = vpop.permute.xlu0 %831 }
  0xc9   : > { %v969_v14 = vpop.permute.xlu1 %968  ;;  %v837_v15 = vsel %vm833_vm6, %v830_v8, %v832_v13 }
  0xca   : > { %2724 = vrot.lane.b32.xlu0 %v9049_v34, %s8775_s23  ;;  %8277 = vmatmul.mubr.msk.bf16.vlgmr.msra.gmra.mrb[16].mxu0 %vm257_vm2, %v8275_v11 }
  0xcb   : > { %2726 = vrot.lane.b32.xlu1 %v9062_v41, %s8775_s23  ;;  %8278 = vmatprep.subr.msk.bf16.mxu1 %vm261_vm1, %v837_v15  ;;  %v8305_v15 = vld [vmem:[%s10769_s1 + $0x24] sm:$0xf] }
  0xcc   : > { %895 = vmatpush1.bf16.msra.mxu1 %v848_v16  ;;  %v971_v17 = vpop.permute.xlu0 %970  ;;  %1030 = vmatprep.mubr.bf16.mxu0 %v8758_v0 }
  0xcd   : > { %v973_v18 = vpop.permute.xlu1 %972  ;;  %v979_v19 = vsel %vm978_vm7, %v969_v14, %v971_v17 }
  0xce   : > { %2728 = vrot.lane.b32.xlu0 %v9067_v42, %s8775_s23  ;;  %v980_v20 = vsel %vm978_vm7, %v971_v17, %v973_v18  ;;  %v987_v21 = vsel %vm261_vm1, %v979_v19, 0 }
  0xcf   : > { %2865 = vrot.lane.b32.xlu1 %v9030_v27, %s8759_s6  ;;  %8279 = vmatmul.mubr.msk.bf16.vlgmr.msra.gmra.mrb[16].mxu1 %vm257_vm2, %v8275_v11 }
  0xd0   : > { %8282 = vmatprep.subr.msk.bf16.mxu0 %vm261_vm1, %v980_v20  ;;  %v975_v22 = vpop.permute.xlu0 %974  ;;  %1071 = vmatprep.mubr.bf16.mxu1 %v8758_v0 }
  0xd1   : > { %999 = vmatpush1.bf16.msra.mxu0 %v987_v21  ;;  %v977_v23 = vpop.permute.xlu1 %976  ;;  %v981_v24 = vsel %vm978_vm7, %v973_v18, %v975_v22 }
  0xd2   : > { %2867 = vrot.lane.b32.xlu0 %v9041_v33, %s8759_s6  ;;  %v982_v26 = vsel %vm978_vm7, %v975_v22, %v977_v23  ;;  %v993_v28 = vsel %vm261_vm1, %v981_v24, 0 }
  0xd3   : > { %2869 = vrot.lane.b32.xlu1 %v9049_v34, %s8759_s6  ;;  %8284 = vmatprep.subr.msk.bf16.mxu1 %vm261_vm1, %v982_v26 }
  0xd4   : > { %8283 = vmatmul.mubr.msk.bf16.vlgmr.msra.gmra.mrb[20].mxu0 %vm257_vm2, %v8281_v25  ;;  %1040 = vmatpush1.bf16.msra.mxu1 %v993_v28  ;;  %v1114_v29 = vpop.permute.xlu0 %1113 }
  0xd5   : > { %v1116_v30 = vpop.permute.xlu1 %1115  ;;  %1175 = vmatprep.mubr.bf16.mxu0 %v8758_v0 }
  0xd6   : > { %2871 = vrot.lane.b32.xlu0 %v9062_v41, %s8759_s6  ;;  %v1124_v31 = vsel %vm1123_vm8, %v1114_v29, %v1116_v30 }
  0xd7   : > { %2873 = vrot.lane.b32.xlu1 %v9067_v42, %s8759_s6  ;;  %8285 = vmatmul.mubr.msk.bf16.vlgmr.msra.gmra.mrb[20].mxu1 %vm257_vm2, %v8281_v25  ;;  %v1132_v37 = vsel %vm261_vm1, %v1124_v31, 0  ;;  %v8311_v25 = vld [vmem:[%s10769_s1 + $0x28] sm:$0xf] }
  0xd8   : > { %v1118_v32 = vpop.permute.xlu0 %1117  ;;  %1216 = vmatprep.mubr.bf16.mxu1 %v8758_v0 }
  0xd9   : > { %v1120_v35 = vpop.permute.xlu1 %1119  ;;  %v1125_v36 = vsel %vm1123_vm8, %v1116_v30, %v1118_v32 }
  0xda   : > { %3009 = vrot.lane.b32.xlu0 %v9030_v27, %s8760_s7  ;;  %8288 = vmatprep.subr.msk.bf16.mxu0 %vm261_vm1, %v1125_v36  ;;  %v1126_v39 = vsel %vm1123_vm8, %v1118_v32, %v1120_v35 }
  0xdb   : > { %3011 = vrot.lane.b32.xlu1 %v9041_v33, %s8760_s7  ;;  %1144 = vmatpush1.bf16.msra.mxu0 %v1132_v37  ;;  %v1138_v45 = vsel %vm261_vm1, %v1126_v39, 0 }
  0xdc   : > { %v1122_v40 = vpop.permute.xlu0 %1121 }
  0xdd   : > { %v1259_v43 = vpop.permute.xlu1 %1258  ;;  %v1127_v44 = vsel %vm1123_vm8, %v1120_v35, %v1122_v40 }
  0xde   : > { %3013 = vrot.lane.b32.xlu0 %v9049_v34, %s8760_s7  ;;  %8289 = vmatmul.mubr.msk.bf16.vlgmr.msra.gmra.mrb[24].mxu0 %vm257_vm2, %v8287_v38 }
  0xdf   : > { %3015 = vrot.lane.b32.xlu1 %v9062_v41, %s8760_s7  ;;  %8290 = vmatprep.subr.msk.bf16.mxu1 %vm261_vm1, %v1127_v44  ;;  %v8317_v44 = vld [vmem:[%s10769_s1 + $0x2c] sm:$0xf] }
  0xe0   : > { %1185 = vmatpush1.bf16.msra.mxu1 %v1138_v45  ;;  %v1261_v46 = vpop.permute.xlu0 %1260  ;;  %1320 = vmatprep.mubr.bf16.mxu0 %v8758_v0 }
  0xe1   : > { %v1263_v47 = vpop.permute.xlu1 %1262  ;;  %v1269_v48 = vsel %vm1268_vm9, %v1259_v43, %v1261_v46 }
  0xe2   : > { %3017 = vrot.lane.b32.xlu0 %v9067_v42, %s8760_s7  ;;  %v1270_v49 = vsel %vm1268_vm9, %v1261_v46, %v1263_v47  ;;  %v1277_v50 = vsel %vm261_vm1, %v1269_v48, 0 }
  0xe3   : > { %3153 = vrot.lane.b32.xlu1 %v9030_v27, %s8761_s8  ;;  %8291 = vmatmul.mubr.msk.bf16.vlgmr.msra.gmra.mrb[24].mxu1 %vm257_vm2, %v8287_v38 }
  0xe4   : > { %8294 = vmatprep.subr.msk.bf16.mxu0 %vm261_vm1, %v1270_v49  ;;  %v1265_v51 = vpop.permute.xlu0 %1264  ;;  %1361 = vmatprep.mubr.bf16.mxu1 %v8758_v0 }
  0xe5   : > { %1289 = vmatpush1.bf16.msra.mxu0 %v1277_v50  ;;  %v1267_v52 = vpop.permute.xlu1 %1266  ;;  %v1271_v53 = vsel %vm1268_vm9, %v1263_v47, %v1265_v51 }
  0xe6   : > { %3155 = vrot.lane.b32.xlu0 %v9041_v33, %s8761_s8  ;;  %v1272_v55 = vsel %vm1268_vm9, %v1265_v51, %v1267_v52  ;;  %v1283_v56 = vsel %vm261_vm1, %v1271_v53, 0 }
  0xe7   : > { %3157 = vrot.lane.b32.xlu1 %v9049_v34, %s8761_s8  ;;  %8296 = vmatprep.subr.msk.bf16.mxu1 %vm261_vm1, %v1272_v55 }
  0xe8   : > { %8295 = vmatmul.mubr.msk.bf16.vlgmr.msra.gmra.mrb[28].mxu0 %vm257_vm2, %v8293_v54  ;;  %1330 = vmatpush1.bf16.msra.mxu1 %v1283_v56  ;;  %v1404_v57 = vpop.permute.xlu0 %1403 }
  0xe9   : > { %v1406_v58 = vpop.permute.xlu1 %1405  ;;  %1465 = vmatprep.mubr.bf16.mxu0 %v8758_v0 }
  0xea   : > { %3159 = vrot.lane.b32.xlu0 %v9062_v41, %s8761_s8  ;;  %v1414_v59 = vsel %vm10785_vm10, %v1404_v57, %v1406_v58 }
  0xeb   : > { %3161 = vrot.lane.b32.xlu1 %v9067_v42, %s8761_s8  ;;  %8297 = vmatmul.mubr.msk.bf16.vlgmr.msra.gmra.mrb[28].mxu1 %vm257_vm2, %v8293_v54  ;;  %v1422_v63 = vsel %vm261_vm1, %v1414_v59, 0  ;;  %v8323_v54 = vld [vmem:[%s10769_s1 + $0x30] sm:$0xf]  ;;  %v2144_v59 = vsel %vm261_vm1, %v9030_v27, 0 }
  0xec   : > { %v1408_v60 = vpop.permute.xlu0 %1407  ;;  %1506 = vmatprep.mubr.bf16.mxu1 %v8758_v0 }
  0xed   : > { %v1410_v61 = vpop.permute.xlu1 %1409  ;;  %v1415_v62 = vsel %vm10785_vm10, %v1406_v58, %v1408_v60 }
  0xee   : > { %3297 = vrot.lane.b32.xlu0 %v9030_v27, %s8762_s9  ;;  %8300 = vmatprep.subr.msk.bf16.mxu0 %vm261_vm1, %v1415_v62  ;;  %v1416_v2 = vsel %vm10785_vm10, %v1408_v60, %v1410_v61 }
  0xef   : > { %3299 = vrot.lane.b32.xlu1 %v9041_v33, %s8762_s9  ;;  %1434 = vmatpush1.bf16.msra.mxu0 %v1422_v63  ;;  %v1428_v6 = vsel %vm261_vm1, %v1416_v2, 0  ;;  %v2150_v63 = vsel %vm261_vm1, %v9049_v34, 0 }
  0xf0   : > { %v1412_v3 = vpop.permute.xlu0 %1411 }
  0xf1   : > { %v1549_v4 = vpop.permute.xlu1 %1548  ;;  %v1417_v5 = vsel %vm10785_vm10, %v1410_v61, %v1412_v3  ;;  %v8329_v3 = vld [vmem:[%s10769_s1 + $0x34] sm:$0xf] }
  0xf2   : > { %3301 = vrot.lane.b32.xlu0 %v9049_v34, %s8762_s9  ;;  %8301 = vmatmul.mubr.msk.bf16.vlgmr.msra.gmra.mrb[32].mxu0 %vm257_vm2, %v8299_v1 }
  0xf3   : > { %3303 = vrot.lane.b32.xlu1 %v9062_v41, %s8762_s9  ;;  %8302 = vmatprep.subr.msk.bf16.mxu1 %vm261_vm1, %v1417_v5 }
  0xf4   : > { %1475 = vmatpush1.bf16.msra.mxu1 %v1428_v6  ;;  %v1551_v7 = vpop.permute.xlu0 %1550  ;;  %1610 = vmatprep.mubr.bf16.mxu0 %v8758_v0 }
  0xf5   : > { %v1553_v8 = vpop.permute.xlu1 %1552  ;;  %v1559_v9 = vsel %vm1558_vm11, %v1549_v4, %v1551_v7 }
  0xf6   : > { %3305 = vrot.lane.b32.xlu0 %v9067_v42, %s8762_s9  ;;  %v1560_v10 = vsel %vm1558_vm11, %v1551_v7, %v1553_v8  ;;  %v1567_v11 = vsel %vm261_vm1, %v1559_v9, 0 }
  0xf7   : > { %3441 = vrot.lane.b32.xlu1 %v9030_v27, %s8763_s10  ;;  %8303 = vmatmul.mubr.msk.bf16.vlgmr.msra.gmra.mrb[32].mxu1 %vm257_vm2, %v8299_v1 }
  0xf8   : > { %8306 = vmatprep.subr.msk.bf16.mxu0 %vm261_vm1, %v1560_v10  ;;  %v1555_v12 = vpop.permute.xlu0 %1554  ;;  %1651 = vmatprep.mubr.bf16.mxu1 %v8758_v0  ;;  %v8339_v10 = vld [vmem:[%s10769_s1 + $0x38] sm:$0xf] }
  0xf9   : > { %1579 = vmatpush1.bf16.msra.mxu0 %v1567_v11  ;;  %v1557_v13 = vpop.permute.xlu1 %1556  ;;  %v1561_v14 = vsel %vm1558_vm11, %v1553_v8, %v1555_v12 }
  0xfa   : > { %3443 = vrot.lane.b32.xlu0 %v9041_v33, %s8763_s10  ;;  %v1562_v16 = vsel %vm1558_vm11, %v1555_v12, %v1557_v13  ;;  %v1573_v17 = vsel %vm261_vm1, %v1561_v14, 0 }
  0xfb   : > { %3445 = vrot.lane.b32.xlu1 %v9049_v34, %s8763_s10  ;;  %8308 = vmatprep.subr.msk.bf16.mxu1 %vm261_vm1, %v1562_v16 }
  0xfc   : > { %8307 = vmatmul.mubr.msk.bf16.vlgmr.msra.gmra.mrb[36].mxu0 %vm257_vm2, %v8305_v15  ;;  %1620 = vmatpush1.bf16.msra.mxu1 %v1573_v17  ;;  %v1694_v18 = vpop.permute.xlu0 %1693 }
  0xfd   : > { %v1696_v19 = vpop.permute.xlu1 %1695  ;;  %1755 = vmatprep.mubr.bf16.mxu0 %v8758_v0 }
  0xfe   : > { %3447 = vrot.lane.b32.xlu0 %v9062_v41, %s8763_s10  ;;  %v1704_v20 = vsel %vm257_vm2, %v1694_v18, %v1696_v19  ;;  %v8350_v18 = vld [vmem:[%s10769_s1 + $0x3c] sm:$0xf] }
  0xff   : > { %3449 = vrot.lane.b32.xlu1 %v9067_v42, %s8763_s10  ;;  %8309 = vmatmul.mubr.msk.bf16.vlgmr.msra.gmra.mrb[36].mxu1 %vm257_vm2, %v8305_v15  ;;  %v1712_v24 = vsel %vm261_vm1, %v1704_v20, 0 }
 0x100   : > { %v1698_v21 = vpop.permute.xlu0 %1697  ;;  %1796 = vmatprep.mubr.bf16.mxu1 %v8758_v0 }
 0x101   : > { %v1700_v22 = vpop.permute.xlu1 %1699  ;;  %v1705_v23 = vsel %vm257_vm2, %v1696_v19, %v1698_v21 }
 0x102   : > { %3585 = vrot.lane.b32.xlu0 %v9030_v27, %s8764_s11  ;;  %8312 = vmatprep.subr.msk.bf16.mxu0 %vm261_vm1, %v1705_v23  ;;  %v1706_v26 = vsel %vm257_vm2, %v1698_v21, %v1700_v22 }
 0x103   : > { %3587 = vrot.lane.b32.xlu1 %v9041_v33, %s8764_s11  ;;  %1724 = vmatpush1.bf16.msra.mxu0 %v1712_v24  ;;  %v1718_v31 = vsel %vm261_vm1, %v1706_v26, 0 }
 0x104   : > { %v1702_v28 = vpop.permute.xlu0 %1701 }
 0x105   : > { %v1839_v29 = vpop.permute.xlu1 %1838  ;;  %v1707_v30 = vsel %vm257_vm2, %v1700_v22, %v1702_v28 }
 0x106   : > { %3589 = vrot.lane.b32.xlu0 %v9049_v34, %s8764_s11  ;;  %8313 = vmatmul.mubr.msk.bf16.vlgmr.msra.gmra.mrb[40].mxu0 %vm257_vm2, %v8311_v25 }
 0x107   : > { %3591 = vrot.lane.b32.xlu1 %v9062_v41, %s8764_s11  ;;  %8314 = vmatprep.subr.msk.bf16.mxu1 %vm261_vm1, %v1707_v30  ;;  %v8356_v30 = vld [vmem:[%s10769_s1 + $0x40] sm:$0xf] }
 0x108   : > { %1765 = vmatpush1.bf16.msra.mxu1 %v1718_v31  ;;  %v1841_v32 = vpop.permute.xlu0 %1840  ;;  %1900 = vmatprep.mubr.bf16.mxu0 %v8758_v0 }
 0x109   : > { %v1843_v35 = vpop.permute.xlu1 %1842  ;;  %v1849_v36 = vsel %vm1848_vm12, %v1839_v29, %v1841_v32 }
 0x10a   : > { %3593 = vrot.lane.b32.xlu0 %v9067_v42, %s8764_s11  ;;  %v1850_v37 = vsel %vm1848_vm12, %v1841_v32, %v1843_v35  ;;  %v1857_v38 = vsel %vm261_vm1, %v1849_v36, 0 }
 0x10b   : > { %3729 = vrot.lane.b32.xlu1 %v9030_v27, %s8765_s12  ;;  %8315 = vmatmul.mubr.msk.bf16.vlgmr.msra.gmra.mrb[40].mxu1 %vm257_vm2, %v8311_v25 }
 0x10c   : > { %8318 = vmatprep.subr.msk.bf16.mxu0 %vm261_vm1, %v1850_v37  ;;  %v1845_v39 = vpop.permute.xlu0 %1844  ;;  %1941 = vmatprep.mubr.bf16.mxu1 %v8758_v0 }
 0x10d   : > { %1869 = vmatpush1.bf16.msra.mxu0 %v1857_v38  ;;  %v1847_v40 = vpop.permute.xlu1 %1846  ;;  %v1851_v43 = vsel %vm1848_vm12, %v1843_v35, %v1845_v39 }
 0x10e   : > { %3731 = vrot.lane.b32.xlu0 %v9041_v33, %s8765_s12  ;;  %v1852_v45 = vsel %vm1848_vm12, %v1845_v39, %v1847_v40  ;;  %v1863_v46 = vsel %vm261_vm1, %v1851_v43, 0  ;;  %v8362_v43 = vld [vmem:[%s10769_s1 + $0x44] sm:$0xf] }
 0x10f   : > { %3733 = vrot.lane.b32.xlu1 %v9049_v34, %s8765_s12  ;;  %8320 = vmatprep.subr.msk.bf16.mxu1 %vm261_vm1, %v1852_v45 }
 0x110   : > { %8319 = vmatmul.mubr.msk.bf16.vlgmr.msra.gmra.mrb[44].mxu0 %vm257_vm2, %v8317_v44  ;;  %1910 = vmatpush1.bf16.msra.mxu1 %v1863_v46  ;;  %v1984_v47 = vpop.permute.xlu0 %1983 }
 0x111   : > { %v1986_v48 = vpop.permute.xlu1 %1985  ;;  %2045 = vmatprep.mubr.bf16.mxu0 %v8758_v0 }
 0x112   : > { %3735 = vrot.lane.b32.xlu0 %v9062_v41, %s8765_s12  ;;  %v1994_v49 = vsel %vm1993_vm13, %v1984_v47, %v1986_v48 }
 0x113   : > { %3737 = vrot.lane.b32.xlu1 %v9067_v42, %s8765_s12  ;;  %8321 = vmatmul.mubr.msk.bf16.vlgmr.msra.gmra.mrb[44].mxu1 %vm257_vm2, %v8317_v44  ;;  %v2002_v53 = vsel %vm261_vm1, %v1994_v49, 0 }
 0x114   : > { %v1988_v50 = vpop.permute.xlu0 %1987  ;;  %2086 = vmatprep.mubr.bf16.mxu1 %v8758_v0 }
 0x115   : > { %v1990_v51 = vpop.permute.xlu1 %1989  ;;  %v1995_v52 = vsel %vm1993_vm13, %v1986_v48, %v1988_v50 }
 0x116   : > { %3873 = vrot.lane.b32.xlu0 %v9030_v27, %s8766_s13  ;;  %8324 = vmatprep.subr.msk.bf16.mxu0 %vm261_vm1, %v1995_v52  ;;  %v1996_v55 = vsel %vm1993_vm13, %v1988_v50, %v1990_v51 }
 0x117   : > { %3875 = vrot.lane.b32.xlu1 %v9041_v33, %s8766_s13  ;;  %2014 = vmatpush1.bf16.msra.mxu0 %v2002_v53  ;;  %v2008_v60 = vsel %vm261_vm1, %v1996_v55, 0 }
 0x118   : > { %v1992_v56 = vpop.permute.xlu0 %1991  ;;  %8334 = vmatprep.subr.msk.bf16.mxu0 %vm261_vm1, %v9041_v33 }
 0x119   : > { %v2286_v57 = vpop.permute.xlu1 %2285  ;;  %v1997_v58 = vsel %vm1993_vm13, %v1990_v51, %v1992_v56 }
 0x11a   : > { %3877 = vrot.lane.b32.xlu0 %v9049_v34, %s8766_s13  ;;  %8325 = vmatmul.mubr.msk.bf16.vlgmr.msra.gmra.mrb[48].mxu0 %vm257_vm2, %v8323_v54 }
 0x11b   : > { %3879 = vrot.lane.b32.xlu1 %v9062_v41, %s8766_s13  ;;  %8326 = vmatprep.subr.msk.bf16.mxu1 %vm261_vm1, %v1997_v58 }
 0x11c   : > { %2055 = vmatpush1.bf16.msra.mxu1 %v2008_v60  ;;  %v2288_v61 = vpop.permute.xlu0 %2287  ;;  %2156 = vmatpush1.bf16.msra.mxu0 %v2144_v59 }
 0x11d   : > { %v2290_v62 = vpop.permute.xlu1 %2289  ;;  %8336 = vmatprep.subr.msk.bf16.mxu1 %vm261_vm1, %v9062_v41  ;;  %2187 = vmatprep.mubr.bf16.mxu0 %v8758_v0  ;;  %v2296_v2 = vsel %vm10779_vm14, %v2286_v57, %v2288_v61 }
 0x11e   : > { %3881 = vrot.lane.b32.xlu0 %v9067_v42, %s8766_s13  ;;  %v2297_v1 = vsel %vm10779_vm14, %v2288_v61, %v2290_v62 }
 0x11f   : > { %4017 = vrot.lane.b32.xlu1 %v9030_v27, %s10783_s14  ;;  %8327 = vmatmul.mubr.msk.bf16.vlgmr.msra.gmra.mrb[48].mxu1 %vm257_vm2, %v8323_v54  ;;  %v2304_v27 = vsel %vm261_vm1, %v2296_v2, 0  ;;  %v8368_v54 = vld [vmem:[%s10769_s1 + $0x48] sm:$0xf] }
 0x120   : > { %8345 = vmatprep.subr.msk.bf16.mxu0 %vm261_vm1, %v2297_v1  ;;  %v2292_v4 = vpop.permute.xlu0 %2291  ;;  %2197 = vmatpush1.bf16.msra.mxu1 %v2150_v63 }
 0x121   : > { %v2294_v5 = vpop.permute.xlu1 %2293  ;;  %2228 = vmatprep.mubr.bf16.mxu1 %v8758_v0  ;;  %v2298_v7 = vsel %vm10779_vm14, %v2290_v62, %v2292_v4 }
 0x122   : > { %4019 = vrot.lane.b32.xlu0 %v9041_v33, %s10783_s14  ;;  %8335 = vmatmul.mubr.msk.bf16.vlgmr.msra.gmra.mrb[52].mxu0 %vm257_vm2, %v8329_v3  ;;  %v2299_v6 = vsel %vm10779_vm14, %v2292_v4, %v2294_v5  ;;  %vm2585_vm14 = vcmask 982016   ;;  %v8374_v4 = vld [vmem:[%s10769_s1 + $0x4c] sm:$0xf] }
 0x123   : > { %4021 = vrot.lane.b32.xlu1 %v9049_v34, %s10783_s14  ;;  %2316 = vmatpush1.bf16.msra.mxu0 %v2304_v27  ;;  %v2310_v34 = vsel %vm261_vm1, %v2298_v7, 0 }
 0x124   : > { %8347 = vmatprep.subr.msk.bf16.mxu1 %vm261_vm1, %v2299_v6  ;;  %v2431_v8 = vpop.permute.xlu0 %2430  ;;  %2347 = vmatprep.mubr.bf16.mxu0 %v8758_v0 }
 0x125   : > { %v2433_v9 = vpop.permute.xlu1 %2432 }
 0x126   : > { %4023 = vrot.lane.b32.xlu0 %v9062_v41, %s10783_s14  ;;  %v2441_v33 = vsel %vm10780_vm15, %v2431_v8, %v2433_v9 }
 0x127   : > { %4025 = vrot.lane.b32.xlu1 %v9067_v42, %s10783_s14  ;;  %8337 = vmatmul.mubr.msk.bf16.vlgmr.msra.gmra.mrb[52].mxu1 %vm257_vm2, %v8329_v3  ;;  %v2449_v13 = vsel %vm261_vm1, %v2441_v33, 0  ;;  %s10790_s14 = smov 8  }
 0x128   : > { %2357 = vmatpush1.bf16.msra.mxu1 %v2310_v34  ;;  %v2435_v11 = vpop.permute.xlu0 %2434  ;;  %2388 = vmatprep.mubr.bf16.mxu1 %v8758_v0 }
 0x129   : > { %v2437_v12 = vpop.permute.xlu1 %2436  ;;  %v2442_v41 = vsel %vm10780_vm15, %v2433_v9, %v2435_v11 }
 0x12a   : > { %8346 = vmatmul.mubr.msk.bf16.vlgmr.msra.gmra.mrb[56].mxu0 %vm257_vm2, %v8339_v10  ;;  %8351 = vmatprep.subr.msk.bf16.mxu0 %vm261_vm1, %v2442_v41  ;;  %v2443_v42 = vsel %vm10780_vm15, %v2435_v11, %v2437_v12 }
 0x12b   : > { %2461 = vmatpush1.bf16.msra.mxu0 %v2449_v13  ;;  %2492 = vmatprep.mubr.bf16.mxu0 %v8758_v0  ;;  %v2455_v17 = vsel %vm261_vm1, %v2443_v42, 0 }
 0x12c   : > { %v2439_v14 = vpop.permute.xlu0 %2438 }
 0x12d   : > { %v2576_v15 = vpop.permute.xlu1 %2575  ;;  %v2444_v16 = vsel %vm10780_vm15, %v2437_v12, %v2439_v14  ;;  %vm2730_vm15 = vcmask 973824   ;;  %v8380_v12 = vld [vmem:[%s10769_s1 + $0x50] sm:$0xf] }
 0x12e   : > { %8353 = vmatprep.subr.msk.bf16.mxu1 %vm261_vm1, %v2444_v16 }
 0x12f   : > { %8348 = vmatmul.mubr.msk.bf16.vlgmr.msra.gmra.mrb[56].mxu1 %vm257_vm2, %v8339_v10 }
 0x130   : > { %2502 = vmatpush1.bf16.msra.mxu1 %v2455_v17  ;;  %v2578_v19 = vpop.permute.xlu0 %2577  ;;  %2533 = vmatprep.mubr.bf16.mxu1 %v8758_v0 }
 0x131   : > { %v2580_v20 = vpop.permute.xlu1 %2579  ;;  %v2586_v21 = vsel %vm2585_vm14, %v2576_v15, %v2578_v19 }
 0x132   : > { %8352 = vmatmul.mubr.msk.bf16.vlgmr.msra.gmra.mrb[60].mxu0 %vm257_vm2, %v8350_v18  ;;  %v2587_v22 = vsel %vm2585_vm14, %v2578_v19, %v2580_v20  ;;  %v2594_v23 = vsel %vm261_vm1, %v2586_v21, 0 }
 0x133   : > { %8357 = vmatprep.subr.msk.bf16.mxu0 %vm261_vm1, %v2587_v22  ;;  %2637 = vmatprep.mubr.bf16.mxu0 %v8758_v0 }
 0x134   : > { %2606 = vmatpush1.bf16.msra.mxu0 %v2594_v23  ;;  %v2582_v24 = vpop.permute.xlu0 %2581  ;;  %v8386_v23 = vld [vmem:[%s10769_s1 + $0x54] sm:$0xf] }
 0x135   : > { %v2584_v25 = vpop.permute.xlu1 %2583  ;;  %v2588_v26 = vsel %vm2585_vm14, %v2580_v20, %v2582_v24 }
 0x136   : > { %v2589_v28 = vsel %vm2585_vm14, %v2582_v24, %v2584_v25  ;;  %v2600_v29 = vsel %vm261_vm1, %v2588_v26, 0 }
 0x137   : > { %8354 = vmatmul.mubr.msk.bf16.vlgmr.msra.gmra.mrb[60].mxu1 %vm257_vm2, %v8350_v18  ;;  %8359 = vmatprep.subr.msk.bf16.mxu1 %vm261_vm1, %v2589_v28 }
 0x138   : > { %2647 = vmatpush1.bf16.msra.mxu1 %v2600_v29  ;;  %v2721_v31 = vpop.permute.xlu0 %2720  ;;  %2678 = vmatprep.mubr.bf16.mxu1 %v8758_v0 }
 0x139   : > { %v2723_v32 = vpop.permute.xlu1 %2722 }
 0x13a   : > { %8358 = vmatmul.mubr.msk.bf16.vlgmr.msra.gmra.mrb[64].mxu0 %vm257_vm2, %v8356_v30  ;;  %v2731_v35 = vsel %vm2730_vm15, %v2721_v31, %v2723_v32 }
 0x13b   : > { %2782 = vmatprep.mubr.bf16.mxu0 %v8758_v0  ;;  %v2739_v39 = vsel %vm261_vm1, %v2731_v35, 0 }
 0x13c   : > { %v2725_v36 = vpop.permute.xlu0 %2724 }
 0x13d   : > { %v2727_v37 = vpop.permute.xlu1 %2726  ;;  %v2732_v38 = vsel %vm2730_vm15, %v2723_v32, %v2725_v36 }
 0x13e   : > { %8363 = vmatprep.subr.msk.bf16.mxu0 %vm261_vm1, %v2732_v38  ;;  %v2733_v40 = vsel %vm2730_vm15, %v2725_v36, %v2727_v37  ;;  %v358_v36 = vlaneseq  ;;  %v8392_v38 = vld [vmem:[%s10769_s1 + $0x58] sm:$0xf] }
 0x13f   : > { %8360 = vmatmul.mubr.msk.bf16.vlgmr.msra.gmra.mrb[64].mxu1 %vm257_vm2, %v8356_v30  ;;  %2751 = vmatpush1.bf16.msra.mxu0 %v2739_v39  ;;  %v2745_v47 = vsel %vm261_vm1, %v2733_v40, 0 }
 0x140   : > { %v2729_v44 = vpop.permute.xlu0 %2728  ;;  %2823 = vmatprep.mubr.bf16.mxu1 %v8758_v0 }
 0x141   : > { %v2866_v45 = vpop.permute.xlu1 %2865  ;;  %v2734_v46 = vsel %vm2730_vm15, %v2727_v37, %v2729_v44 }
 0x142   : > { %8364 = vmatmul.mubr.msk.bf16.vlgmr.msra.gmra.mrb[68].mxu0 %vm257_vm2, %v8362_v43  ;;  %8365 = vmatprep.subr.msk.bf16.mxu1 %vm261_vm1, %v2734_v46 }
 0x143   : > { %2792 = vmatpush1.bf16.msra.mxu1 %v2745_v47  ;;  %2926 = vmatprep.mubr.bf16.mxu0 %v8758_v0 }
 0x144   : > { %v2868_v48 = vpop.permute.xlu0 %2867 }
 0x145   : > { %v2870_v49 = vpop.permute.xlu1 %2869  ;;  %v2875_v50 = vsel %vm252_vm0, %v2866_v45, %v2868_v48  ;;  %v359_v45 = vshrl.u32 %v358_v36, 7 }
 0x146   : > { %v2876_v51 = vsel %vm252_vm0, %v2868_v48, %v2870_v49  ;;  %v2883_v52 = vsel %vm261_vm1, %v2875_v50, 0 }
 0x147   : > { %8366 = vmatmul.mubr.msk.bf16.vlgmr.msra.gmra.mrb[68].mxu1 %vm257_vm2, %v8362_v43  ;;  %8369 = vmatprep.subr.msk.bf16.mxu0 %vm261_vm1, %v2876_v51  ;;  %v9510_v48 = vsub.s32 0, %v359_v45  ;;  %v356_v51 = vld [vmem:[%s10771_s3] sm:$0xf] }
 0x148   : > { %2895 = vmatpush1.bf16.msra.mxu0 %v2883_v52  ;;  %v2872_v53 = vpop.permute.xlu0 %2871  ;;  %2967 = vmatprep.mubr.bf16.mxu1 %v8758_v0  ;;  %v9517_v52 = vsub.s32 1, %v359_v45 }
 0x149   : > { %v2874_v55 = vpop.permute.xlu1 %2873  ;;  %v2877_v56 = vsel %vm252_vm0, %v2870_v49, %v2872_v53 }
 0x14a   : > { %v2878_v57 = vsel %vm252_vm0, %v2872_v53, %v2874_v55  ;;  %v2889_v58 = vsel %vm261_vm1, %v2877_v56, 0 }
 0x14b   : > { %8370 = vmatmul.mubr.msk.bf16.vlgmr.msra.gmra.mrb[72].mxu0 %vm257_vm2, %v8368_v54  ;;  %8371 = vmatprep.subr.msk.bf16.mxu1 %vm261_vm1, %v2878_v57 }
 0x14c   : > { %2936 = vmatpush1.bf16.msra.mxu1 %v2889_v58  ;;  %v3010_v59 = vpop.permute.xlu0 %3009  ;;  %3070 = vmatprep.mubr.bf16.mxu0 %v8758_v0  ;;  %v9521_v58 = vsub.s32 2, %v359_v45 }
 0x14d   : > { %v3012_v60 = vpop.permute.xlu1 %3011 }
 0x14e   : > { %v3019_v61 = vsel %vm398_vm3, %v3010_v59, %v3012_v60  ;;  %v8262_v59 = vld [vmem:[%s10771_s3 + $0x4] sm:$0xf] }
 0x14f   : > { %8372 = vmatmul.mubr.msk.bf16.vlgmr.msra.gmra.mrb[72].mxu1 %vm257_vm2, %v8368_v54  ;;  %v3027_v2 = vsel %vm261_vm1, %v3019_v61, 0  ;;  %v361_v61 = vrot.slane %v356_v51, %v9510_v48 }
 0x150   : > { %v3014_v62 = vpop.permute.xlu0 %3013  ;;  %3111 = vmatprep.mubr.bf16.mxu1 %v8758_v0 }
 0x151   : > { %v3016_v63 = vpop.permute.xlu1 %3015  ;;  %v3020_v1 = vsel %vm398_vm3, %v3012_v60, %v3014_v62 }
 0x152   : > { %8375 = vmatprep.subr.msk.bf16.mxu0 %vm261_vm1, %v3020_v1  ;;  %v3021_v3 = vsel %vm398_vm3, %v3014_v62, %v3016_v63  ;;  %v9529_v1 = vsub.s32 3, %v359_v45  ;;  %v8268_v45 = vld [vmem:[%s10771_s3 + $0x8] sm:$0xf] }
 0x153   : > { %3039 = vmatpush1.bf16.msra.mxu0 %v3027_v2  ;;  %v3033_v7 = vsel %vm261_vm1, %v3021_v3, 0  ;;  %v8398_v3 = vld [vmem:[%s10769_s1 + $0x5c] sm:$0xf] }
 0x154   : > { %v3018_v5 = vpop.permute.xlu0 %3017 }
 0x155   : > { %v3154_v27 = vpop.permute.xlu1 %3153  ;;  %v3022_v6 = vsel %vm398_vm3, %v3016_v63, %v3018_v5 }
 0x156   : > { %8376 = vmatmul.mubr.msk.bf16.vlgmr.msra.gmra.mrb[76].mxu0 %vm257_vm2, %v8374_v4  ;;  %8377 = vmatprep.subr.msk.bf16.mxu1 %vm261_vm1, %v3022_v6  ;;  %v506_v6 = vrot.slane %v8262_v59, %v9510_v48 }
 0x157   : > { %3080 = vmatpush1.bf16.msra.mxu1 %v3033_v7  ;;  %3214 = vmatprep.mubr.bf16.mxu0 %v8758_v0 }
 0x158   : > { %v3156_v8 = vpop.permute.xlu0 %3155 }
 0x159   : > { %v3158_v9 = vpop.permute.xlu1 %3157  ;;  %v3163_v33 = vsel %vm543_vm4, %v3154_v27, %v3156_v8 }
 0x15a   : > { %8378 = vmatmul.mubr.msk.bf16.vlgmr.msra.gmra.mrb[76].mxu1 %vm257_vm2, %v8374_v4  ;;  %v3164_v34 = vsel %vm543_vm4, %v3156_v8, %v3158_v9  ;;  %v3171_v10 = vsel %vm261_vm1, %v3163_v33, 0  ;;  %v365_v4 = vrot.slane %v356_v51, %v9517_v52  ;;  %v369_v33 = vrot.slane %v356_v51, %v9521_v58 }
 0x15b   : > { %8381 = vmatprep.subr.msk.bf16.mxu0 %vm261_vm1, %v3164_v34  ;;  %3255 = vmatprep.mubr.bf16.mxu1 %v8758_v0  ;;  %v510_v34 = vrot.slane %v8262_v59, %v9517_v52 }
 0x15c   : > { %3183 = vmatpush1.bf16.msra.mxu0 %v3171_v10  ;;  %v3160_v11 = vpop.permute.xlu0 %3159 }
 0x15d   : > { %v3162_v41 = vpop.permute.xlu1 %3161  ;;  %v3165_v13 = vsel %vm543_vm4, %v3158_v9, %v3160_v11 }
 0x15e   : > { %v3166_v42 = vsel %vm543_vm4, %v3160_v11, %v3162_v41  ;;  %v3177_v14 = vsel %vm261_vm1, %v3165_v13, 0  ;;  %v373_v41 = vrot.slane %v356_v51, %v9529_v1 }
 0x15f   : > { %8382 = vmatmul.mubr.msk.bf16.vlgmr.msra.gmra.mrb[80].mxu0 %vm257_vm2, %v8380_v12  ;;  %8383 = vmatprep.subr.msk.bf16.mxu1 %vm261_vm1, %v3166_v42 }
 0x160   : > { %3224 = vmatpush1.bf16.msra.mxu1 %v3177_v14  ;;  %v3298_v15 = vpop.permute.xlu0 %3297  ;;  %3358 = vmatprep.mubr.bf16.mxu0 %v8758_v0  ;;  %v514_v14 = vrot.slane %v8262_v59, %v9521_v58 }
 0x161   : > { %v3300_v16 = vpop.permute.xlu1 %3299 }
 0x162   : > { %v3307_v17 = vsel %vm688_vm5, %v3298_v15, %v3300_v16 }
 0x163   : > { %8384 = vmatmul.mubr.msk.bf16.vlgmr.msra.gmra.mrb[80].mxu1 %vm257_vm2, %v8380_v12  ;;  %v3315_v21 = vsel %vm261_vm1, %v3307_v17, 0 }
 0x164   : > { %v3302_v18 = vpop.permute.xlu0 %3301  ;;  %3399 = vmatprep.mubr.bf16.mxu1 %v8758_v0 }
 0x165   : > { %v3304_v19 = vpop.permute.xlu1 %3303  ;;  %v3308_v20 = vsel %vm688_vm5, %v3300_v16, %v3302_v18 }
 0x166   : > { %8387 = vmatprep.subr.msk.bf16.mxu0 %vm261_vm1, %v3308_v20  ;;  %v3309_v22 = vsel %vm688_vm5, %v3302_v18, %v3304_v19  ;;  %v518_v18 = vrot.slane %v8262_v59, %v9529_v1  ;;  %v659_v59 = vrot.slane %v8268_v45, %v9521_v58 }
 0x167   : > { %3327 = vmatpush1.bf16.msra.mxu0 %v3315_v21  ;;  %v3321_v28 = vsel %vm261_vm1, %v3309_v22, 0 }
 0x168   : > { %v3306_v24 = vpop.permute.xlu0 %3305 }
 0x169   : > { %v3442_v25 = vpop.permute.xlu1 %3441  ;;  %v3310_v26 = vsel %vm688_vm5, %v3304_v19, %v3306_v24 }
 0x16a   : > { %8388 = vmatmul.mubr.msk.bf16.vlgmr.msra.gmra.mrb[84].mxu0 %vm257_vm2, %v8386_v23  ;;  %8389 = vmatprep.subr.msk.bf16.mxu1 %vm261_vm1, %v3310_v26 }
 0x16b   : > { %3368 = vmatpush1.bf16.msra.mxu1 %v3321_v28  ;;  %3502 = vmatprep.mubr.bf16.mxu0 %v8758_v0 }
 0x16c   : > { %v3444_v29 = vpop.permute.xlu0 %3443 }
 0x16d   : > { %v3446_v30 = vpop.permute.xlu1 %3445  ;;  %v3451_v31 = vsel %vm833_vm6, %v3442_v25, %v3444_v29 }
 0x16e   : > { %8390 = vmatmul.mubr.msk.bf16.vlgmr.msra.gmra.mrb[84].mxu1 %vm257_vm2, %v8386_v23  ;;  %v3452_v32 = vsel %vm833_vm6, %v3444_v29, %v3446_v30  ;;  %v3459_v35 = vsel %vm261_vm1, %v3451_v31, 0 }
 0x16f   : > { %8393 = vmatprep.subr.msk.bf16.mxu0 %vm261_vm1, %v3452_v32  ;;  %3543 = vmatprep.mubr.bf16.mxu1 %v8758_v0 }
 0x170   : > { %3471 = vmatpush1.bf16.msra.mxu0 %v3459_v35  ;;  %v3448_v37 = vpop.permute.xlu0 %3447 }
 0x171   : > { %v3450_v39 = vpop.permute.xlu1 %3449  ;;  %v3453_v40 = vsel %vm833_vm6, %v3446_v30, %v3448_v37 }
 0x172   : > { %v3454_v43 = vsel %vm833_vm6, %v3448_v37, %v3450_v39  ;;  %v3465_v44 = vsel %vm261_vm1, %v3453_v40, 0  ;;  %v8404_v37 = vld [vmem:[%s10769_s1 + $0x60] sm:$0xf] }
 0x173   : > { %8394 = vmatmul.mubr.msk.bf16.vlgmr.msra.gmra.mrb[88].mxu0 %vm257_vm2, %v8392_v38  ;;  %8395 = vmatprep.subr.msk.bf16.mxu1 %vm261_vm1, %v3454_v43 }
 0x174   : > { %3512 = vmatpush1.bf16.msra.mxu1 %v3465_v44  ;;  %v3586_v46 = vpop.permute.xlu0 %3585  ;;  %3646 = vmatprep.mubr.bf16.mxu0 %v8758_v0 }
 0x175   : > { %v3588_v47 = vpop.permute.xlu1 %3587 }
 0x176   : > { %v3595_v49 = vsel %vm978_vm7, %v3586_v46, %v3588_v47 }
 0x177   : > { %8396 = vmatmul.mubr.msk.bf16.vlgmr.msra.gmra.mrb[88].mxu1 %vm257_vm2, %v8392_v38  ;;  %v308_v50 = vpop.f32.mrb[0].mxu0  ;;  %v3603_v60 = vsel %vm261_vm1, %v3595_v49, 0 }
 0x178   : > { %v3590_v53 = vpop.permute.xlu0 %3589  ;;  %3687 = vmatprep.mubr.bf16.mxu1 %v8758_v0  ;;  %v310_v54 = vpop.f32.mrb[1].mxu0  ;;  %v378_v12 = vmul.f32 %v361_v61, %v308_v50 }
 0x179   : > { %v3592_v55 = vpop.permute.xlu1 %3591  ;;  %v3596_v56 = vsel %vm978_vm7, %v3588_v47, %v3590_v53  ;;  %v312_v57 = vpop.f32.mrb[2].mxu0  ;;  %v379_v13 = vmul.f32 %v365_v4, %v310_v54 }
 0x17a   : > { %8399 = vmatprep.subr.msk.bf16.mxu0 %vm261_vm1, %v3596_v56  ;;  %v313_v62 = vpop.f32.mrb[3].mxu0  ;;  %v349_v63 = vpop.f32.mrb[0].mxu1  ;;  %v3597_v2 = vsel %vm978_vm7, %v3590_v53, %v3592_v55  ;;  %v651_v53 = vrot.slane %v8268_v45, %v9510_v48 }
 0x17b   : > { %3615 = vmatpush1.bf16.msra.mxu0 %v3603_v60  ;;  %v351_v5 = vpop.f32.mrb[1].mxu1  ;;  %v3609_v11 = vsel %vm261_vm1, %v3597_v2, 0  ;;  %v380_v21 = vmul.f32 %v369_v33, %v349_v63  ;;  %v663_v63 = vrot.slane %v8268_v45, %v9529_v1 }
 0x17c   : > { %v3594_v27 = vpop.permute.xlu0 %3593  ;;  %v353_v7 = vpop.f32.mrb[2].mxu1  ;;  %v381_v28 = vmul.f32 %v373_v41, %v351_v5 }
 0x17d   : > { %v3730_v8 = vpop.permute.xlu1 %3729  ;;  %v3598_v9 = vsel %vm978_vm7, %v3592_v55, %v3594_v27  ;;  %v354_v10 = vpop.f32.mrb[3].mxu1  ;;  %v655_v55 = vrot.slane %v8268_v45, %v9517_v52  ;;  %v8274_v27 = vld [vmem:[%s10771_s3 + $0xc] sm:$0xf] }
 0x17e   : > { %8400 = vmatmul.mubr.msk.bf16.vlgmr.msra.gmra.mrb[92].mxu0 %vm257_vm2, %v8398_v3  ;;  %8401 = vmatprep.subr.msk.bf16.mxu1 %vm261_vm1, %v3598_v9 }
 0x17f   : > { %3656 = vmatpush1.bf16.msra.mxu1 %v3609_v11  ;;  %3790 = vmatprep.mubr.bf16.mxu0 %v8758_v0  ;;  %v452_v42 = vpop.f32.mrb[4].mxu0 }
 0x180   : > { %v3732_v15 = vpop.permute.xlu0 %3731  ;;  %v523_v16 = vmul.f32 %v506_v6, %v452_v42  ;;  %v454_v17 = vpop.f32.mrb[5].mxu0 }
 0x181   : > { %v3734_v19 = vpop.permute.xlu1 %3733  ;;  %v3739_v20 = vsel %vm1123_vm8, %v3730_v8, %v3732_v15  ;;  %v524_v22 = vmul.f32 %v510_v34, %v454_v17  ;;  %v456_v23 = vpop.f32.mrb[6].mxu0  ;;  %v8410_v34 = vld [vmem:[%s10769_s1 + $0x64] sm:$0xf] }
 0x182   : > { %8402 = vmatmul.mubr.msk.bf16.vlgmr.msra.gmra.mrb[92].mxu1 %vm257_vm2, %v8398_v3  ;;  %v3740_v24 = vsel %vm1123_vm8, %v3732_v15, %v3734_v19  ;;  %v3747_v25 = vsel %vm261_vm1, %v3739_v20, 0  ;;  %v527_v26 = vadd.f32 %v523_v16, %v378_v12  ;;  %v457_v29 = vpop.f32.mrb[7].mxu0  ;;  %v493_v30 = vpop.f32.mrb[4].mxu1  ;;  %v804_v23 = vrot.slane %v8274_v27, %v9521_v58 }
 0x183   : > { %8405 = vmatprep.subr.msk.bf16.mxu0 %vm261_vm1, %v3740_v24  ;;  %3831 = vmatprep.mubr.bf16.mxu1 %v8758_v0  ;;  %v528_v31 = vadd.f32 %v524_v22, %v379_v13  ;;  %v525_v32 = vmul.f32 %v514_v14, %v493_v30  ;;  %v495_v35 = vpop.f32.mrb[5].mxu1  ;;  %v796_v13 = vrot.slane %v8274_v27, %v9510_v48 }
 0x184   : > { %3759 = vmatpush1.bf16.msra.mxu0 %v3747_v25  ;;  %v3736_v36 = vpop.permute.xlu0 %3735  ;;  %v526_v38 = vmul.f32 %v518_v18, %v495_v35  ;;  %v497_v39 = vpop.f32.mrb[6].mxu1  ;;  %v800_v18 = vrot.slane %v8274_v27, %v9517_v52 }
 0x185   : > { %v3738_v40 = vpop.permute.xlu1 %3737  ;;  %v3741_v43 = vsel %vm1123_vm8, %v3734_v19, %v3736_v36  ;;  %v529_v44 = vadd.f32 %v525_v32, %v380_v21  ;;  %v498_v46 = vpop.f32.mrb[7].mxu1 }
 0x186   : > { %v3742_v47 = vsel %vm1123_vm8, %v3736_v36, %v3738_v40  ;;  %v3753_v49 = vsel %vm261_vm1, %v3741_v43, 0  ;;  %v530_v50 = vadd.f32 %v526_v38, %v381_v28  ;;  %v808_v28 = vrot.slane %v8274_v27, %v9529_v1 }
 0x187   : > { %8406 = vmatmul.mubr.msk.bf16.vlgmr.msra.gmra.mrb[96].mxu0 %vm257_vm2, %v8404_v37  ;;  %8407 = vmatprep.subr.msk.bf16.mxu1 %vm261_vm1, %v3742_v47  ;;  %v8416_v47 = vld [vmem:[%s10769_s1 + $0x68] sm:$0xf] }
 0x188   : > { %3800 = vmatpush1.bf16.msra.mxu1 %v3753_v49  ;;  %v3874_v51 = vpop.permute.xlu0 %3873  ;;  %3934 = vmatprep.mubr.bf16.mxu0 %v8758_v0 }
 0x189   : > { %v3876_v54 = vpop.permute.xlu1 %3875 }
 0x18a   : > { %v3883_v56 = vsel %vm1268_vm9, %v3874_v51, %v3876_v54 }
 0x18b   : > { %8408 = vmatmul.mubr.msk.bf16.vlgmr.msra.gmra.mrb[96].mxu1 %vm257_vm2, %v8404_v37  ;;  %v597_v57 = vpop.f32.mrb[8].mxu0  ;;  %v3891_v6 = vsel %vm261_vm1, %v3883_v56, 0 }
 0x18c   : > { %v3878_v60 = vpop.permute.xlu0 %3877  ;;  %3975 = vmatprep.mubr.bf16.mxu1 %v8758_v0  ;;  %v668_v61 = vmul.f32 %v651_v53, %v597_v57  ;;  %v599_v62 = vpop.f32.mrb[9].mxu0 }
 0x18d   : > { %v3880_v2 = vpop.permute.xlu1 %3879  ;;  %v3884_v3 = vsel %vm1268_vm9, %v3876_v54, %v3878_v60  ;;  %v669_v4 = vmul.f32 %v655_v55, %v599_v62  ;;  %v601_v5 = vpop.f32.mrb[10].mxu0 }
 0x18e   : > { %8411 = vmatprep.subr.msk.bf16.mxu0 %vm261_vm1, %v3884_v3  ;;  %v672_v7 = vadd.f32 %v668_v61, %v527_v26  ;;  %v602_v8 = vpop.f32.mrb[11].mxu0  ;;  %v638_v9 = vpop.f32.mrb[8].mxu1  ;;  %v3885_v33 = vsel %vm1268_vm9, %v3878_v60, %v3880_v2 }
 0x18f   : > { %3903 = vmatpush1.bf16.msra.mxu0 %v3891_v6  ;;  %v673_v10 = vadd.f32 %v669_v4, %v528_v31  ;;  %v670_v11 = vmul.f32 %v659_v59, %v638_v9  ;;  %v640_v12 = vpop.f32.mrb[9].mxu1  ;;  %v3897_v20 = vsel %vm261_vm1, %v3885_v33, 0  ;;  %v8286_v9 = vld [vmem:[%s10771_s3 + $0x14] sm:$0xf] }
 0x190   : > { %v3882_v41 = vpop.permute.xlu0 %3881  ;;  %v671_v42 = vmul.f32 %v663_v63, %v640_v12  ;;  %v642_v14 = vpop.f32.mrb[10].mxu1 }
 0x191   : > { %v4018_v15 = vpop.permute.xlu1 %4017  ;;  %v3886_v16 = vsel %vm1268_vm9, %v3880_v2, %v3882_v41  ;;  %v674_v17 = vadd.f32 %v670_v11, %v529_v44  ;;  %v643_v19 = vpop.f32.mrb[11].mxu1  ;;  %v8280_v44 = vld [vmem:[%s10771_s3 + $0x10] sm:$0xf]  ;;  %v1086_v11 = vrot.slane %v8286_v9, %v9510_v48 }
 0x192   : > { %8412 = vmatmul.mubr.msk.bf16.vlgmr.msra.gmra.mrb[100].mxu0 %vm257_vm2, %v8410_v34  ;;  %8413 = vmatprep.subr.msk.bf16.mxu1 %vm261_vm1, %v3886_v16  ;;  %v675_v21 = vadd.f32 %v671_v42, %v530_v50  ;;  %v941_v59 = vrot.slane %v8280_v44, %v9510_v48  ;;  %v945_v61 = vrot.slane %v8280_v44, %v9517_v52 }
 0x193   : > { %3944 = vmatpush1.bf16.msra.mxu1 %v3897_v20  ;;  %4078 = vmatprep.mubr.bf16.mxu0 %v8758_v0  ;;  %v742_v22 = vpop.f32.mrb[12].mxu0  ;;  %v949_v5 = vrot.slane %v8280_v44, %v9521_v58  ;;  %v1090_v42 = vrot.slane %v8286_v9, %v9517_v52  ;;  %v1098_v20 = vrot.slane %v8286_v9, %v9529_v1 }
 0x194   : > { %v4020_v24 = vpop.permute.xlu0 %4019  ;;  %v813_v25 = vmul.f32 %v796_v13, %v742_v22  ;;  %v744_v26 = vpop.f32.mrb[13].mxu0 }
 0x195   : > { %v4022_v29 = vpop.permute.xlu1 %4021  ;;  %v4027_v30 = vsel %vm10785_vm10, %v4018_v15, %v4020_v24  ;;  %v814_v31 = vmul.f32 %v800_v18, %v744_v26  ;;  %v746_v32 = vpop.f32.mrb[14].mxu0 }
 0x196   : > { %8414 = vmatmul.mubr.msk.bf16.vlgmr.msra.gmra.mrb[100].mxu1 %vm257_vm2, %v8410_v34  ;;  %v4028_v35 = vsel %vm10785_vm10, %v4020_v24, %v4022_v29  ;;  %v4035_v36 = vsel %vm261_vm1, %v4027_v30, 0  ;;  %v817_v37 = vadd.f32 %v813_v25, %v672_v7  ;;  %v747_v38 = vpop.f32.mrb[15].mxu0  ;;  %v783_v39 = vpop.f32.mrb[12].mxu1  ;;  %v953_v7 = vrot.slane %v8280_v44, %v9529_v1  ;;  %v8292_v30 = vld [vmem:[%s10771_s3 + $0x18] sm:$0xf] }
 0x197   : > { %8417 = vmatprep.subr.msk.bf16.mxu0 %vm261_vm1, %v4028_v35  ;;  %4119 = vmatprep.mubr.bf16.mxu1 %v8758_v0  ;;  %v818_v40 = vadd.f32 %v814_v31, %v673_v10  ;;  %v815_v43 = vmul.f32 %v804_v23, %v783_v39  ;;  %v785_v45 = vpop.f32.mrb[13].mxu1  ;;  %v1231_v38 = vrot.slane %v8292_v30, %v9510_v48 }
 0x198   : > { %4047 = vmatpush1.bf16.msra.mxu0 %v4035_v36  ;;  %v4024_v46 = vpop.permute.xlu0 %4023  ;;  %v816_v49 = vmul.f32 %v808_v28, %v785_v45  ;;  %v787_v50 = vpop.f32.mrb[14].mxu1  ;;  %v1235_v39 = vrot.slane %v8292_v30, %v9517_v52 }
 0x199   : > { %v4026_v51 = vpop.permute.xlu1 %4025  ;;  %v4029_v53 = vsel %vm10785_vm10, %v4022_v29, %v4024_v46  ;;  %v819_v54 = vadd.f32 %v815_v43, %v674_v17  ;;  %v788_v55 = vpop.f32.mrb[15].mxu1  ;;  %v1094_v17 = vrot.slane %v8286_v9, %v9521_v58  ;;  %v1243_v50 = vrot.slane %v8292_v30, %v9529_v1 }
 0x19a   : > { %v4030_v56 = vsel %vm10785_vm10, %v4024_v46, %v4026_v51  ;;  %v4041_v57 = vsel %vm261_vm1, %v4029_v53, 0  ;;  %v820_v60 = vadd.f32 %v816_v49, %v675_v21  ;;  %v1239_v46 = vrot.slane %v8292_v30, %v9521_v58 }
 0x19b   : > { %8418 = vmatmul.mubr.msk.bf16.vlgmr.msra.gmra.mrb[104].mxu0 %vm257_vm2, %v8416_v47  ;;  %8419 = vmatprep.subr.msk.bf16.mxu1 %vm261_vm1, %v4030_v56 }
 0x19c   : > { %4088 = vmatpush1.bf16.msra.mxu1 %v4041_v57  ;;  %4310 = vmatprep.mubr.bf16.mxu0 %v8758_v0 }
 0x19d   : > { %v887_v62 = vpop.f32.mrb[16].mxu0 }
 0x19e   : > { %v958_v63 = vmul.f32 %v941_v59, %v887_v62  ;;  %v889_v2 = vpop.f32.mrb[17].mxu0 }
 0x19f   : > { %8420 = vmatmul.mubr.msk.bf16.vlgmr.msra.gmra.mrb[104].mxu1 %vm257_vm2, %v8416_v47  ;;  %v959_v3 = vmul.f32 %v945_v61, %v889_v2  ;;  %v891_v4 = vpop.f32.mrb[18].mxu0 }
 0x1a0   : > { %v962_v27 = vadd.f32 %v958_v63, %v817_v37  ;;  %v892_v6 = vpop.f32.mrb[19].mxu0  ;;  %4351 = vmatprep.mubr.bf16.mxu1 %v8758_v0 }
 0x1a1   : > { %v963_v8 = vadd.f32 %v959_v3, %v818_v40 }
 0x1a2   : > { %v928_v33 = vpop.f32.mrb[16].mxu1 }
 0x1a3   : > { %v960_v34 = vmul.f32 %v949_v5, %v928_v33  ;;  %v930_v10 = vpop.f32.mrb[17].mxu1 }
 0x1a4   : > { %v961_v12 = vmul.f32 %v953_v7, %v930_v10  ;;  %v932_v41 = vpop.f32.mrb[18].mxu1 }
 0x1a5   : > { %v964_v13 = vadd.f32 %v960_v34, %v819_v54  ;;  %v933_v14 = vpop.f32.mrb[19].mxu1  ;;  %v8298_v54 = vld [vmem:[%s10771_s3 + $0x1c] sm:$0xf] }
 0x1a6   : > { %v965_v15 = vadd.f32 %v961_v12, %v820_v60  ;;  %v1376_v60 = vrot.slane %v8298_v54, %v9510_v48  ;;  %v1380_v63 = vrot.slane %v8298_v54, %v9517_v52  ;;  %v1384_v5 = vrot.slane %v8298_v54, %v9521_v58 }
 0x1a7   : > { %v1032_v16 = vpop.f32.mrb[20].mxu0  ;;  %v1388_v7 = vrot.slane %v8298_v54, %v9529_v1 }
 0x1a8   : > { %v1103_v18 = vmul.f32 %v1086_v11, %v1032_v16  ;;  %v1034_v19 = vpop.f32.mrb[21].mxu0 }
 0x1a9   : > { %v1104_v21 = vmul.f32 %v1090_v42, %v1034_v19  ;;  %v1036_v22 = vpop.f32.mrb[22].mxu0 }
 0x1aa   : > { %v1107_v23 = vadd.f32 %v1103_v18, %v962_v27  ;;  %v1073_v24 = vpop.f32.mrb[20].mxu1  ;;  %v1037_v25 = vpop.f32.mrb[23].mxu0 }
 0x1ab   : > { %v1108_v26 = vadd.f32 %v1104_v21, %v963_v8  ;;  %v1105_v28 = vmul.f32 %v1094_v17, %v1073_v24  ;;  %v1075_v29 = vpop.f32.mrb[21].mxu1 }
 0x1ac   : > { %v1106_v31 = vmul.f32 %v1098_v20, %v1075_v29  ;;  %v1077_v32 = vpop.f32.mrb[22].mxu1 }
 0x1ad   : > { %v1109_v35 = vadd.f32 %v1105_v28, %v964_v13  ;;  %v1078_v36 = vpop.f32.mrb[23].mxu1  ;;  %v8304_v13 = vld [vmem:[%s10771_s3 + $0x20] sm:$0xf] }
 0x1ae   : > { %v1110_v37 = vadd.f32 %v1106_v31, %v965_v15  ;;  %v1521_v18 = vrot.slane %v8304_v13, %v9510_v48  ;;  %v1525_v19 = vrot.slane %v8304_v13, %v9517_v52  ;;  %v1529_v24 = vrot.slane %v8304_v13, %v9521_v58  ;;  %v8310_v31 = vld [vmem:[%s10771_s3 + $0x24] sm:$0xf] }
 0x1af   : > { %v1533_v28 = vrot.slane %v8304_v13, %v9529_v1 }
 0x1b1   : > { %v1177_v40 = vpop.f32.mrb[24].mxu0 }
 0x1b2   : > { %v1248_v43 = vmul.f32 %v1231_v38, %v1177_v40  ;;  %v1179_v44 = vpop.f32.mrb[25].mxu0  ;;  %v1666_v38 = vrot.slane %v8310_v31, %v9510_v48 }
 0x1b3   : > { %v1249_v45 = vmul.f32 %v1235_v39, %v1179_v44  ;;  %v1181_v47 = vpop.f32.mrb[26].mxu0 }
 0x1b4   : > { %v1252_v49 = vadd.f32 %v1248_v43, %v1107_v23  ;;  %v1182_v51 = vpop.f32.mrb[27].mxu0  ;;  %v1670_v43 = vrot.slane %v8310_v31, %v9517_v52  ;;  %v1674_v47 = vrot.slane %v8310_v31, %v9521_v58 }
 0x1b5   : > { %v1253_v53 = vadd.f32 %v1249_v45, %v1108_v26  ;;  %v1678_v51 = vrot.slane %v8310_v31, %v9529_v1 }
 0x1b6   : > { %v1218_v55 = vpop.f32.mrb[24].mxu1 }
 0x1b7   : > { %v1250_v56 = vmul.f32 %v1239_v46, %v1218_v55  ;;  %v1220_v57 = vpop.f32.mrb[25].mxu1 }
 0x1b8   : > { %v1251_v59 = vmul.f32 %v1243_v50, %v1220_v57  ;;  %v1222_v61 = vpop.f32.mrb[26].mxu1 }
 0x1b9   : > { %v1254_v62 = vadd.f32 %v1250_v56, %v1109_v35  ;;  %v1223_v2 = vpop.f32.mrb[27].mxu1 }
 0x1ba   : > { %v1255_v3 = vadd.f32 %v1251_v59, %v1110_v37 }
 0x1bb   : > { %v1322_v4 = vpop.f32.mrb[28].mxu0 }
 0x1bc   : > { %v1393_v27 = vmul.f32 %v1376_v60, %v1322_v4  ;;  %v1324_v6 = vpop.f32.mrb[29].mxu0 }
 0x1bd   : > { %v1394_v8 = vmul.f32 %v1380_v63, %v1324_v6  ;;  %v1326_v9 = vpop.f32.mrb[30].mxu0 }
 0x1be   : > { %v1397_v33 = vadd.f32 %v1393_v27, %v1252_v49  ;;  %v1363_v34 = vpop.f32.mrb[28].mxu1  ;;  %v1327_v10 = vpop.f32.mrb[31].mxu0 }
 0x1bf   : > { %v1398_v11 = vadd.f32 %v1394_v8, %v1253_v53  ;;  %v1395_v12 = vmul.f32 %v1384_v5, %v1363_v34  ;;  %v1365_v41 = vpop.f32.mrb[29].mxu1 }
 0x1c0   : > { %v1396_v42 = vmul.f32 %v1388_v7, %v1365_v41  ;;  %v1367_v14 = vpop.f32.mrb[30].mxu1 }
 0x1c1   : > { %v1399_v15 = vadd.f32 %v1395_v12, %v1254_v62  ;;  %v1368_v16 = vpop.f32.mrb[31].mxu1  ;;  %v8316_v62 = vld [vmem:[%s10771_s3 + $0x28] sm:$0xf] }
 0x1c2   : > { %v1400_v17 = vadd.f32 %v1396_v42, %v1255_v3  ;;  %v1811_v27 = vrot.slane %v8316_v62, %v9510_v48  ;;  %v1815_v6 = vrot.slane %v8316_v62, %v9517_v52  ;;  %v1819_v34 = vrot.slane %v8316_v62, %v9521_v58  ;;  %v8322_v42 = vld [vmem:[%s10771_s3 + $0x2c] sm:$0xf] }
 0x1c3   : > { %v1823_v12 = vrot.slane %v8316_v62, %v9529_v1 }
 0x1c5   : > { %v1467_v20 = vpop.f32.mrb[32].mxu0 }
 0x1c6   : > { %v1538_v21 = vmul.f32 %v1521_v18, %v1467_v20  ;;  %v1469_v22 = vpop.f32.mrb[33].mxu0  ;;  %v1956_v18 = vrot.slane %v8322_v42, %v9510_v48 }
 0x1c7   : > { %v1539_v23 = vmul.f32 %v1525_v19, %v1469_v22  ;;  %v1471_v25 = vpop.f32.mrb[34].mxu0 }
 0x1c8   : > { %v1542_v26 = vadd.f32 %v1538_v21, %v1397_v33  ;;  %v1472_v29 = vpop.f32.mrb[35].mxu0  ;;  %v1960_v21 = vrot.slane %v8322_v42, %v9517_v52  ;;  %v1964_v25 = vrot.slane %v8322_v42, %v9521_v58 }
 0x1c9   : > { %v1543_v30 = vadd.f32 %v1539_v23, %v1398_v11  ;;  %v1968_v29 = vrot.slane %v8322_v42, %v9529_v1  ;;  %v8349_v42 = vld [vmem:[%s10771_s3 + $0x38] sm:$0xf] }
 0x1ca   : > { %v1508_v32 = vpop.f32.mrb[32].mxu1 }
 0x1cb   : > { %v1540_v35 = vmul.f32 %v1529_v24, %v1508_v32  ;;  %v1510_v36 = vpop.f32.mrb[33].mxu1 }
 0x1cc   : > { %v1541_v37 = vmul.f32 %v1533_v28, %v1510_v36  ;;  %v1512_v39 = vpop.f32.mrb[34].mxu1 }
 0x1cd   : > { %v1544_v40 = vadd.f32 %v1540_v35, %v1399_v15  ;;  %v1513_v44 = vpop.f32.mrb[35].mxu1 }
 0x1ce   : > { %v1545_v45 = vadd.f32 %v1541_v37, %v1400_v17 }
 0x1cf   : > { %v1612_v46 = vpop.f32.mrb[36].mxu0 }
 0x1d0   : > { %v1683_v49 = vmul.f32 %v1666_v38, %v1612_v46  ;;  %v1614_v50 = vpop.f32.mrb[37].mxu0 }
 0x1d1   : > { %v1684_v53 = vmul.f32 %v1670_v43, %v1614_v50  ;;  %v1616_v54 = vpop.f32.mrb[38].mxu0 }
 0x1d2   : > { %v1687_v55 = vadd.f32 %v1683_v49, %v1542_v26  ;;  %v1653_v56 = vpop.f32.mrb[36].mxu1  ;;  %v1617_v57 = vpop.f32.mrb[39].mxu0 }
 0x1d3   : > { %v1688_v59 = vadd.f32 %v1684_v53, %v1543_v30  ;;  %v1685_v60 = vmul.f32 %v1674_v47, %v1653_v56  ;;  %v1655_v61 = vpop.f32.mrb[37].mxu1 }
 0x1d4   : > { %v1686_v63 = vmul.f32 %v1678_v51, %v1655_v61  ;;  %v1657_v2 = vpop.f32.mrb[38].mxu1 }
 0x1d5   : > { %v1689_v3 = vadd.f32 %v1685_v60, %v1544_v40  ;;  %v1658_v4 = vpop.f32.mrb[39].mxu1  ;;  %v8328_v40 = vld [vmem:[%s10771_s3 + $0x30] sm:$0xf] }
 0x1d6   : > { %v1690_v5 = vadd.f32 %v1686_v63, %v1545_v45  ;;  %v2101_v49 = vrot.slane %v8328_v40, %v9510_v48  ;;  %v2105_v50 = vrot.slane %v8328_v40, %v9517_v52  ;;  %v2109_v56 = vrot.slane %v8328_v40, %v9521_v58 }
 0x1d7   : > { %v2113_v61 = vrot.slane %v8328_v40, %v9529_v1 }
 0x1d9   : > { %v1757_v7 = vpop.f32.mrb[40].mxu0 }
 0x1da   : > { %v1828_v8 = vmul.f32 %v1811_v27, %v1757_v7  ;;  %v1759_v9 = vpop.f32.mrb[41].mxu0 }
 0x1db   : > { %v1829_v33 = vmul.f32 %v1815_v6, %v1759_v9  ;;  %v1761_v10 = vpop.f32.mrb[42].mxu0 }
 0x1dc   : > { %v1832_v11 = vadd.f32 %v1828_v8, %v1687_v55  ;;  %v1762_v41 = vpop.f32.mrb[43].mxu0 }
 0x1dd   : > { %v1833_v13 = vadd.f32 %v1829_v33, %v1688_v59  ;;  %v8338_v59 = vld [vmem:[%s10771_s3 + $0x34] sm:$0xf] }
 0x1de   : > { %v1798_v14 = vpop.f32.mrb[40].mxu1  ;;  %v2246_v27 = vrot.slane %v8338_v59, %v9517_v52  ;;  %v2250_v41 = vrot.slane %v8338_v59, %v9521_v58 }
 0x1df   : > { %v1830_v15 = vmul.f32 %v1819_v34, %v1798_v14  ;;  %v1800_v16 = vpop.f32.mrb[41].mxu1 }
 0x1e0   : > { %v1831_v17 = vmul.f32 %v1823_v12, %v1800_v16  ;;  %v1802_v19 = vpop.f32.mrb[42].mxu1 }
 0x1e1   : > { %v1834_v20 = vadd.f32 %v1830_v15, %v1689_v3  ;;  %v1803_v22 = vpop.f32.mrb[43].mxu1  ;;  %v2242_v3 = vrot.slane %v8338_v59, %v9510_v48  ;;  %v2254_v15 = vrot.slane %v8338_v59, %v9529_v1  ;;  %v2403_v19 = vrot.slane %v8349_v42, %v9510_v48 }
 0x1e2   : > { %v1835_v23 = vadd.f32 %v1831_v17, %v1690_v5  ;;  %v2407_v22 = vrot.slane %v8349_v42, %v9517_v52 }
 0x1e3   : > { %v1902_v24 = vpop.f32.mrb[44].mxu0 }
 0x1e4   : > { %v1973_v26 = vmul.f32 %v1956_v18, %v1902_v24  ;;  %v1904_v28 = vpop.f32.mrb[45].mxu0 }
 0x1e5   : > { %v1974_v30 = vmul.f32 %v1960_v21, %v1904_v28  ;;  %v1906_v31 = vpop.f32.mrb[46].mxu0 }
 0x1e6   : > { %v1977_v32 = vadd.f32 %v1973_v26, %v1832_v11  ;;  %v1943_v35 = vpop.f32.mrb[44].mxu1  ;;  %v1907_v36 = vpop.f32.mrb[47].mxu0 }
 0x1e7   : > { %v1978_v37 = vadd.f32 %v1974_v30, %v1833_v13  ;;  %v1975_v38 = vmul.f32 %v1964_v25, %v1943_v35  ;;  %v1945_v39 = vpop.f32.mrb[45].mxu1  ;;  %v2411_v35 = vrot.slane %v8349_v42, %v9521_v58 }
 0x1e8   : > { %v1976_v43 = vmul.f32 %v1968_v29, %v1945_v39  ;;  %v1947_v44 = vpop.f32.mrb[46].mxu1  ;;  %v2415_v39 = vrot.slane %v8349_v42, %v9529_v1 }
 0x1e9   : > { %v1979_v45 = vadd.f32 %v1975_v38, %v1834_v20  ;;  %v1948_v46 = vpop.f32.mrb[47].mxu1 }
 0x1ea   : > { %v1980_v47 = vadd.f32 %v1976_v43, %v1835_v23 }
 0x1ed   : > { %v2047_v51 = vpop.f32.mrb[48].mxu0 }
 0x1ee   : > { %v2118_v53 = vmul.f32 %v2101_v49, %v2047_v51  ;;  %v2049_v54 = vpop.f32.mrb[49].mxu0 }
 0x1ef   : > { %v2119_v55 = vmul.f32 %v2105_v50, %v2049_v54  ;;  %v2051_v57 = vpop.f32.mrb[50].mxu0 }
 0x1f0   : > { %v2122_v60 = vadd.f32 %v2118_v53, %v1977_v32  ;;  %v2052_v62 = vpop.f32.mrb[51].mxu0 }
 0x1f1   : > { %v2123_v63 = vadd.f32 %v2119_v55, %v1978_v37  ;;  %v8355_v37 = vld [vmem:[%s10771_s3 + $0x3c] sm:$0xf] }
 0x1f2   : > { %v2088_v2 = vpop.f32.mrb[48].mxu1  ;;  %v2552_v49 = vrot.slane %v8355_v37, %v9517_v52 }
 0x1f3   : > { %v2120_v4 = vmul.f32 %v2109_v56, %v2088_v2  ;;  %v2090_v5 = vpop.f32.mrb[49].mxu1 }
 0x1f4   : > { %v2121_v6 = vmul.f32 %v2113_v61, %v2090_v5  ;;  %v2092_v7 = vpop.f32.mrb[50].mxu1  ;;  %v2556_v61 = vrot.slane %v8355_v37, %v9521_v58 }
 0x1f5   : > { %v2124_v8 = vadd.f32 %v2120_v4, %v1979_v45  ;;  %v2189_v9 = vpop.f32.mrb[52].mxu0  ;;  %v2093_v33 = vpop.f32.mrb[51].mxu1  ;;  %v2548_v45 = vrot.slane %v8355_v37, %v9510_v48 }
 0x1f6   : > { %v2125_v34 = vadd.f32 %v2121_v6, %v1980_v47  ;;  %v2259_v10 = vmul.f32 %v2242_v3, %v2189_v9  ;;  %v2191_v11 = vpop.f32.mrb[53].mxu0  ;;  %v2560_v3 = vrot.slane %v8355_v37, %v9529_v1 }
 0x1f7   : > { %v2260_v12 = vmul.f32 %v2246_v27, %v2191_v11  ;;  %v2193_v13 = vpop.f32.mrb[54].mxu0 }
 0x1f8   : > { %v2263_v14 = vadd.f32 %v2259_v10, %v2122_v60  ;;  %v2194_v16 = vpop.f32.mrb[55].mxu0 }
 0x1f9   : > { %v2264_v17 = vadd.f32 %v2260_v12, %v2123_v63  ;;  %v8361_v63 = vld [vmem:[%s10771_s3 + $0x40] sm:$0xf] }
 0x1fa   : > { %v2230_v18 = vpop.f32.mrb[52].mxu1  ;;  %v2693_v6 = vrot.slane %v8361_v63, %v9510_v48  ;;  %v2697_v9 = vrot.slane %v8361_v63, %v9517_v52 }
 0x1fb   : > { %v2261_v20 = vmul.f32 %v2250_v41, %v2230_v18  ;;  %v2232_v21 = vpop.f32.mrb[53].mxu1 }
 0x1fc   : > { %v2262_v23 = vmul.f32 %v2254_v15, %v2232_v21  ;;  %v2234_v24 = vpop.f32.mrb[54].mxu1  ;;  %v2701_v15 = vrot.slane %v8361_v63, %v9521_v58 }
 0x1fd   : > { %v2265_v25 = vadd.f32 %v2261_v20, %v2124_v8  ;;  %v2349_v26 = vpop.f32.mrb[56].mxu0  ;;  %v2235_v28 = vpop.f32.mrb[55].mxu1 }
 0x1fe   : > { %v2266_v29 = vadd.f32 %v2262_v23, %v2125_v34  ;;  %v2420_v30 = vmul.f32 %v2403_v19, %v2349_v26  ;;  %v2351_v31 = vpop.f32.mrb[57].mxu0  ;;  %v2705_v19 = vrot.slane %v8361_v63, %v9529_v1 }
 0x1ff   : > { %v2421_v32 = vmul.f32 %v2407_v22, %v2351_v31  ;;  %v2353_v36 = vpop.f32.mrb[58].mxu0 }
 0x200   : > { %v2424_v38 = vadd.f32 %v2420_v30, %v2263_v14  ;;  %v2354_v40 = vpop.f32.mrb[59].mxu0 }
 0x201   : > { %v2425_v43 = vadd.f32 %v2421_v32, %v2264_v17  ;;  %v8367_v17 = vld [vmem:[%s10771_s3 + $0x44] sm:$0xf] }
 0x202   : > { %v2390_v44 = vpop.f32.mrb[56].mxu1  ;;  %v2838_v23 = vrot.slane %v8367_v17, %v9510_v48  ;;  %v2842_v26 = vrot.slane %v8367_v17, %v9517_v52 }
 0x203   : > { %v2422_v46 = vmul.f32 %v2411_v35, %v2390_v44  ;;  %v2392_v47 = vpop.f32.mrb[57].mxu1  ;;  %v2850_v44 = vrot.slane %v8367_v17, %v9529_v1 }
 0x204   : > { %v2423_v50 = vmul.f32 %v2415_v39, %v2392_v47  ;;  %v2394_v51 = vpop.f32.mrb[58].mxu1  ;;  %v2846_v39 = vrot.slane %v8367_v17, %v9521_v58 }
 0x205   : > { %v2426_v53 = vadd.f32 %v2422_v46, %v2265_v25  ;;  %v2494_v54 = vpop.f32.mrb[60].mxu0  ;;  %v2395_v55 = vpop.f32.mrb[59].mxu1  ;;  %v8373_v46 = vld [vmem:[%s10771_s3 + $0x48] sm:$0xf] }
 0x206   : > { %v2427_v56 = vadd.f32 %v2423_v50, %v2266_v29  ;;  %v2565_v57 = vmul.f32 %v2548_v45, %v2494_v54  ;;  %v2496_v59 = vpop.f32.mrb[61].mxu0  ;;  %v2986_v55 = vrot.slane %v8373_v46, %v9517_v52 }
 0x207   : > { %v2566_v60 = vmul.f32 %v2552_v49, %v2496_v59  ;;  %v2498_v62 = vpop.f32.mrb[62].mxu0 }
 0x208   : > { %v2569_v2 = vadd.f32 %v2565_v57, %v2424_v38  ;;  %v2499_v4 = vpop.f32.mrb[63].mxu0 }
 0x209   : > { %v2570_v5 = vadd.f32 %v2566_v60, %v2425_v43  ;;  %v2994_v4 = vrot.slane %v8373_v46, %v9529_v1 }
 0x20a   : > { %v2535_v27 = vpop.f32.mrb[60].mxu1 }
 0x20b   : > { %v2567_v7 = vmul.f32 %v2556_v61, %v2535_v27  ;;  %v2537_v8 = vpop.f32.mrb[61].mxu1 }
 0x20c   : > { %v2568_v33 = vmul.f32 %v2560_v3, %v2537_v8  ;;  %v2539_v34 = vpop.f32.mrb[62].mxu1 }
 0x20d   : > { %v2571_v10 = vadd.f32 %v2567_v7, %v2426_v53  ;;  %v2639_v11 = vpop.f32.mrb[64].mxu0  ;;  %v2540_v12 = vpop.f32.mrb[63].mxu1  ;;  %v2982_v53 = vrot.slane %v8373_v46, %v9510_v48  ;;  %v8379_v34 = vld [vmem:[%s10771_s3 + $0x4c] sm:$0xf] }
 0x20e   : > { %v2572_v41 = vadd.f32 %v2568_v33, %v2427_v56  ;;  %v2710_v13 = vmul.f32 %v2693_v6, %v2639_v11  ;;  %v2641_v42 = vpop.f32.mrb[65].mxu0 }
 0x20f   : > { %v2711_v14 = vmul.f32 %v2697_v9, %v2641_v42  ;;  %v2643_v16 = vpop.f32.mrb[66].mxu0  ;;  %v3126_v42 = vrot.slane %v8379_v34, %v9510_v48 }
 0x210   : > { %v2714_v18 = vadd.f32 %v2710_v13, %v2569_v2  ;;  %v2644_v20 = vpop.f32.mrb[67].mxu0  ;;  %v2990_v2 = vrot.slane %v8373_v46, %v9521_v58 }
 0x211   : > { %v2715_v21 = vadd.f32 %v2711_v14, %v2570_v5  ;;  %v3130_v14 = vrot.slane %v8379_v34, %v9517_v52  ;;  %v3138_v20 = vrot.slane %v8379_v34, %v9529_v1 }
 0x212   : > { %v2680_v22 = vpop.f32.mrb[64].mxu1 }
 0x213   : > { %v2712_v24 = vmul.f32 %v2701_v15, %v2680_v22  ;;  %v2682_v25 = vpop.f32.mrb[65].mxu1 }
 0x214   : > { %v2713_v28 = vmul.f32 %v2705_v19, %v2682_v25  ;;  %v2684_v29 = vpop.f32.mrb[66].mxu1 }
 0x215   : > { %v2716_v30 = vadd.f32 %v2712_v24, %v2571_v10  ;;  %v2784_v31 = vpop.f32.mrb[68].mxu0  ;;  %v2685_v32 = vpop.f32.mrb[67].mxu1  ;;  %v8385_v24 = vld [vmem:[%s10771_s3 + $0x50] sm:$0xf] }
 0x216   : > { %v2717_v35 = vadd.f32 %v2713_v28, %v2572_v41  ;;  %v2855_v36 = vmul.f32 %v2838_v23, %v2784_v31  ;;  %v2786_v37 = vpop.f32.mrb[69].mxu0  ;;  %v3270_v31 = vrot.slane %v8385_v24, %v9510_v48  ;;  %v3282_v46 = vrot.slane %v8385_v24, %v9529_v1 }
 0x217   : > { %v2856_v38 = vmul.f32 %v2842_v26, %v2786_v37  ;;  %v2788_v40 = vpop.f32.mrb[70].mxu0 }
 0x218   : > { %v2859_v43 = vadd.f32 %v2855_v36, %v2714_v18  ;;  %v2789_v45 = vpop.f32.mrb[71].mxu0  ;;  %v3134_v18 = vrot.slane %v8379_v34, %v9521_v58  ;;  %v3274_v36 = vrot.slane %v8385_v24, %v9517_v52  ;;  %v8397_v34 = vld [vmem:[%s10771_s3 + $0x58] sm:$0xf] }
 0x219   : > { %v2860_v47 = vadd.f32 %v2856_v38, %v2715_v21 }
 0x21a   : > { %v2825_v49 = vpop.f32.mrb[68].mxu1 }
 0x21b   : > { %v2857_v50 = vmul.f32 %v2846_v39, %v2825_v49  ;;  %v2827_v51 = vpop.f32.mrb[69].mxu1 }
 0x21c   : > { %v2858_v54 = vmul.f32 %v2850_v44, %v2827_v51  ;;  %v2829_v56 = vpop.f32.mrb[70].mxu1  ;;  %v3278_v44 = vrot.slane %v8385_v24, %v9521_v58  ;;  %v3570_v24 = vrot.slane %v8397_v34, %v9529_v1 }
 0x21d   : > { %v2861_v57 = vadd.f32 %v2857_v50, %v2716_v30  ;;  %v2830_v59 = vpop.f32.mrb[71].mxu1  ;;  %v8391_v56 = vld [vmem:[%s10771_s3 + $0x54] sm:$0xf] }
 0x21e   : > { %v2862_v60 = vadd.f32 %v2858_v54, %v2717_v35  ;;  %v2928_v61 = vpop.f32.mrb[72].mxu0 }
 0x21f   : > { %v2999_v62 = vmul.f32 %v2982_v53, %v2928_v61  ;;  %v2930_v63 = vpop.f32.mrb[73].mxu0 }
 0x220   : > { %v3000_v3 = vmul.f32 %v2986_v55, %v2930_v63  ;;  %v2932_v5 = vpop.f32.mrb[74].mxu0  ;;  %v3414_v63 = vrot.slane %v8391_v56, %v9510_v48 }
 0x221   : > { %v3003_v27 = vadd.f32 %v2999_v62, %v2859_v43  ;;  %v2933_v6 = vpop.f32.mrb[75].mxu0 }
 0x222   : > { %v3004_v7 = vadd.f32 %v3000_v3, %v2860_v47  ;;  %v2969_v8 = vpop.f32.mrb[72].mxu1 }
 0x223   : > { %v3001_v9 = vmul.f32 %v2990_v2, %v2969_v8  ;;  %v2971_v33 = vpop.f32.mrb[73].mxu1  ;;  %v3418_v2 = vrot.slane %v8391_v56, %v9517_v52 }
 0x224   : > { %v3002_v10 = vmul.f32 %v2994_v4, %v2971_v33  ;;  %v2973_v11 = vpop.f32.mrb[74].mxu1 }
 0x225   : > { %v3005_v12 = vadd.f32 %v3001_v9, %v2861_v57  ;;  %v2974_v41 = vpop.f32.mrb[75].mxu1 }
 0x226   : > { %v3006_v13 = vadd.f32 %v3002_v10, %v2862_v60 }
 0x229   : > { %v3072_v15 = vpop.f32.mrb[76].mxu0 }
 0x22a   : > { %v3143_v16 = vmul.f32 %v3126_v42, %v3072_v15  ;;  %v3074_v17 = vpop.f32.mrb[77].mxu0  ;;  %v3558_v42 = vrot.slane %v8397_v34, %v9510_v48 }
 0x22b   : > { %v3144_v19 = vmul.f32 %v3130_v14, %v3074_v17  ;;  %v3076_v21 = vpop.f32.mrb[78].mxu0 }
 0x22c   : > { %v3147_v22 = vadd.f32 %v3143_v16, %v3003_v27  ;;  %v3077_v23 = vpop.f32.mrb[79].mxu0  ;;  %v3422_v27 = vrot.slane %v8391_v56, %v9521_v58  ;;  %v3562_v16 = vrot.slane %v8397_v34, %v9517_v52 }
 0x22d   : > { %v3148_v25 = vadd.f32 %v3144_v19, %v3004_v7  ;;  %v3113_v26 = vpop.f32.mrb[76].mxu1  ;;  %v3426_v7 = vrot.slane %v8391_v56, %v9529_v1  ;;  %v8409_v56 = vld [vmem:[%s10771_s3 + $0x60] sm:$0xf] }
 0x22e   : > { %v3145_v28 = vmul.f32 %v3134_v18, %v3113_v26  ;;  %v3115_v29 = vpop.f32.mrb[77].mxu1 }
 0x22f   : > { %v3146_v30 = vmul.f32 %v3138_v20, %v3115_v29  ;;  %v3117_v32 = vpop.f32.mrb[78].mxu1 }
 0x230   : > { %v3149_v35 = vadd.f32 %v3145_v28, %v3005_v12  ;;  %v3118_v37 = vpop.f32.mrb[79].mxu1 }
 0x231   : > { %v3150_v38 = vadd.f32 %v3146_v30, %v3006_v13 }
 0x232   : > { %v3216_v39 = vpop.f32.mrb[80].mxu0 }
 0x233   : > { %v3287_v40 = vmul.f32 %v3270_v31, %v3216_v39  ;;  %v3218_v43 = vpop.f32.mrb[81].mxu0 }
 0x234   : > { %v3288_v45 = vmul.f32 %v3274_v36, %v3218_v43  ;;  %v3220_v47 = vpop.f32.mrb[82].mxu0 }
 0x235   : > { %v3291_v49 = vadd.f32 %v3287_v40, %v3147_v22  ;;  %v3221_v50 = vpop.f32.mrb[83].mxu0  ;;  %v3566_v22 = vrot.slane %v8397_v34, %v9521_v58 }
 0x236   : > { %v3292_v51 = vadd.f32 %v3288_v45, %v3148_v25  ;;  %v3257_v53 = vpop.f32.mrb[80].mxu1 }
 0x237   : > { %v3289_v54 = vmul.f32 %v3278_v44, %v3257_v53  ;;  %v3259_v55 = vpop.f32.mrb[81].mxu1 }
 0x238   : > { %v3290_v57 = vmul.f32 %v3282_v46, %v3259_v55  ;;  %v3261_v59 = vpop.f32.mrb[82].mxu1 }
 0x239   : > { %v3293_v60 = vadd.f32 %v3289_v54, %v3149_v35  ;;  %v3262_v61 = vpop.f32.mrb[83].mxu1  ;;  %v8403_v35 = vld [vmem:[%s10771_s3 + $0x5c] sm:$0xf] }
 0x23a   : > { %v3294_v62 = vadd.f32 %v3290_v57, %v3150_v38  ;;  %v3702_v43 = vrot.slane %v8403_v35, %v9510_v48  ;;  %v3706_v44 = vrot.slane %v8403_v35, %v9517_v52  ;;  %v3714_v53 = vrot.slane %v8403_v35, %v9529_v1 }
 0x23d   : > { %v3360_v3 = vpop.f32.mrb[84].mxu0 }
 0x23e   : > { %v3431_v4 = vmul.f32 %v3414_v63, %v3360_v3  ;;  %v3362_v5 = vpop.f32.mrb[85].mxu0 }
 0x23f   : > { %v3432_v6 = vmul.f32 %v3418_v2, %v3362_v5  ;;  %v3364_v8 = vpop.f32.mrb[86].mxu0  ;;  %v3846_v2 = vrot.slane %v8409_v56, %v9510_v48  ;;  %v3850_v5 = vrot.slane %v8409_v56, %v9517_v52 }
 0x240   : > { %v3435_v9 = vadd.f32 %v3431_v4, %v3291_v49  ;;  %v3365_v33 = vpop.f32.mrb[87].mxu0  ;;  %v3710_v49 = vrot.slane %v8403_v35, %v9521_v58  ;;  %v8421_v35 = vld [vmem:[%s10771_s3 + $0x68] sm:$0xf] }
 0x241   : > { %v3436_v10 = vadd.f32 %v3432_v6, %v3292_v51  ;;  %v3401_v11 = vpop.f32.mrb[84].mxu1 }
 0x242   : > { %v3433_v12 = vmul.f32 %v3422_v27, %v3401_v11  ;;  %v3403_v41 = vpop.f32.mrb[85].mxu1 }
 0x243   : > { %v3434_v13 = vmul.f32 %v3426_v7, %v3403_v41  ;;  %v3405_v14 = vpop.f32.mrb[86].mxu1 }
 0x244   : > { %v3437_v15 = vadd.f32 %v3433_v12, %v3293_v60  ;;  %v3406_v17 = vpop.f32.mrb[87].mxu1 }
 0x245   : > { %v3438_v18 = vadd.f32 %v3434_v13, %v3294_v62 }
 0x246   : > { %v3504_v19 = vpop.f32.mrb[88].mxu0 }
 0x247   : > { %v3575_v20 = vmul.f32 %v3558_v42, %v3504_v19  ;;  %v3506_v21 = vpop.f32.mrb[89].mxu0 }
 0x248   : > { %v3576_v23 = vmul.f32 %v3562_v16, %v3506_v21  ;;  %v3508_v25 = vpop.f32.mrb[90].mxu0 }
 0x249   : > { %v3579_v26 = vadd.f32 %v3575_v20, %v3435_v9  ;;  %v3509_v28 = vpop.f32.mrb[91].mxu0  ;;  %v3854_v9 = vrot.slane %v8409_v56, %v9521_v58 }
 0x24a   : > { %v3580_v29 = vadd.f32 %v3576_v23, %v3436_v10  ;;  %v3545_v30 = vpop.f32.mrb[88].mxu1  ;;  %v3858_v10 = vrot.slane %v8409_v56, %v9529_v1 }
 0x24b   : > { %v3577_v31 = vmul.f32 %v3566_v22, %v3545_v30  ;;  %v3547_v32 = vpop.f32.mrb[89].mxu1 }
 0x24c   : > { %v3578_v36 = vmul.f32 %v3570_v24, %v3547_v32  ;;  %v3549_v37 = vpop.f32.mrb[90].mxu1 }
 0x24d   : > { %v3581_v38 = vadd.f32 %v3577_v31, %v3437_v15  ;;  %v3550_v39 = vpop.f32.mrb[91].mxu1  ;;  %v8415_v15 = vld [vmem:[%s10771_s3 + $0x64] sm:$0xf] }
 0x24e   : > { %v3582_v40 = vadd.f32 %v3578_v36, %v3438_v18  ;;  %v3990_v21 = vrot.slane %v8415_v15, %v9510_v48  ;;  %v3994_v22 = vrot.slane %v8415_v15, %v9517_v52  ;;  %v4002_v30 = vrot.slane %v8415_v15, %v9529_v1 }
 0x251   : > { %v3648_v45 = vpop.f32.mrb[92].mxu0 }
 0x252   : > { %v3719_v46 = vmul.f32 %v3702_v43, %v3648_v45  ;;  %v3650_v47 = vpop.f32.mrb[93].mxu0 }
 0x253   : > { %v3720_v50 = vmul.f32 %v3706_v44, %v3650_v47  ;;  %v3652_v51 = vpop.f32.mrb[94].mxu0  ;;  %v4134_v44 = vrot.slane %v8421_v35, %v9510_v48  ;;  %v4138_v47 = vrot.slane %v8421_v35, %v9517_v52 }
 0x254   : > { %v3723_v54 = vadd.f32 %v3719_v46, %v3579_v26  ;;  %v3653_v55 = vpop.f32.mrb[95].mxu0  ;;  %v3998_v26 = vrot.slane %v8415_v15, %v9521_v58 }
 0x255   : > { %v3724_v57 = vadd.f32 %v3720_v50, %v3580_v29  ;;  %v3689_v59 = vpop.f32.mrb[92].mxu1 }
 0x256   : > { %v3721_v60 = vmul.f32 %v3710_v49, %v3689_v59  ;;  %v3691_v61 = vpop.f32.mrb[93].mxu1 }
 0x257   : > { %v3722_v62 = vmul.f32 %v3714_v53, %v3691_v61  ;;  %v3693_v63 = vpop.f32.mrb[94].mxu1 }
 0x258   : > { %v3725_v3 = vadd.f32 %v3721_v60, %v3581_v38  ;;  %v3694_v4 = vpop.f32.mrb[95].mxu1 }
 0x259   : > { %v3726_v27 = vadd.f32 %v3722_v62, %v3582_v40 }
 0x25a   : > { %v3792_v6 = vpop.f32.mrb[96].mxu0 }
 0x25b   : > { %v3863_v7 = vmul.f32 %v3846_v2, %v3792_v6  ;;  %v3794_v8 = vpop.f32.mrb[97].mxu0 }
 0x25c   : > { %v3864_v33 = vmul.f32 %v3850_v5, %v3794_v8  ;;  %v3796_v34 = vpop.f32.mrb[98].mxu0 }
 0x25d   : > { %v3867_v11 = vadd.f32 %v3863_v7, %v3723_v54  ;;  %v3797_v12 = vpop.f32.mrb[99].mxu0  ;;  %v4142_v54 = vrot.slane %v8421_v35, %v9521_v58 }
 0x25e   : > { %v3868_v41 = vadd.f32 %v3864_v33, %v3724_v57  ;;  %v3833_v13 = vpop.f32.mrb[96].mxu1  ;;  %v4146_v57 = vrot.slane %v8421_v35, %v9529_v1  ;;  %v8245_v33 = vld [vmem:[%s10771_s3 + $0x34] sm:$0xf] }
 0x25f   : > { %v3865_v42 = vmul.f32 %v3854_v9, %v3833_v13  ;;  %v3835_v14 = vpop.f32.mrb[97].mxu1  ;;  %v9776_v12 = vrot.slane %v8245_v33, %v9517_v52 }
 0x260   : > { %v3866_v16 = vmul.f32 %v3858_v10, %v3835_v14  ;;  %v3837_v17 = vpop.f32.mrb[98].mxu1 }
 0x261   : > { %v3869_v18 = vadd.f32 %v3865_v42, %v3725_v3  ;;  %v3838_v19 = vpop.f32.mrb[99].mxu1 }
 0x262   : > { %v3870_v20 = vadd.f32 %v3866_v16, %v3726_v27 }
 0x265   : > { %v3936_v23 = vpop.f32.mrb[100].mxu0 }
 0x266   : > { %v4007_v24 = vmul.f32 %v3990_v21, %v3936_v23  ;;  %v3938_v25 = vpop.f32.mrb[101].mxu0 }
 0x267   : > { %v4008_v28 = vmul.f32 %v3994_v22, %v3938_v25  ;;  %v3940_v29 = vpop.f32.mrb[102].mxu0 }
 0x268   : > { %v4011_v31 = vadd.f32 %v4007_v24, %v3867_v11  ;;  %v3941_v32 = vpop.f32.mrb[103].mxu0  ;;  %v9773_v11 = vrot.slane %v8245_v33, %v9510_v48  ;;  %v9788_v29 = vld [vmem:[#allocation3 + $0x14] ss:$0 sps:$4 sm:$0xff]  }
 0x269   : > { %v4012_v36 = vadd.f32 %v4008_v28, %v3868_v41  ;;  %v3977_v37 = vpop.f32.mrb[100].mxu1 }
 0x26a   : > { %v4009_v38 = vmul.f32 %v3998_v26, %v3977_v37  ;;  %v3979_v39 = vpop.f32.mrb[101].mxu1 }
 0x26b   : > { %v4010_v40 = vmul.f32 %v4002_v30, %v3979_v39  ;;  %v3981_v43 = vpop.f32.mrb[102].mxu1 }
 0x26c   : > { %v4013_v45 = vadd.f32 %v4009_v38, %v3869_v18  ;;  %v3982_v46 = vpop.f32.mrb[103].mxu1  ;;  %v9779_v18 = vrot.slane %v8245_v33, %v9521_v58 }
 0x26d   : > { %v4014_v49 = vadd.f32 %v4010_v40, %v3870_v20  ;;  %v9782_v20 = vrot.slane %v8245_v33, %v9529_v1 }
 0x26e   : > { %v4080_v50 = vpop.f32.mrb[104].mxu0 }
 0x26f   : > { %v4151_v51 = vmul.f32 %v4134_v44, %v4080_v50  ;;  %v4082_v53 = vpop.f32.mrb[105].mxu0 }
 0x270   : > { %v4152_v55 = vmul.f32 %v4138_v47, %v4082_v53  ;;  %v4084_v56 = vpop.f32.mrb[106].mxu0 }
 0x271   : > { %v4155_v59 = vadd.f32 %v4151_v51, %v4011_v31  ;;  %v4085_v60 = vpop.f32.mrb[107].mxu0 }
 0x272   : > { %v4156_v61 = vadd.f32 %v4152_v55, %v4012_v36  ;;  %v4121_v62 = vpop.f32.mrb[104].mxu1 }
 0x273   : > { %v4153_v63 = vmul.f32 %v4142_v54, %v4121_v62  ;;  %v4123_v2 = vpop.f32.mrb[105].mxu1 }
 0x274   : > { %v4159_v3 = vadd.f32 %v4156_v61, %v4155_v59  ;;  %v4154_v4 = vmul.f32 %v4146_v57, %v4123_v2  ;;  %v4125_v5 = vpop.f32.mrb[106].mxu1 }
 0x275   : > { %v4157_v27 = vadd.f32 %v4153_v63, %v4013_v45  ;;  %v4126_v6 = vpop.f32.mrb[107].mxu1 }
 0x276   : > { %v4158_v7 = vadd.f32 %v4154_v4, %v4014_v49 }
 0x277   : > { %v4160_v8 = vadd.f32 %v4159_v3, %v4157_v27 }
 0x279   : > { %v4161_v9 = vadd.f32 %v4160_v8, %v4158_v7 }
 0x27b   : > { %4162 = vadd.xlane.f32.xlu0 %v4161_v9 }
 0x291   : > { %6416 = vrot.lane.b32.xlu0 %v9788_v29, %s8773_s28 }
 0x295   : > { %6702 = vrot.lane.b32.xlu0 %v9788_v29, %s8775_s23 }
 0x299   : > { %6988 = vrot.lane.b32.xlu0 %v9788_v29, %s8760_s7 }
 0x29d   : > { %7274 = vrot.lane.b32.xlu0 %v9788_v29, %s8762_s9 }
 0x308   : > { %v4163_v34 = vpop.xlane.xlu0 %4162 }
 0x309   : > { %v4164_v10 = vmul.f32 0.001953125, %v4163_v34 }
 0x30b   : > { %v4165_v41 = vsub.f32 %v4155_v59, %v4164_v10  ;;  %v4166_v13 = vsub.f32 %v4156_v61, %v4164_v10  ;;  %v4167_v42 = vsub.f32 %v4157_v27, %v4164_v10  ;;  %v4168_v14 = vsub.f32 %v4158_v7, %v4164_v10 }
 0x30c   : > { %v9926_v60 = vpop.permute.xlu0 %6416 }
 0x30d   : > { %v4169_v15 = vmul.f32 %v4165_v41, %v4165_v41  ;;  %v4170_v16 = vmul.f32 %v4166_v13, %v4166_v13  ;;  %v4171_v17 = vmul.f32 %v4167_v42, %v4167_v42  ;;  %v4172_v19 = vmul.f32 %v4168_v14, %v4168_v14 }
 0x30f   : > { %v4194_v21 = vmul.f32 %v9773_v11, %v4169_v15  ;;  %v4195_v22 = vmul.f32 %v9776_v12, %v4170_v16  ;;  %v4196_v23 = vmul.f32 %v9779_v18, %v4171_v17  ;;  %v4197_v25 = vmul.f32 %v9782_v20, %v4172_v19 }
 0x310   : > { %v9938_v62 = vpop.permute.xlu0 %6702 }
 0x311   : > { %v4198_v24 = vadd.f32 %v4195_v22, %v4194_v21 }
 0x313   : > { %v4199_v26 = vadd.f32 %v4198_v24, %v4196_v23 }
 0x314   : > { %v9946_v2 = vpop.permute.xlu0 %6988 }
 0x315   : > { %v4200_v28 = vadd.f32 %v4199_v26, %v4197_v25  ;;  %v8433_v25 = vld [vmem:[%s10770_s2 + $0x4] sm:$0xf] }
 0x317   : > { %4201 = vadd.xlane.f32.xlu1 %v4200_v28 }
 0x318   : > { %v9958_v4 = vpop.permute.xlu0 %7274 }
 0x328   : > { %6273 = vrot.lane.b32.xlu1 %v9788_v29, %s8772_s30 }
 0x32c   : > { %6559 = vrot.lane.b32.xlu1 %v9788_v29, %s8774_s27 }
 0x330   : > { %6845 = vrot.lane.b32.xlu1 %v9788_v29, %s8759_s6 }
 0x334   : > { %7131 = vrot.lane.b32.xlu1 %v9788_v29, %s8761_s8 }
 0x338   : > { %7417 = vrot.lane.b32.xlu1 %v9788_v29, %s8763_s10 }
 0x3a4   : > { %v4202_v30 = vpop.xlane.xlu1 %4201 }
 0x3a5   : > { %v4203_v31 = vmul.f32 0.001953125, %v4202_v30 }
 0x3a7   : > { %v4204_v32 = vadd.f32 1e-05, %v4203_v31 }
 0x3a8   : > { %v9918_v57 = vpop.permute.xlu1 %6273 }
 0x3a9   : > { %8678 = vrsqrt.f32 %v4204_v32 }
 0x3ac   : > { %v9924_v59 = vpop.permute.xlu1 %6559 }
 0x3b0   : > { %v9936_v61 = vpop.permute.xlu1 %6845 }
 0x3b3   : > { %v8679_v35 = vpop.eup %8678 }
 0x3b4   : > { %v4206_v36 = vmul.f32 %v8679_v35, %v4165_v41  ;;  %v4207_v37 = vmul.f32 %v8679_v35, %v4166_v13  ;;  %v4208_v38 = vmul.f32 %v8679_v35, %v4167_v42  ;;  %v4209_v39 = vmul.f32 %v8679_v35, %v4168_v14  ;;  %v9944_v63 = vpop.permute.xlu1 %7131  ;;  %v4235_v13 = vld [vmem:[%s10770_s2] sm:$0xf] }
 0x3b6   : > { %v9808_v40 = vmax.f32 %v4206_v36, 0.0  ;;  %v9810_v43 = vmax.f32 %v4207_v37, 0.0  ;;  %v9812_v44 = vmax.f32 %v4208_v38, 0.0  ;;  %v9814_v45 = vmax.f32 %v4209_v39, 0.0 }
 0x3b8   : > { %v8606_v46 = vpack.c.bf16 %v9810_v43, %v9808_v40  ;;  %v8607_v47 = vpack.c.bf16 %v9814_v45, %v9812_v44  ;;  %v9956_v3 = vpop.permute.xlu1 %7417  ;;  %v10000_v22 = vpack.c.bf16 %v9808_v40, %v9808_v40  ;;  %v10017_v31 = vpack.c.bf16 %v9810_v43, %v9810_v43 }
 0x3b9   : > { %v10021_v32 = vpack.c.bf16 %v9812_v44, %v9812_v44  ;;  %v10031_v37 = vpack.c.bf16 %v9814_v45, %v9814_v45 }
 0x3ba   : > { %4230 = vst [vmem:[#allocation3 + $0x4] sm:$0xff] %v8606_v46  ;;  %4231 = vst [vmem:[#allocation3 + $0xc] sm:$0xff] %v8607_v47 }
 0x3c1   : > { %v4232_v49 = vld [vmem:[#allocation3] sm:$0xff]  ;;  %v4233_v53 = vld [vmem:[#allocation3 + $0x8] sm:$0xff]  ;;  %v9836_v56 = vld [vmem:[#allocation3 + $0x10] ss:$0 sps:$4 sm:$0xff]  }
 0x3c2   : > { %v9820_v50 = vcombine.low %v4232_v49, %v4232_v49  ;;  %v9822_v51 = vcombine.high %v4232_v49, %v4232_v49  ;;  %v9828_v54 = vcombine.low %v4233_v53, %v4233_v53  ;;  %v9830_v55 = vcombine.high %v4233_v53, %v4233_v53  ;;  %v8439_v49 = vld [vmem:[%s10770_s2 + $0x8] sm:$0xf] }
 0x3c4   : > { %4251 = vrot.lane.b32.xlu1 %v9822_v51, %s8759_s6  ;;  %4249 = vrot.lane.b32.xlu0 %v9820_v50, %s8759_s6 }
 0x3c8   : > { %4255 = vrot.lane.b32.xlu1 %v9830_v55, %s8759_s6  ;;  %4253 = vrot.lane.b32.xlu0 %v9828_v54, %s8759_s6 }
 0x3cc   : > { %4392 = vrot.lane.b32.xlu1 %v9820_v50, %s8760_s7  ;;  %4257 = vrot.lane.b32.xlu0 %v9836_v56, %s8759_s6 }
 0x3d0   : > { %4396 = vrot.lane.b32.xlu1 %v9828_v54, %s8760_s7  ;;  %4394 = vrot.lane.b32.xlu0 %v9822_v51, %s8760_s7 }
 0x3d4   : > { %4400 = vrot.lane.b32.xlu1 %v9836_v56, %s8760_s7  ;;  %4398 = vrot.lane.b32.xlu0 %v9830_v55, %s8760_s7 }
 0x3d8   : > { %4537 = vrot.lane.b32.xlu1 %v9822_v51, %s8761_s8  ;;  %4535 = vrot.lane.b32.xlu0 %v9820_v50, %s8761_s8 }
 0x3dc   : > { %4541 = vrot.lane.b32.xlu1 %v9830_v55, %s8761_s8  ;;  %4539 = vrot.lane.b32.xlu0 %v9828_v54, %s8761_s8 }
 0x3e0   : > { %4678 = vrot.lane.b32.xlu1 %v9820_v50, %s8762_s9  ;;  %4543 = vrot.lane.b32.xlu0 %v9836_v56, %s8761_s8 }
 0x3e4   : > { %4682 = vrot.lane.b32.xlu1 %v9828_v54, %s8762_s9  ;;  %4680 = vrot.lane.b32.xlu0 %v9822_v51, %s8762_s9 }
 0x3e8   : > { %4686 = vrot.lane.b32.xlu1 %v9836_v56, %s8762_s9  ;;  %4684 = vrot.lane.b32.xlu0 %v9830_v55, %s8762_s9 }
 0x3ec   : > { %4823 = vrot.lane.b32.xlu1 %v9822_v51, %s8763_s10  ;;  %4821 = vrot.lane.b32.xlu0 %v9820_v50, %s8763_s10 }
 0x3f0   : > { %4827 = vrot.lane.b32.xlu1 %v9830_v55, %s8763_s10  ;;  %4825 = vrot.lane.b32.xlu0 %v9828_v54, %s8763_s10 }
 0x3f4   : > { %4964 = vrot.lane.b32.xlu1 %v9820_v50, %s8764_s11  ;;  %4829 = vrot.lane.b32.xlu0 %v9836_v56, %s8763_s10 }
 0x3f8   : > { %4968 = vrot.lane.b32.xlu1 %v9828_v54, %s8764_s11  ;;  %4966 = vrot.lane.b32.xlu0 %v9822_v51, %s8764_s11 }
 0x3fc   : > { %4972 = vrot.lane.b32.xlu1 %v9836_v56, %s8764_s11  ;;  %4970 = vrot.lane.b32.xlu0 %v9830_v55, %s8764_s11 }
 0x400   : > { %5109 = vrot.lane.b32.xlu1 %v9822_v51, %s8765_s12  ;;  %5107 = vrot.lane.b32.xlu0 %v9820_v50, %s8765_s12 }
 0x404   : > { %5113 = vrot.lane.b32.xlu1 %v9830_v55, %s8765_s12  ;;  %5111 = vrot.lane.b32.xlu0 %v9828_v54, %s8765_s12 }
 0x408   : > { %5250 = vrot.lane.b32.xlu1 %v9820_v50, %s8766_s13  ;;  %5115 = vrot.lane.b32.xlu0 %v9836_v56, %s8765_s12 }
 0x40c   : > { %5254 = vrot.lane.b32.xlu1 %v9828_v54, %s8766_s13  ;;  %5252 = vrot.lane.b32.xlu0 %v9822_v51, %s8766_s13 }
 0x410   : > { %5258 = vrot.lane.b32.xlu1 %v9836_v56, %s8766_s13  ;;  %5256 = vrot.lane.b32.xlu0 %v9830_v55, %s8766_s13 }
 0x414   : > { %5395 = vrot.lane.b32.xlu1 %v9822_v51, %s10788_s22  ;;  %5393 = vrot.lane.b32.xlu0 %v9820_v50, %s10788_s22 }
 0x418   : > { %5399 = vrot.lane.b32.xlu1 %v9830_v55, %s10788_s22  ;;  %5397 = vrot.lane.b32.xlu0 %v9828_v54, %s10788_s22 }
 0x41c   : > { %5536 = vrot.lane.b32.xlu1 %v9820_v50, %s10789_s29  ;;  %5401 = vrot.lane.b32.xlu0 %v9836_v56, %s10788_s22 }
 0x420   : > { %5540 = vrot.lane.b32.xlu1 %v9828_v54, %s10789_s29  ;;  %5538 = vrot.lane.b32.xlu0 %v9822_v51, %s10789_s29 }
 0x424   : > { %5544 = vrot.lane.b32.xlu1 %v9836_v56, %s10789_s29  ;;  %5542 = vrot.lane.b32.xlu0 %v9830_v55, %s10789_s29  ;;  %s10792_s29 = smov 1  }
 0x428   : > { %5681 = vrot.lane.b32.xlu1 %v9822_v51, %s10790_s14  ;;  %5679 = vrot.lane.b32.xlu0 %v9820_v50, %s10790_s14 }
 0x42c   : > { %5685 = vrot.lane.b32.xlu1 %v9830_v55, %s10790_s14  ;;  %5683 = vrot.lane.b32.xlu0 %v9828_v54, %s10790_s14 }
 0x430   : > { %5822 = vrot.lane.b32.xlu1 %v9820_v50, %s10791_s20  ;;  %5687 = vrot.lane.b32.xlu0 %v9836_v56, %s10790_s14 }
 0x434   : > { %5826 = vrot.lane.b32.xlu1 %v9828_v54, %s10791_s20  ;;  %5824 = vrot.lane.b32.xlu0 %v9822_v51, %s10791_s20 }
 0x436   : > { %v4252_v5 = vpop.permute.xlu1 %4251  ;;  %v4250_v27 = vpop.permute.xlu0 %4249 }
 0x437   : > { %v4259_v6 = vsel %vm252_vm0, %v4250_v27, %v4252_v5 }
 0x438   : > { %5830 = vrot.lane.b32.xlu1 %v9836_v56, %s10791_s20  ;;  %5828 = vrot.lane.b32.xlu0 %v9830_v55, %s10791_s20  ;;  %v4267_v33 = vsel %vm261_vm1, %v4259_v6, 0 }
 0x43a   : > { %v4256_v7 = vpop.permute.xlu1 %4255  ;;  %v4254_v8 = vpop.permute.xlu0 %4253 }
 0x43b   : > { %v4260_v9 = vsel %vm252_vm0, %v4252_v5, %v4254_v8  ;;  %v4261_v34 = vsel %vm252_vm0, %v4254_v8, %v4256_v7 }
 0x43c   : > { %5967 = vrot.lane.b32.xlu1 %v9822_v51, %s10792_s29  ;;  %5965 = vrot.lane.b32.xlu0 %v9820_v50, %s10792_s29  ;;  %v4273_v14 = vsel %vm261_vm1, %v4261_v34, 0 }
 0x43d   : > { %8429 = vmatprep.subr.msk.bf16.mxu0 %vm261_vm1, %v4260_v9 }
 0x43e   : > { %4279 = vmatpush1.bf16.msra.mxu0 %v4267_v33  ;;  %v4393_v10 = vpop.permute.xlu1 %4392  ;;  %v4258_v41 = vpop.permute.xlu0 %4257 }
 0x43f   : > { %v4262_v42 = vsel %vm252_vm0, %v4256_v7, %v4258_v41  ;;  %v8445_v7 = vld [vmem:[%s10770_s2 + $0xc] sm:$0xf] }
 0x440   : > { %5971 = vrot.lane.b32.xlu1 %v9830_v55, %s10792_s29  ;;  %5969 = vrot.lane.b32.xlu0 %v9828_v54, %s10792_s29 }
 0x441   : > { %8431 = vmatprep.subr.msk.bf16.mxu1 %vm261_vm1, %v4262_v42  ;;  %8430 = vmatmul.mubr.msk.bf16.vlgmr.msra.gmra.mrb[108].mxu0 %vm257_vm2, %v4235_v13 }
 0x442   : > { %4320 = vmatpush1.bf16.msra.mxu1 %v4273_v14  ;;  %v4397_v15 = vpop.permute.xlu1 %4396  ;;  %v4395_v16 = vpop.permute.xlu0 %4394  ;;  %4453 = vmatprep.mubr.bf16.mxu0 %v8758_v0 }
 0x443   : > { %v4402_v17 = vsel %vm398_vm3, %v4393_v10, %v4395_v16  ;;  %v4403_v19 = vsel %vm398_vm3, %v4395_v16, %v4397_v15 }
 0x444   : > { %7703 = vrot.lane.b32.xlu1 %v9788_v29, %s8765_s12  ;;  %5973 = vrot.lane.b32.xlu0 %v9836_v56, %s10792_s29  ;;  %v4410_v21 = vsel %vm261_vm1, %v4402_v17, 0 }
 0x445   : > { %8434 = vmatprep.subr.msk.bf16.mxu0 %vm261_vm1, %v4403_v19  ;;  %8432 = vmatmul.mubr.msk.bf16.vlgmr.msra.gmra.mrb[108].mxu1 %vm257_vm2, %v4235_v13 }
 0x446   : > { %4422 = vmatpush1.bf16.msra.mxu0 %v4410_v21  ;;  %v4401_v23 = vpop.permute.xlu1 %4400  ;;  %v4399_v24 = vpop.permute.xlu0 %4398  ;;  %4494 = vmatprep.mubr.bf16.mxu1 %v8758_v0  ;;  %v8451_v21 = vld [vmem:[%s10770_s2 + $0x10] sm:$0xf] }
 0x447   : > { %v4404_v26 = vsel %vm398_vm3, %v4397_v15, %v4399_v24  ;;  %v4405_v28 = vsel %vm398_vm3, %v4399_v24, %v4401_v23 }
 0x448   : > { %6265 = vrot.lane.b32.xlu1 %v10000_v22, %s8772_s30  ;;  %7560 = vrot.lane.b32.xlu0 %v9788_v29, %s8764_s11  ;;  %v4416_v30 = vsel %vm261_vm1, %v4404_v26, 0 }
 0x449   : > { %8436 = vmatprep.subr.msk.bf16.mxu1 %vm261_vm1, %v4405_v28  ;;  %8435 = vmatmul.mubr.msk.bf16.vlgmr.msra.gmra.mrb[112].mxu0 %vm257_vm2, %v8433_v25 }
 0x44a   : > { %4463 = vmatpush1.bf16.msra.mxu1 %v4416_v30  ;;  %v4538_v35 = vpop.permute.xlu1 %4537  ;;  %v4536_v36 = vpop.permute.xlu0 %4535  ;;  %4596 = vmatprep.mubr.bf16.mxu0 %v8758_v0 }
 0x44b   : > { %v4545_v38 = vsel %vm543_vm4, %v4536_v36, %v4538_v35 }
 0x44c   : > { %6269 = vrot.lane.b32.xlu1 %v10021_v32, %s8772_s30  ;;  %6267 = vrot.lane.b32.xlu0 %v10017_v31, %s8772_s30  ;;  %v4553_v44 = vsel %vm261_vm1, %v4545_v38, 0 }
 0x44d   : > { %8437 = vmatmul.mubr.msk.bf16.vlgmr.msra.gmra.mrb[112].mxu1 %vm257_vm2, %v8433_v25 }
 0x44e   : > { %v4542_v39 = vpop.permute.xlu1 %4541  ;;  %v4540_v40 = vpop.permute.xlu0 %4539  ;;  %4637 = vmatprep.mubr.bf16.mxu1 %v8758_v0 }
 0x44f   : > { %v4546_v43 = vsel %vm543_vm4, %v4538_v35, %v4540_v40  ;;  %v4547_v45 = vsel %vm543_vm4, %v4540_v40, %v4542_v39 }
 0x450   : > { %6410 = vrot.lane.b32.xlu1 %v10017_v31, %s8773_s28  ;;  %6271 = vrot.lane.b32.xlu0 %v10031_v37, %s8772_s30  ;;  %v4559_v51 = vsel %vm261_vm1, %v4547_v45, 0 }
 0x451   : > { %8440 = vmatprep.subr.msk.bf16.mxu0 %vm261_vm1, %v4546_v43 }
 0x452   : > { %4565 = vmatpush1.bf16.msra.mxu0 %v4553_v44  ;;  %v4679_v46 = vpop.permute.xlu1 %4678  ;;  %v4544_v47 = vpop.permute.xlu0 %4543 }
 0x453   : > { %v4548_v50 = vsel %vm543_vm4, %v4542_v39, %v4544_v47  ;;  %v8457_v39 = vld [vmem:[%s10770_s2 + $0x14] sm:$0xf] }
 0x454   : > { %6414 = vrot.lane.b32.xlu1 %v10031_v37, %s8773_s28  ;;  %6408 = vrot.lane.b32.xlu0 %v10000_v22, %s8773_s28 }
 0x455   : > { %8442 = vmatprep.subr.msk.bf16.mxu1 %vm261_vm1, %v4548_v50  ;;  %8441 = vmatmul.mubr.msk.bf16.vlgmr.msra.gmra.mrb[116].mxu0 %vm257_vm2, %v8439_v49 }
 0x456   : > { %4606 = vmatpush1.bf16.msra.mxu1 %v4559_v51  ;;  %v4683_v53 = vpop.permute.xlu1 %4682  ;;  %v4681_v54 = vpop.permute.xlu0 %4680  ;;  %4739 = vmatprep.mubr.bf16.mxu0 %v8758_v0 }
 0x457   : > { %v4688_v55 = vsel %vm688_vm5, %v4679_v46, %v4681_v54  ;;  %v4689_v56 = vsel %vm688_vm5, %v4681_v54, %v4683_v53 }
 0x458   : > { %6551 = vrot.lane.b32.xlu1 %v10000_v22, %s8774_s27  ;;  %6412 = vrot.lane.b32.xlu0 %v10021_v32, %s8773_s28  ;;  %v4696_v5 = vsel %vm261_vm1, %v4688_v55, 0 }
 0x459   : > { %8446 = vmatprep.subr.msk.bf16.mxu0 %vm261_vm1, %v4689_v56  ;;  %8443 = vmatmul.mubr.msk.bf16.vlgmr.msra.gmra.mrb[116].mxu1 %vm257_vm2, %v8439_v49 }
 0x45a   : > { %4708 = vmatpush1.bf16.msra.mxu0 %v4696_v5  ;;  %v4687_v27 = vpop.permute.xlu1 %4686  ;;  %v4685_v6 = vpop.permute.xlu0 %4684  ;;  %4780 = vmatprep.mubr.bf16.mxu1 %v8758_v0  ;;  %v8463_v5 = vld [vmem:[%s10770_s2 + $0x18] sm:$0xf] }
 0x45b   : > { %v4690_v8 = vsel %vm688_vm5, %v4683_v53, %v4685_v6  ;;  %v4691_v9 = vsel %vm688_vm5, %v4685_v6, %v4687_v27 }
 0x45c   : > { %6555 = vrot.lane.b32.xlu1 %v10021_v32, %s8774_s27  ;;  %6553 = vrot.lane.b32.xlu0 %v10017_v31, %s8774_s27  ;;  %v4702_v33 = vsel %vm261_vm1, %v4690_v8, 0 }
 0x45d   : > { %8448 = vmatprep.subr.msk.bf16.mxu1 %vm261_vm1, %v4691_v9  ;;  %8447 = vmatmul.mubr.msk.bf16.vlgmr.msra.gmra.mrb[120].mxu0 %vm257_vm2, %v8445_v7 }
 0x45e   : > { %4749 = vmatpush1.bf16.msra.mxu1 %v4702_v33  ;;  %v4824_v34 = vpop.permute.xlu1 %4823  ;;  %v4822_v10 = vpop.permute.xlu0 %4821  ;;  %4882 = vmatprep.mubr.bf16.mxu0 %v8758_v0 }
 0x45f   : > { %v4831_v41 = vsel %vm833_vm6, %v4822_v10, %v4824_v34 }
 0x460   : > { %6696 = vrot.lane.b32.xlu1 %v10017_v31, %s8775_s23  ;;  %6557 = vrot.lane.b32.xlu0 %v10031_v37, %s8774_s27  ;;  %v4839_v15 = vsel %vm261_vm1, %v4831_v41, 0 }
 0x461   : > { %8449 = vmatmul.mubr.msk.bf16.vlgmr.msra.gmra.mrb[120].mxu1 %vm257_vm2, %v8445_v7 }
 0x462   : > { %v4828_v13 = vpop.permute.xlu1 %4827  ;;  %v4826_v42 = vpop.permute.xlu0 %4825  ;;  %4923 = vmatprep.mubr.bf16.mxu1 %v8758_v0 }
 0x463   : > { %v4832_v14 = vsel %vm833_vm6, %v4824_v34, %v4826_v42  ;;  %v4833_v16 = vsel %vm833_vm6, %v4826_v42, %v4828_v13 }
 0x464   : > { %6700 = vrot.lane.b32.xlu1 %v10031_v37, %s8775_s23  ;;  %6694 = vrot.lane.b32.xlu0 %v10000_v22, %s8775_s23  ;;  %v4845_v24 = vsel %vm261_vm1, %v4833_v16, 0 }
 0x465   : > { %8452 = vmatprep.subr.msk.bf16.mxu0 %vm261_vm1, %v4832_v14 }
 0x466   : > { %4851 = vmatpush1.bf16.msra.mxu0 %v4839_v15  ;;  %v4965_v17 = vpop.permute.xlu1 %4964  ;;  %v4830_v19 = vpop.permute.xlu0 %4829 }
 0x467   : > { %v4834_v23 = vsel %vm833_vm6, %v4828_v13, %v4830_v19  ;;  %v8469_v13 = vld [vmem:[%s10770_s2 + $0x1c] sm:$0xf] }
 0x468   : > { %6837 = vrot.lane.b32.xlu1 %v10000_v22, %s8759_s6  ;;  %6698 = vrot.lane.b32.xlu0 %v10021_v32, %s8775_s23 }
 0x469   : > { %8453 = vmatmul.mubr.msk.bf16.vlgmr.msra.gmra.mrb[124].mxu0 %vm257_vm2, %v8451_v21  ;;  %8454 = vmatprep.subr.msk.bf16.mxu1 %vm261_vm1, %v4834_v23 }
 0x46a   : > { %4892 = vmatpush1.bf16.msra.mxu1 %v4845_v24  ;;  %v4969_v25 = vpop.permute.xlu1 %4968  ;;  %v4967_v26 = vpop.permute.xlu0 %4966  ;;  %5025 = vmatprep.mubr.bf16.mxu0 %v8758_v0 }
 0x46b   : > { %v4974_v28 = vsel %vm978_vm7, %v4965_v17, %v4967_v26  ;;  %v4975_v30 = vsel %vm978_vm7, %v4967_v26, %v4969_v25 }
 0x46c   : > { %v4982_v35 = vsel %vm261_vm1, %v4974_v28, 0  ;;  %6841 = vrot.lane.b32.xlu1 %v10021_v32, %s8759_s6  ;;  %6839 = vrot.lane.b32.xlu0 %v10017_v31, %s8759_s6 }
 0x46d   : > { %8455 = vmatmul.mubr.msk.bf16.vlgmr.msra.gmra.mrb[124].mxu1 %vm257_vm2, %v8451_v21  ;;  %8458 = vmatprep.subr.msk.bf16.mxu0 %vm261_vm1, %v4975_v30 }
 0x46e   : > { %4994 = vmatpush1.bf16.msra.mxu0 %v4982_v35  ;;  %v4973_v36 = vpop.permute.xlu1 %4972  ;;  %v4971_v38 = vpop.permute.xlu0 %4970  ;;  %5066 = vmatprep.mubr.bf16.mxu1 %v8758_v0  ;;  %v8475_v35 = vld [vmem:[%s10770_s2 + $0x20] sm:$0xf] }
 0x46f   : > { %v4976_v40 = vsel %vm978_vm7, %v4969_v25, %v4971_v38  ;;  %v4977_v43 = vsel %vm978_vm7, %v4971_v38, %v4973_v36 }
 0x470   : > { %v4988_v44 = vsel %vm261_vm1, %v4976_v40, 0  ;;  %6982 = vrot.lane.b32.xlu1 %v10017_v31, %s8760_s7  ;;  %6843 = vrot.lane.b32.xlu0 %v10031_v37, %s8759_s6  ;;  %s188_s6 = sand.u32 1, %s8748_s16  }
 0x471   : > { %8459 = vmatmul.mubr.msk.bf16.vlgmr.msra.gmra.mrb[128].mxu0 %vm257_vm2, %v8457_v39  ;;  %8460 = vmatprep.subr.msk.bf16.mxu1 %vm261_vm1, %v4977_v43  ;;  %s8242_s14 = sshll.u32 %s188_s6, 5 }
 0x472   : > { %5035 = vmatpush1.bf16.msra.mxu1 %v4988_v44  ;;  %v5110_v45 = vpop.permute.xlu1 %5109  ;;  %v5108_v46 = vpop.permute.xlu0 %5107  ;;  %5168 = vmatprep.mubr.bf16.mxu0 %v8758_v0  ;;  %s190_s30 = scalar_lea.vmem [#allocation4], %s8242_s14 }
 0x473   : > { %v5117_v47 = vsel %vm1123_vm8, %v5108_v46, %v5110_v45 }
 0x474   : > { %6980 = vrot.lane.b32.xlu0 %v10000_v22, %s8760_s7  ;;  %6986 = vrot.lane.b32.xlu1 %v10031_v37, %s8760_s7  ;;  %v5125_v53 = vsel %vm261_vm1, %v5117_v47, 0 }
 0x475   : > { %8461 = vmatmul.mubr.msk.bf16.vlgmr.msra.gmra.mrb[128].mxu1 %vm257_vm2, %v8457_v39 }
 0x476   : > { %v5114_v49 = vpop.permute.xlu1 %5113  ;;  %v5112_v50 = vpop.permute.xlu0 %5111  ;;  %5209 = vmatprep.mubr.bf16.mxu1 %v8758_v0 }
 0x477   : > { %v5118_v51 = vsel %vm1123_vm8, %v5110_v45, %v5112_v50  ;;  %v5119_v54 = vsel %vm1123_vm8, %v5112_v50, %v5114_v49 }
 0x478   : > { %7123 = vrot.lane.b32.xlu1 %v10000_v22, %s8761_s8  ;;  %6984 = vrot.lane.b32.xlu0 %v10021_v32, %s8760_s7  ;;  %v5131_v6 = vsel %vm261_vm1, %v5119_v54, 0  ;;  %s8608_s7 = sshll.u32 %s8823_s19, 9  ;;  %s8165_s19 = scalar_lea.sflag [#allocation5], %s188_s6 }
 0x479   : > { %8464 = vmatprep.subr.msk.bf16.mxu0 %vm261_vm1, %v5118_v51  ;;  %s10726_s20 = scalar_lea.hbm %s10772_s4, %s8608_s7 }
 0x47a   : > { %5137 = vmatpush1.bf16.msra.mxu0 %v5125_v53  ;;  %v5251_v55 = vpop.permute.xlu1 %5250  ;;  %v5116_v56 = vpop.permute.xlu0 %5115 }
 0x47b   : > { %v5120_v27 = vsel %vm1123_vm8, %v5114_v49, %v5116_v56  ;;  %v8481_v49 = vld [vmem:[%s10770_s2 + $0x24] sm:$0xf] }
 0x47c   : > { %7127 = vrot.lane.b32.xlu1 %v10021_v32, %s8761_s8  ;;  %7125 = vrot.lane.b32.xlu0 %v10017_v31, %s8761_s8 }
 0x47d   : > { %8465 = vmatmul.mubr.msk.bf16.vlgmr.msra.gmra.mrb[132].mxu0 %vm257_vm2, %v8463_v5  ;;  %8466 = vmatprep.subr.msk.bf16.mxu1 %vm261_vm1, %v5120_v27 }
 0x47e   : > { %5178 = vmatpush1.bf16.msra.mxu1 %v5131_v6  ;;  %v5255_v7 = vpop.permute.xlu1 %5254  ;;  %v5253_v8 = vpop.permute.xlu0 %5252  ;;  %5311 = vmatprep.mubr.bf16.mxu0 %v8758_v0 }
 0x47f   : > { %v5260_v9 = vsel %vm1268_vm9, %v5251_v55, %v5253_v8  ;;  %v5261_v33 = vsel %vm1268_vm9, %v5253_v8, %v5255_v7 }
 0x480   : > { %v5268_v34 = vsel %vm261_vm1, %v5260_v9, 0  ;;  %7268 = vrot.lane.b32.xlu1 %v10017_v31, %s8762_s9  ;;  %7129 = vrot.lane.b32.xlu0 %v10031_v37, %s8761_s8  ;;  %s8179_s8 = sshll.u32 %s190_s30, 4  ;;  %s10728_s8 = int_to_ptr.vmem [resolvable:$true] %s8179_s8 }
 0x481   : > { %8467 = vmatmul.mubr.msk.bf16.vlgmr.msra.gmra.mrb[132].mxu1 %vm257_vm2, %v8463_v5  ;;  %8470 = vmatprep.subr.msk.bf16.mxu0 %vm261_vm1, %v5261_v33 }
 0x482   : > { %5280 = vmatpush1.bf16.msra.mxu0 %v5268_v34  ;;  %v5259_v10 = vpop.permute.xlu1 %5258  ;;  %v5257_v41 = vpop.permute.xlu0 %5256  ;;  %5352 = vmatprep.mubr.bf16.mxu1 %v8758_v0  ;;  %v8487_v34 = vld [vmem:[%s10770_s2 + $0x28] sm:$0xf] }
 0x483   : > { %v5262_v42 = vsel %vm1268_vm9, %v5255_v7, %v5257_v41  ;;  %v5263_v14 = vsel %vm1268_vm9, %v5257_v41, %v5259_v10 }
 0x484   : > { %v5274_v15 = vsel %vm261_vm1, %v5262_v42, 0  ;;  %7272 = vrot.lane.b32.xlu1 %v10031_v37, %s8762_s9  ;;  %7266 = vrot.lane.b32.xlu0 %v10000_v22, %s8762_s9 }
 0x485   : > { %8471 = vmatmul.mubr.msk.bf16.vlgmr.msra.gmra.mrb[136].mxu0 %vm257_vm2, %v8469_v13  ;;  %8472 = vmatprep.subr.msk.bf16.mxu1 %vm261_vm1, %v5263_v14 }
 0x486   : > { %5321 = vmatpush1.bf16.msra.mxu1 %v5274_v15  ;;  %v5396_v16 = vpop.permute.xlu1 %5395  ;;  %v5394_v17 = vpop.permute.xlu0 %5393  ;;  %5454 = vmatprep.mubr.bf16.mxu0 %v8758_v0 }
 0x487   : > { %v5403_v19 = vsel %vm10785_vm10, %v5394_v17, %v5396_v16 }
 0x488   : > { %7409 = vrot.lane.b32.xlu1 %v10000_v22, %s8763_s10  ;;  %7270 = vrot.lane.b32.xlu0 %v10021_v32, %s8762_s9  ;;  %v5411_v25 = vsel %vm261_vm1, %v5403_v19, 0 }
 0x489   : > { %8473 = vmatmul.mubr.msk.bf16.vlgmr.msra.gmra.mrb[136].mxu1 %vm257_vm2, %v8469_v13 }
 0x48a   : > { %v5400_v21 = vpop.permute.xlu1 %5399  ;;  %v5398_v23 = vpop.permute.xlu0 %5397  ;;  %5495 = vmatprep.mubr.bf16.mxu1 %v8758_v0 }
 0x48b   : > { %v5404_v24 = vsel %vm10785_vm10, %v5396_v16, %v5398_v23  ;;  %v5405_v26 = vsel %vm10785_vm10, %v5398_v23, %v5400_v21 }
 0x48c   : > { %7413 = vrot.lane.b32.xlu1 %v10021_v32, %s8763_s10  ;;  %7411 = vrot.lane.b32.xlu0 %v10017_v31, %s8763_s10  ;;  %v5417_v38 = vsel %vm261_vm1, %v5405_v26, 0 }
 0x48d   : > { %8476 = vmatprep.subr.msk.bf16.mxu0 %vm261_vm1, %v5404_v24 }
 0x48e   : > { %5423 = vmatpush1.bf16.msra.mxu0 %v5411_v25  ;;  %v5537_v28 = vpop.permute.xlu1 %5536  ;;  %v5402_v30 = vpop.permute.xlu0 %5401 }
 0x48f   : > { %v5406_v36 = vsel %vm10785_vm10, %v5400_v21, %v5402_v30  ;;  %v8493_v21 = vld [vmem:[%s10770_s2 + $0x2c] sm:$0xf] }
 0x490   : > { %7554 = vrot.lane.b32.xlu1 %v10017_v31, %s8764_s11  ;;  %7415 = vrot.lane.b32.xlu0 %v10031_v37, %s8763_s10 }
 0x491   : > { %8477 = vmatmul.mubr.msk.bf16.vlgmr.msra.gmra.mrb[140].mxu0 %vm257_vm2, %v8475_v35  ;;  %8478 = vmatprep.subr.msk.bf16.mxu1 %vm261_vm1, %v5406_v36 }
 0x492   : > { %5464 = vmatpush1.bf16.msra.mxu1 %v5417_v38  ;;  %v5541_v39 = vpop.permute.xlu1 %5540  ;;  %v5539_v40 = vpop.permute.xlu0 %5538  ;;  %5597 = vmatprep.mubr.bf16.mxu0 %v8758_v0 }
 0x493   : > { %v5546_v43 = vsel %vm1558_vm11, %v5537_v28, %v5539_v40  ;;  %v5547_v44 = vsel %vm1558_vm11, %v5539_v40, %v5541_v39 }
 0x494   : > { %v5554_v45 = vsel %vm261_vm1, %v5546_v43, 0  ;;  %7558 = vrot.lane.b32.xlu1 %v10031_v37, %s8764_s11  ;;  %7552 = vrot.lane.b32.xlu0 %v10000_v22, %s8764_s11 }
 0x495   : > { %8479 = vmatmul.mubr.msk.bf16.vlgmr.msra.gmra.mrb[140].mxu1 %vm257_vm2, %v8475_v35  ;;  %8482 = vmatprep.subr.msk.bf16.mxu0 %vm261_vm1, %v5547_v44 }
 0x496   : > { %5566 = vmatpush1.bf16.msra.mxu0 %v5554_v45  ;;  %v5545_v46 = vpop.permute.xlu1 %5544  ;;  %v5543_v47 = vpop.permute.xlu0 %5542  ;;  %5638 = vmatprep.mubr.bf16.mxu1 %v8758_v0 }
 0x497   : > { %v5548_v50 = vsel %vm1558_vm11, %v5541_v39, %v5543_v47  ;;  %v5549_v51 = vsel %vm1558_vm11, %v5543_v47, %v5545_v46  ;;  %v6124_v47 = vsel %vm261_vm1, %v10000_v22, 0  ;;  %vm10793_vm11 = vcmask 1039360  }
 0x498   : > { %v5560_v53 = vsel %vm261_vm1, %v5548_v50, 0  ;;  %7695 = vrot.lane.b32.xlu1 %v10000_v22, %s8765_s12  ;;  %7556 = vrot.lane.b32.xlu0 %v10021_v32, %s8764_s11  ;;  %vm10796_vm10 = vmmov %vm10793_vm11  ;;  %s8776_s11 = smov [#allocation4]  }
 0x499   : > { %8483 = vmatmul.mubr.msk.bf16.vlgmr.msra.gmra.mrb[144].mxu0 %vm257_vm2, %v8481_v49  ;;  %8484 = vmatprep.subr.msk.bf16.mxu1 %vm261_vm1, %v5549_v51  ;;  %s8698_s28 = sshll.u32 %s8776_s11, 4  ;;  %s8699_s28 = int_to_ptr.vmem [resolvable:$false] %s8698_s28 }
 0x49a   : > { %5607 = vmatpush1.bf16.msra.mxu1 %v5560_v53  ;;  %v5682_v54 = vpop.permute.xlu1 %5681  ;;  %v5680_v55 = vpop.permute.xlu0 %5679  ;;  %5740 = vmatprep.mubr.bf16.mxu0 %v8758_v0  ;;  %p8701_p0 = scmp.lt.s32.totalorder %s10728_s8, %s8699_s28 }
 0x49b   : > { %v5689_v56 = vsel %vm257_vm2, %v5680_v55, %v5682_v54 }
 0x49c   : > { %7699 = vrot.lane.b32.xlu1 %v10021_v32, %s8765_s12  ;;  %7697 = vrot.lane.b32.xlu0 %v10017_v31, %s8765_s12  ;;  %v5697_v7 = vsel %vm261_vm1, %v5689_v56, 0 }
 0x49d   : > { %8485 = vmatmul.mubr.msk.bf16.vlgmr.msra.gmra.mrb[144].mxu1 %vm257_vm2, %v8481_v49 }
 0x49e   : > { %v5686_v5 = vpop.permute.xlu1 %5685  ;;  %v5684_v27 = vpop.permute.xlu0 %5683  ;;  %5781 = vmatprep.mubr.bf16.mxu1 %v8758_v0 }
 0x49f   : > { %v5690_v6 = vsel %vm257_vm2, %v5682_v54, %v5684_v27  ;;  %v5691_v8 = vsel %vm257_vm2, %v5684_v27, %v5686_v5 }
 0x4a0   : > { %7840 = vrot.lane.b32.xlu1 %v10017_v31, %s8766_s13  ;;  %7701 = vrot.lane.b32.xlu0 %v10031_v37, %s8765_s12  ;;  %v5703_v41 = vsel %vm261_vm1, %v5691_v8, 0  ;;  %s8700_s12 = scalar_lea.vmem %s8699_s28, 1024 }
 0x4a1   : > { %8488 = vmatprep.subr.msk.bf16.mxu0 %vm261_vm1, %v5690_v6 }
 0x4a2   : > { %5709 = vmatpush1.bf16.msra.mxu0 %v5697_v7  ;;  %v5823_v9 = vpop.permute.xlu1 %5822  ;;  %v5688_v33 = vpop.permute.xlu0 %5687  ;;  %v8515_v7 = vld [vmem:[%s10770_s2 + $0x38] sm:$0xf] }
 0x4a3   : > { %v5692_v10 = vsel %vm257_vm2, %v5686_v5, %v5688_v33 }
 0x4a4   : > { %7844 = vrot.lane.b32.xlu1 %v10031_v37, %s8766_s13  ;;  %7838 = vrot.lane.b32.xlu0 %v10000_v22, %s8766_s13 }
 0x4a5   : > { %8489 = vmatmul.mubr.msk.bf16.vlgmr.msra.gmra.mrb[148].mxu0 %vm257_vm2, %v8487_v34  ;;  %8490 = vmatprep.subr.msk.bf16.mxu1 %vm261_vm1, %v5692_v10 }
 0x4a6   : > { %5750 = vmatpush1.bf16.msra.mxu1 %v5703_v41  ;;  %v5827_v13 = vpop.permute.xlu1 %5826  ;;  %v5825_v42 = vpop.permute.xlu0 %5824  ;;  %5883 = vmatprep.mubr.bf16.mxu0 %v8758_v0 }
 0x4a7   : > { %v5832_v14 = vsel %vm1848_vm12, %v5823_v9, %v5825_v42  ;;  %v5833_v15 = vsel %vm1848_vm12, %v5825_v42, %v5827_v13 }
 0x4a8   : > { %v5840_v16 = vsel %vm261_vm1, %v5832_v14, 0  ;;  %7981 = vrot.lane.b32.xlu1 %v10000_v22, %s10788_s22  ;;  %7842 = vrot.lane.b32.xlu0 %v10021_v32, %s8766_s13  ;;  %v8505_v22 = vld [vmem:[%s10770_s2 + $0x34] sm:$0xf] }
 0x4a9   : > { %8491 = vmatmul.mubr.msk.bf16.vlgmr.msra.gmra.mrb[148].mxu1 %vm257_vm2, %v8487_v34  ;;  %8494 = vmatprep.subr.msk.bf16.mxu0 %vm261_vm1, %v5833_v15 }
 0x4aa   : > { %5852 = vmatpush1.bf16.msra.mxu0 %v5840_v16  ;;  %v5831_v17 = vpop.permute.xlu1 %5830  ;;  %v5829_v19 = vpop.permute.xlu0 %5828  ;;  %5924 = vmatprep.mubr.bf16.mxu1 %v8758_v0 }
 0x4ab   : > { %v5834_v23 = vsel %vm1848_vm12, %v5827_v13, %v5829_v19  ;;  %v5835_v24 = vsel %vm1848_vm12, %v5829_v19, %v5831_v17  ;;  %vm10794_vm12 = vmmov %vm10793_vm11 }
 0x4ac   : > { %v5846_v25 = vsel %vm261_vm1, %v5834_v23, 0  ;;  %7985 = vrot.lane.b32.xlu1 %v10021_v32, %s10788_s22  ;;  %7846 = vrot.lane.b32.xlu0 %v9788_v29, %s8766_s13 }
 0x4ad   : > { %8495 = vmatmul.mubr.msk.bf16.vlgmr.msra.gmra.mrb[152].mxu0 %vm257_vm2, %v8493_v21  ;;  %8496 = vmatprep.subr.msk.bf16.mxu1 %vm261_vm1, %v5835_v24 }
 0x4ae   : > { %5893 = vmatpush1.bf16.msra.mxu1 %v5846_v25  ;;  %v5968_v26 = vpop.permute.xlu1 %5967  ;;  %v5966_v28 = vpop.permute.xlu0 %5965  ;;  %6026 = vmatprep.mubr.bf16.mxu0 %v8758_v0 }
 0x4af   : > { %v5975_v30 = vsel %vm1993_vm13, %v5966_v28, %v5968_v26 }
 0x4b0   : > { %7983 = vrot.lane.b32.xlu0 %v10017_v31, %s10788_s22  ;;  %7989 = vrot.lane.b32.xlu1 %v9788_v29, %s10788_s22  ;;  %v5983_v39 = vsel %vm261_vm1, %v5975_v30, 0  ;;  %v8499_v29 = vld [vmem:[%s10770_s2 + $0x30] sm:$0xf]  ;;  %v8532_v30 = vld [vmem:[%s10770_s2 + $0x40] sm:$0xf] }
 0x4b1   : > { %8497 = vmatmul.mubr.msk.bf16.vlgmr.msra.gmra.mrb[152].mxu1 %vm257_vm2, %v8493_v21 }
 0x4b2   : > { %v5972_v35 = vpop.permute.xlu1 %5971  ;;  %v5970_v36 = vpop.permute.xlu0 %5969  ;;  %6067 = vmatprep.mubr.bf16.mxu1 %v8758_v0 }
 0x4b3   : > { %v5976_v38 = vsel %vm1993_vm13, %v5968_v26, %v5970_v36  ;;  %v5977_v40 = vsel %vm1993_vm13, %v5970_v36, %v5972_v35 }
 0x4b4   : > { %7987 = vrot.lane.b32.xlu0 %v10031_v37, %s10788_s22  ;;  %8500 = vmatprep.subr.msk.bf16.mxu0 %vm261_vm1, %v5976_v38  ;;  %v5989_v46 = vsel %vm261_vm1, %v5977_v40, 0 }
 0x4b5   : > { %5995 = vmatpush1.bf16.msra.mxu0 %v5983_v39 }
 0x4b6   : > { %v10294_v43 = vpop.permute.xlu1 %7703  ;;  %8510 = vmatprep.subr.msk.bf16.mxu0 %vm261_vm1, %v10017_v31  ;;  %v5974_v44 = vpop.permute.xlu0 %5973  ;;  %v6130_v31 = vsel %vm261_vm1, %v10021_v32, 0 }
 0x4b7   : > { %v5978_v45 = vsel %vm1993_vm13, %v5972_v35, %v5974_v44  ;;  %vm10795_vm13 = vmmov %vm10793_vm11 }
 0x4b8   : > { %8501 = vmatmul.mubr.msk.bf16.vlgmr.msra.gmra.mrb[156].mxu0 %vm257_vm2, %v8499_v29  ;;  %8502 = vmatprep.subr.msk.bf16.mxu1 %vm261_vm1, %v5978_v45 }
 0x4b9   : > { %6036 = vmatpush1.bf16.msra.mxu1 %v5989_v46  ;;  %6136 = vmatpush1.bf16.msra.mxu0 %v6124_v47 }
 0x4ba   : > { %v6266_v49 = vpop.permute.xlu1 %6265  ;;  %8512 = vmatprep.subr.msk.bf16.mxu1 %vm261_vm1, %v10031_v37  ;;  %v10306_v50 = vpop.permute.xlu0 %7560  ;;  %6167 = vmatprep.mubr.bf16.mxu0 %v8758_v0 }
 0x4bc   : > { %8503 = vmatmul.mubr.msk.bf16.vlgmr.msra.gmra.mrb[156].mxu1 %vm257_vm2, %v8499_v29 }
 0x4bd   : > { %6177 = vmatpush1.bf16.msra.mxu1 %v6130_v31  ;;  %6208 = vmatprep.mubr.bf16.mxu1 %v8758_v0 }
 0x4be   : > { %v6270_v51 = vpop.permute.xlu1 %6269  ;;  %v6268_v53 = vpop.permute.xlu0 %6267 }
 0x4bf   : > { %v6275_v37 = vsel %vm10793_vm11, %v6266_v49, %v6268_v53  ;;  %v6276_v54 = vsel %vm10794_vm12, %v6268_v53, %v6270_v51  ;;  %vm10797_vm11 = vcmask 990208  }
 0x4c0   : > { %v6283_v55 = vsel %vm261_vm1, %v6275_v37, 0  ;;  %8511 = vmatmul.mubr.msk.bf16.vlgmr.msra.gmra.mrb[160].mxu0 %vm257_vm2, %v8505_v22  ;;  %8521 = vmatprep.subr.msk.bf16.mxu0 %vm261_vm1, %v6276_v54 }
 0x4c1   : > { %6295 = vmatpush1.bf16.msra.mxu0 %v6283_v55  ;;  %6326 = vmatprep.mubr.bf16.mxu0 %v8758_v0 }
 0x4c2   : > { %v6411_v32 = vpop.permute.xlu1 %6410  ;;  %v6272_v56 = vpop.permute.xlu0 %6271 }
 0x4c3   : > { %v6277_v5 = vsel %vm10795_vm13, %v6270_v51, %v6272_v56  ;;  %v6278_v27 = vsel %vm10796_vm10, %v6272_v56, %v9918_v57  ;;  %vm10798_vm10 = vmmov %vm10797_vm11  ;;  %v8544_v56 = vld [vmem:[%s10770_s2 + $0x48] sm:$0xf] }
 0x4c4   : > { %v6289_v6 = vsel %vm261_vm1, %v6277_v5, 0  ;;  %8513 = vmatmul.mubr.msk.bf16.vlgmr.msra.gmra.mrb[160].mxu1 %vm257_vm2, %v8505_v22  ;;  %8523 = vmatprep.subr.msk.bf16.mxu1 %vm261_vm1, %v6278_v27  ;;  %vm10799_vm12 = vmmov %vm10798_vm10 }
 0x4c5   : > { %6336 = vmatpush1.bf16.msra.mxu1 %v6289_v6  ;;  %6367 = vmatprep.mubr.bf16.mxu1 %v8758_v0  ;;  %vm10800_vm13 = vmmov %vm10798_vm10 }
 0x4c6   : > { %v6415_v8 = vpop.permute.xlu1 %6414  ;;  %v6409_v9 = vpop.permute.xlu0 %6408 }
 0x4c7   : > { %v6421_v33 = vsel %vm10797_vm11, %v6415_v8, %v9926_v60  ;;  %v6418_v57 = vsel %vm10798_vm10, %v6409_v9, %v6411_v32  ;;  %v8526_v60 = vld [vmem:[%s10770_s2 + $0x3c] sm:$0xf] }
 0x4c8   : > { %8522 = vmatmul.mubr.msk.bf16.vlgmr.msra.gmra.mrb[164].mxu0 %vm257_vm2, %v8515_v7  ;;  %8529 = vmatprep.subr.msk.bf16.mxu1 %vm261_vm1, %v6421_v33  ;;  %v6426_v42 = vsel %vm261_vm1, %v6418_v57, 0 }
 0x4c9   : > { %6469 = vmatprep.mubr.bf16.mxu0 %v8758_v0 }
 0x4ca   : > { %v6552_v34 = vpop.permute.xlu1 %6551  ;;  %v6413_v10 = vpop.permute.xlu0 %6412 }
 0x4cb   : > { %v6419_v41 = vsel %vm10799_vm12, %v6411_v32, %v6413_v10  ;;  %v6420_v13 = vsel %vm10800_vm13, %v6413_v10, %v6415_v8 }
 0x4cc   : > { %v6432_v14 = vsel %vm261_vm1, %v6420_v13, 0  ;;  %8524 = vmatmul.mubr.msk.bf16.vlgmr.msra.gmra.mrb[164].mxu1 %vm257_vm2, %v8515_v7  ;;  %8527 = vmatprep.subr.msk.bf16.mxu0 %vm261_vm1, %v6419_v41 }
 0x4cd   : > { %6438 = vmatpush1.bf16.msra.mxu0 %v6426_v42  ;;  %6479 = vmatpush1.bf16.msra.mxu1 %v6432_v14 }
 0x4ce   : > { %v6556_v15 = vpop.permute.xlu1 %6555  ;;  %v6554_v16 = vpop.permute.xlu0 %6553  ;;  %6510 = vmatprep.mubr.bf16.mxu1 %v8758_v0 }
 0x4cf   : > { %v6561_v17 = vsel %vm2585_vm14, %v6552_v34, %v6554_v16  ;;  %v6562_v19 = vsel %vm2585_vm14, %v6554_v16, %v6556_v15 }
 0x4d0   : > { %v6569_v21 = vsel %vm261_vm1, %v6561_v17, 0  ;;  %8528 = vmatmul.mubr.msk.bf16.vlgmr.msra.gmra.mrb[168].mxu0 %vm257_vm2, %v8526_v60  ;;  %8533 = vmatprep.subr.msk.bf16.mxu0 %vm261_vm1, %v6562_v19 }
 0x4d1   : > { %6581 = vmatpush1.bf16.msra.mxu0 %v6569_v21  ;;  %6612 = vmatprep.mubr.bf16.mxu0 %v8758_v0  ;;  %v8556_v21 = vld [vmem:[%s10770_s2 + $0x50] sm:$0xf] }
 0x4d2   : > { %v6697_v23 = vpop.permute.xlu1 %6696  ;;  %v6558_v24 = vpop.permute.xlu0 %6557 }
 0x4d3   : > { %v6563_v25 = vsel %vm2585_vm14, %v6556_v15, %v6558_v24  ;;  %v6564_v26 = vsel %vm2585_vm14, %v6558_v24, %v9924_v59 }
 0x4d4   : > { %v6575_v28 = vsel %vm261_vm1, %v6563_v25, 0  ;;  %8530 = vmatmul.mubr.msk.bf16.vlgmr.msra.gmra.mrb[168].mxu1 %vm257_vm2, %v8526_v60  ;;  %8535 = vmatprep.subr.msk.bf16.mxu1 %vm261_vm1, %v6564_v26 }
 0x4d5   : > { %6622 = vmatpush1.bf16.msra.mxu1 %v6575_v28  ;;  %6653 = vmatprep.mubr.bf16.mxu1 %v8758_v0 }
 0x4d6   : > { %v6701_v35 = vpop.permute.xlu1 %6700  ;;  %v6695_v36 = vpop.permute.xlu0 %6694 }
 0x4d7   : > { %v6707_v38 = vsel %vm2730_vm15, %v6701_v35, %v9938_v62  ;;  %v6704_v59 = vsel %vm2730_vm15, %v6695_v36, %v6697_v23  ;;  %v8538_v62 = vld [vmem:[%s10770_s2 + $0x44] sm:$0xf] }
 0x4d8   : > { %8534 = vmatmul.mubr.msk.bf16.vlgmr.msra.gmra.mrb[172].mxu0 %vm257_vm2, %v8532_v30  ;;  %8541 = vmatprep.subr.msk.bf16.mxu1 %vm261_vm1, %v6707_v38  ;;  %v6712_v45 = vsel %vm261_vm1, %v6704_v59, 0 }
 0x4d9   : > { %6755 = vmatprep.mubr.bf16.mxu0 %v8758_v0 }
 0x4da   : > { %v6838_v39 = vpop.permute.xlu1 %6837  ;;  %v6699_v40 = vpop.permute.xlu0 %6698 }
 0x4db   : > { %v6705_v29 = vsel %vm2730_vm15, %v6697_v23, %v6699_v40  ;;  %v6706_v44 = vsel %vm2730_vm15, %v6699_v40, %v6701_v35 }
 0x4dc   : > { %v6718_v46 = vsel %vm261_vm1, %v6706_v44, 0  ;;  %8536 = vmatmul.mubr.msk.bf16.vlgmr.msra.gmra.mrb[172].mxu1 %vm257_vm2, %v8532_v30  ;;  %8539 = vmatprep.subr.msk.bf16.mxu0 %vm261_vm1, %v6705_v29 }
 0x4dd   : > { %6724 = vmatpush1.bf16.msra.mxu0 %v6712_v45  ;;  %6765 = vmatpush1.bf16.msra.mxu1 %v6718_v46 }
 0x4de   : > { %v6842_v47 = vpop.permute.xlu1 %6841  ;;  %v6840_v49 = vpop.permute.xlu0 %6839  ;;  %6796 = vmatprep.mubr.bf16.mxu1 %v8758_v0 }
 0x4df   : > { %v6847_v31 = vsel %vm252_vm0, %v6838_v39, %v6840_v49  ;;  %v6848_v22 = vsel %vm252_vm0, %v6840_v49, %v6842_v47 }
 0x4e0   : > { %v6855_v51 = vsel %vm261_vm1, %v6847_v31, 0  ;;  %8540 = vmatmul.mubr.msk.bf16.vlgmr.msra.gmra.mrb[176].mxu0 %vm257_vm2, %v8538_v62  ;;  %8545 = vmatprep.subr.msk.bf16.mxu0 %vm261_vm1, %v6848_v22  ;;  %v8568_v31 = vld [vmem:[%s10770_s2 + $0x58] sm:$0xf] }
 0x4e1   : > { %6867 = vmatpush1.bf16.msra.mxu0 %v6855_v51  ;;  %6898 = vmatprep.mubr.bf16.mxu0 %v8758_v0 }
 0x4e2   : > { %v6983_v53 = vpop.permute.xlu1 %6982  ;;  %v6844_v37 = vpop.permute.xlu0 %6843 }
 0x4e3   : > { %v6849_v54 = vsel %vm252_vm0, %v6842_v47, %v6844_v37  ;;  %v6850_v55 = vsel %vm252_vm0, %v6844_v37, %v9936_v61  ;;  %vm10801_vm0 = vcmask 449536  }
 0x4e4   : > { %v6861_v32 = vsel %vm261_vm1, %v6849_v54, 0  ;;  %8542 = vmatmul.mubr.msk.bf16.vlgmr.msra.gmra.mrb[176].mxu1 %vm257_vm2, %v8538_v62  ;;  %8547 = vmatprep.subr.msk.bf16.mxu1 %vm261_vm1, %v6850_v55 }
 0x4e5   : > { %6908 = vmatpush1.bf16.msra.mxu1 %v6861_v32  ;;  %6939 = vmatprep.mubr.bf16.mxu1 %v8758_v0 }
 0x4e6   : > { %v6987_v5 = vpop.permute.xlu1 %6986  ;;  %v6981_v27 = vpop.permute.xlu0 %6980 }
 0x4e7   : > { %v6993_v6 = vsel %vm398_vm3, %v6987_v5, %v9946_v2  ;;  %v6990_v61 = vsel %vm398_vm3, %v6981_v27, %v6983_v53  ;;  %v8550_v2 = vld [vmem:[%s10770_s2 + $0x4c] sm:$0xf] }
 0x4e8   : > { %8546 = vmatmul.mubr.msk.bf16.vlgmr.msra.gmra.mrb[180].mxu0 %vm257_vm2, %v8544_v56  ;;  %8553 = vmatprep.subr.msk.bf16.mxu1 %vm261_vm1, %v6993_v6  ;;  %v6998_v57 = vsel %vm261_vm1, %v6990_v61, 0 }
 0x4e9   : > { %7041 = vmatprep.mubr.bf16.mxu0 %v8758_v0 }
 0x4ea   : > { %v7124_v7 = vpop.permute.xlu1 %7123  ;;  %v6985_v8 = vpop.permute.xlu0 %6984 }
 0x4eb   : > { %v6991_v9 = vsel %vm398_vm3, %v6983_v53, %v6985_v8  ;;  %v6992_v33 = vsel %vm398_vm3, %v6985_v8, %v6987_v5  ;;  %vm10802_vm3 = vmmov %vm10801_vm0 }
 0x4ec   : > { %v7004_v34 = vsel %vm261_vm1, %v6992_v33, 0  ;;  %8548 = vmatmul.mubr.msk.bf16.vlgmr.msra.gmra.mrb[180].mxu1 %vm257_vm2, %v8544_v56  ;;  %8551 = vmatprep.subr.msk.bf16.mxu0 %vm261_vm1, %v6991_v9 }
 0x4ed   : > { %7010 = vmatpush1.bf16.msra.mxu0 %v6998_v57  ;;  %7051 = vmatpush1.bf16.msra.mxu1 %v7004_v34 }
 0x4ee   : > { %v7128_v10 = vpop.permute.xlu1 %7127  ;;  %v7126_v41 = vpop.permute.xlu0 %7125  ;;  %7082 = vmatprep.mubr.bf16.mxu1 %v8758_v0 }
 0x4ef   : > { %v7133_v13 = vsel %vm543_vm4, %v7124_v7, %v7126_v41  ;;  %v7134_v42 = vsel %vm543_vm4, %v7126_v41, %v7128_v10  ;;  %v4360_v41 = vld [vmem:[%s10771_s3] sm:$0xf] }
 0x4f0   : > { %v7141_v14 = vsel %vm261_vm1, %v7133_v13, 0  ;;  %8552 = vmatmul.mubr.msk.bf16.vlgmr.msra.gmra.mrb[184].mxu0 %vm257_vm2, %v8550_v2  ;;  %8557 = vmatprep.subr.msk.bf16.mxu0 %vm261_vm1, %v7134_v42  ;;  %v8580_v13 = vld [vmem:[%s10770_s2 + $0x60] sm:$0xf] }
 0x4f1   : > { %7153 = vmatpush1.bf16.msra.mxu0 %v7141_v14  ;;  %7184 = vmatprep.mubr.bf16.mxu0 %v8758_v0 }
 0x4f2   : > { %v7269_v60 = vpop.permute.xlu1 %7268  ;;  %v7130_v15 = vpop.permute.xlu0 %7129 }
 0x4f3   : > { %v7135_v16 = vsel %vm543_vm4, %v7128_v10, %v7130_v15  ;;  %v7136_v17 = vsel %vm543_vm4, %v7130_v15, %v9944_v63  ;;  %v4365_v15 = vrot.slane %v4360_v41, %v9510_v48  ;;  %vm10803_vm4 = vmmov %vm10801_vm0 }
 0x4f4   : > { %v7147_v19 = vsel %vm261_vm1, %v7135_v16, 0  ;;  %8554 = vmatmul.mubr.msk.bf16.vlgmr.msra.gmra.mrb[184].mxu1 %vm257_vm2, %v8550_v2  ;;  %8559 = vmatprep.subr.msk.bf16.mxu1 %vm261_vm1, %v7136_v17  ;;  %v4369_v17 = vrot.slane %v4360_v41, %v9517_v52 }
 0x4f5   : > { %7194 = vmatpush1.bf16.msra.mxu1 %v7147_v19  ;;  %7225 = vmatprep.mubr.bf16.mxu1 %v8758_v0 }
 0x4f6   : > { %v7273_v23 = vpop.permute.xlu1 %7272  ;;  %v7267_v24 = vpop.permute.xlu0 %7266 }
 0x4f7   : > { %v7279_v25 = vsel %vm688_vm5, %v7273_v23, %v9958_v4  ;;  %v7276_v63 = vsel %vm688_vm5, %v7267_v24, %v7269_v60  ;;  %v8562_v4 = vld [vmem:[%s10770_s2 + $0x54] sm:$0xf] }
 0x4f8   : > { %8558 = vmatmul.mubr.msk.bf16.vlgmr.msra.gmra.mrb[188].mxu0 %vm257_vm2, %v8556_v21  ;;  %8565 = vmatprep.subr.msk.bf16.mxu1 %vm261_vm1, %v7279_v25  ;;  %v7284_v36 = vsel %vm261_vm1, %v7276_v63, 0 }
 0x4f9   : > { %7327 = vmatprep.mubr.bf16.mxu0 %v8758_v0 }
 0x4fa   : > { %v7410_v26 = vpop.permute.xlu1 %7409  ;;  %v7271_v28 = vpop.permute.xlu0 %7270 }
 0x4fb   : > { %v7277_v30 = vsel %vm688_vm5, %v7269_v60, %v7271_v28  ;;  %v7278_v35 = vsel %vm688_vm5, %v7271_v28, %v7273_v23  ;;  %v8438_v60 = vld [vmem:[%s10771_s3 + $0x4] sm:$0xf]  ;;  %vm10804_vm5 = vmmov %vm10801_vm0 }
 0x4fc   : > { %v7290_v38 = vsel %vm261_vm1, %v7278_v35, 0  ;;  %8560 = vmatmul.mubr.msk.bf16.vlgmr.msra.gmra.mrb[188].mxu1 %vm257_vm2, %v8556_v21  ;;  %8563 = vmatprep.subr.msk.bf16.mxu0 %vm261_vm1, %v7277_v30  ;;  %v4508_v25 = vrot.slane %v8438_v60, %v9510_v48  ;;  %v4512_v28 = vrot.slane %v8438_v60, %v9517_v52 }
 0x4fd   : > { %7296 = vmatpush1.bf16.msra.mxu0 %v7284_v36  ;;  %7337 = vmatpush1.bf16.msra.mxu1 %v7290_v38  ;;  %v4373_v36 = vrot.slane %v4360_v41, %v9521_v58 }
 0x4fe   : > { %v7414_v59 = vpop.permute.xlu1 %7413  ;;  %v7412_v39 = vpop.permute.xlu0 %7411  ;;  %7368 = vmatprep.mubr.bf16.mxu1 %v8758_v0 }
 0x4ff   : > { %v7419_v40 = vsel %vm833_vm6, %v7410_v26, %v7412_v39  ;;  %v7420_v29 = vsel %vm833_vm6, %v7412_v39, %v7414_v59  ;;  %v4377_v39 = vrot.slane %v4360_v41, %v9529_v1 }
 0x500   : > { %v7427_v44 = vsel %vm261_vm1, %v7419_v40, 0  ;;  %8564 = vmatmul.mubr.msk.bf16.vlgmr.msra.gmra.mrb[192].mxu0 %vm257_vm2, %v8562_v4  ;;  %8569 = vmatprep.subr.msk.bf16.mxu0 %vm261_vm1, %v7420_v29 }
 0x501   : > { %7439 = vmatpush1.bf16.msra.mxu0 %v7427_v44  ;;  %7470 = vmatprep.mubr.bf16.mxu0 %v8758_v0 }
 0x502   : > { %v7555_v45 = vpop.permute.xlu1 %7554  ;;  %v7416_v46 = vpop.permute.xlu0 %7415 }
 0x503   : > { %v7421_v62 = vsel %vm833_vm6, %v7414_v59, %v7416_v46  ;;  %v7422_v47 = vsel %vm833_vm6, %v7416_v46, %v9956_v3 }
 0x504   : > { %v7433_v49 = vsel %vm261_vm1, %v7421_v62, 0  ;;  %8566 = vmatmul.mubr.msk.bf16.vlgmr.msra.gmra.mrb[192].mxu1 %vm257_vm2, %v8562_v4  ;;  %8571 = vmatprep.subr.msk.bf16.mxu1 %vm261_vm1, %v7422_v47  ;;  %v4516_v47 = vrot.slane %v8438_v60, %v9521_v58 }
 0x505   : > { %7480 = vmatpush1.bf16.msra.mxu1 %v7433_v49  ;;  %7511 = vmatprep.mubr.bf16.mxu1 %v8758_v0 }
 0x506   : > { %v7559_v22 = vpop.permute.xlu1 %7558  ;;  %v7553_v51 = vpop.permute.xlu0 %7552 }
 0x507   : > { %v7565_v53 = vsel %vm978_vm7, %v7559_v22, %v10306_v50  ;;  %v7562_v3 = vsel %vm978_vm7, %v7553_v51, %v7555_v45  ;;  %v8574_v50 = vld [vmem:[%s10770_s2 + $0x5c] sm:$0xf] }
 0x508   : > { %8570 = vmatmul.mubr.msk.bf16.vlgmr.msra.gmra.mrb[196].mxu0 %vm257_vm2, %v8568_v31  ;;  %8577 = vmatprep.subr.msk.bf16.mxu1 %vm261_vm1, %v7565_v53  ;;  %v7570_v56 = vsel %vm261_vm1, %v7562_v3, 0 }
 0x509   : > { %7613 = vmatprep.mubr.bf16.mxu0 %v8758_v0 }
 0x50a   : > { %v7696_v37 = vpop.permute.xlu1 %7695  ;;  %v7557_v54 = vpop.permute.xlu0 %7556 }
 0x50b   : > { %v7563_v55 = vsel %vm978_vm7, %v7555_v45, %v7557_v54  ;;  %v7564_v32 = vsel %vm978_vm7, %v7557_v54, %v7559_v22  ;;  %v8586_v45 = vld [vmem:[%s10770_s2 + $0x64] sm:$0xf]  ;;  %v4520_v22 = vrot.slane %v8438_v60, %v9529_v1 }
 0x50c   : > { %v7576_v5 = vsel %vm261_vm1, %v7564_v32, 0  ;;  %8572 = vmatmul.mubr.msk.bf16.vlgmr.msra.gmra.mrb[196].mxu1 %vm257_vm2, %v8568_v31  ;;  %8575 = vmatprep.subr.msk.bf16.mxu0 %vm261_vm1, %v7563_v55 }
 0x50d   : > { %7582 = vmatpush1.bf16.msra.mxu0 %v7570_v56  ;;  %7623 = vmatpush1.bf16.msra.mxu1 %v7576_v5 }
 0x50e   : > { %v7700_v27 = vpop.permute.xlu1 %7699  ;;  %v7698_v6 = vpop.permute.xlu0 %7697  ;;  %7654 = vmatprep.mubr.bf16.mxu1 %v8758_v0 }
 0x50f   : > { %v7705_v61 = vsel %vm1123_vm8, %v7696_v37, %v7698_v6  ;;  %v7706_v7 = vsel %vm1123_vm8, %v7698_v6, %v7700_v27 }
 0x510   : > { %v7713_v8 = vsel %vm261_vm1, %v7705_v61, 0  ;;  %8576 = vmatmul.mubr.msk.bf16.vlgmr.msra.gmra.mrb[200].mxu0 %vm257_vm2, %v8574_v50  ;;  %8581 = vmatprep.subr.msk.bf16.mxu0 %vm261_vm1, %v7706_v7 }
 0x511   : > { %7725 = vmatpush1.bf16.msra.mxu0 %v7713_v8  ;;  %7756 = vmatprep.mubr.bf16.mxu0 %v8758_v0  ;;  %v8444_v8 = vld [vmem:[%s10771_s3 + $0x8] sm:$0xf] }
 0x512   : > { %v7841_v9 = vpop.permute.xlu1 %7840  ;;  %v7702_v33 = vpop.permute.xlu0 %7701  ;;  %v4655_v60 = vrot.slane %v8444_v8, %v9517_v52 }
 0x513   : > { %v7707_v57 = vsel %vm1123_vm8, %v7700_v27, %v7702_v33  ;;  %v7708_v34 = vsel %vm1123_vm8, %v7702_v33, %v10294_v43 }
 0x514   : > { %v7719_v2 = vsel %vm261_vm1, %v7707_v57, 0  ;;  %8578 = vmatmul.mubr.msk.bf16.vlgmr.msra.gmra.mrb[200].mxu1 %vm257_vm2, %v8574_v50  ;;  %8583 = vmatprep.subr.msk.bf16.mxu1 %vm261_vm1, %v7708_v34  ;;  %v4312_v10 = vpop.f32.mrb[108].mxu0 }
 0x515   : > { %7766 = vmatpush1.bf16.msra.mxu1 %v7719_v2  ;;  %7797 = vmatprep.mubr.bf16.mxu1 %v8758_v0  ;;  %v4314_v42 = vpop.f32.mrb[109].mxu0  ;;  %v4382_v35 = vmul.f32 %v4365_v15, %v4312_v10 }
 0x516   : > { %v7845_v43 = vpop.permute.xlu1 %7844  ;;  %v7839_v14 = vpop.permute.xlu0 %7838  ;;  %v4383_v59 = vmul.f32 %v4369_v17, %v4314_v42  ;;  %v8592_v42 = vld [vmem:[%s10770_s2 + $0x68] sm:$0xf] }
 0x517   : > { %v4316_v16 = vpop.f32.mrb[110].mxu0  ;;  %v7848_v23 = vsel %vm1268_vm9, %v7839_v14, %v7841_v9 }
 0x518   : > { %8582 = vmatmul.mubr.msk.bf16.vlgmr.msra.gmra.mrb[204].mxu0 %vm257_vm2, %v8580_v13  ;;  %v4317_v19 = vpop.f32.mrb[111].mxu0  ;;  %v4353_v21 = vpop.f32.mrb[108].mxu1  ;;  %v7856_v4 = vsel %vm261_vm1, %v7848_v23, 0 }
 0x519   : > { %7899 = vmatprep.mubr.bf16.mxu0 %v8758_v0  ;;  %v4355_v24 = vpop.f32.mrb[109].mxu1  ;;  %v4384_v3 = vmul.f32 %v4373_v36, %v4353_v21 }
 0x51a   : > { %v7982_v63 = vpop.permute.xlu1 %7981  ;;  %v7843_v26 = vpop.permute.xlu0 %7842  ;;  %v4385_v32 = vmul.f32 %v4377_v39, %v4355_v24 }
 0x51b   : > { %v7849_v30 = vsel %vm1268_vm9, %v7841_v9, %v7843_v26  ;;  %v4357_v38 = vpop.f32.mrb[110].mxu1  ;;  %v7850_v44 = vsel %vm1268_vm9, %v7843_v26, %v7845_v43  ;;  %v8450_v26 = vld [vmem:[%s10771_s3 + $0xc] sm:$0xf] }
 0x51c   : > { %8584 = vmatmul.mubr.msk.bf16.vlgmr.msra.gmra.mrb[204].mxu1 %vm257_vm2, %v8580_v13  ;;  %8587 = vmatprep.subr.msk.bf16.mxu0 %vm261_vm1, %v7849_v30  ;;  %v4455_v40 = vpop.f32.mrb[112].mxu0  ;;  %v4358_v29 = vpop.f32.mrb[111].mxu1  ;;  %v7862_v55 = vsel %vm261_vm1, %v7850_v44, 0 }
 0x51d   : > { %7868 = vmatpush1.bf16.msra.mxu0 %v7856_v4  ;;  %7940 = vmatprep.mubr.bf16.mxu1 %v8758_v0  ;;  %v4525_v46 = vmul.f32 %v4508_v25, %v4455_v40  ;;  %v4457_v62 = vpop.f32.mrb[113].mxu0  ;;  %v4798_v29 = vrot.slane %v8450_v26, %v9517_v52 }
 0x51e   : > { %v7847_v49 = vpop.permute.xlu0 %7846  ;;  %v4526_v31 = vmul.f32 %v4512_v28, %v4457_v62  ;;  %v7986_v51 = vpop.permute.xlu1 %7985 }
 0x51f   : > { %v7851_v53 = vsel %vm1268_vm9, %v7845_v43, %v7847_v49  ;;  %v4529_v37 = vadd.f32 %v4525_v46, %v4382_v35  ;;  %v4459_v54 = vpop.f32.mrb[114].mxu0  ;;  %v4651_v43 = vrot.slane %v8444_v8, %v9510_v48 }
 0x520   : > { %8588 = vmatmul.mubr.msk.bf16.vlgmr.msra.gmra.mrb[208].mxu0 %vm257_vm2, %v8586_v45  ;;  %8589 = vmatprep.subr.msk.bf16.mxu1 %vm261_vm1, %v7851_v53  ;;  %v4530_v56 = vadd.f32 %v4526_v31, %v4383_v59  ;;  %v4460_v5 = vpop.f32.mrb[115].mxu0  ;;  %v4496_v50 = vpop.f32.mrb[112].mxu1  ;;  %v4794_v59 = vrot.slane %v8450_v26, %v9510_v48  ;;  %v4802_v31 = vrot.slane %v8450_v26, %v9521_v58 }
 0x521   : > { %7909 = vmatpush1.bf16.msra.mxu1 %v7862_v55  ;;  %8042 = vmatprep.mubr.bf16.mxu0 %v8758_v0  ;;  %v4527_v27 = vmul.f32 %v4516_v47, %v4496_v50  ;;  %v4498_v6 = vpop.f32.mrb[113].mxu1  ;;  %v8456_v50 = vld [vmem:[%s10771_s3 + $0x10] sm:$0xf] }
 0x522   : > { %v7984_v61 = vpop.permute.xlu0 %7983  ;;  %v4528_v7 = vmul.f32 %v4520_v22, %v4498_v6  ;;  %v4500_v34 = vpop.f32.mrb[114].mxu1 }
 0x523   : > { %v7991_v9 = vsel %vm10801_vm0, %v7982_v63, %v7984_v61  ;;  %v7992_v33 = vsel %vm10802_vm3, %v7984_v61, %v7986_v51  ;;  %v4531_v57 = vadd.f32 %v4527_v27, %v4384_v3  ;;  %v7990_v10 = vpop.permute.xlu1 %7989  ;;  %v4501_v13 = vpop.f32.mrb[115].mxu1  ;;  %v4663_v63 = vrot.slane %v8444_v8, %v9529_v1 }
 0x524   : > { %v7999_v2 = vsel %vm261_vm1, %v7991_v9, 0  ;;  %8590 = vmatmul.mubr.msk.bf16.vlgmr.msra.gmra.mrb[208].mxu1 %vm257_vm2, %v8586_v45  ;;  %8593 = vmatprep.subr.msk.bf16.mxu0 %vm261_vm1, %v7992_v33  ;;  %v4532_v41 = vadd.f32 %v4528_v7, %v4385_v32  ;;  %v4941_v9 = vrot.slane %v8456_v50, %v9517_v52 }
 0x525   : > { %8011 = vmatpush1.bf16.msra.mxu0 %v7999_v2  ;;  %8083 = vmatprep.mubr.bf16.mxu1 %v8758_v0  ;;  %v4659_v0 = vrot.slane %v8444_v8, %v9521_v58  ;;  %v4937_v8 = vrot.slane %v8456_v50, %v9510_v48  ;;  %v4945_v2 = vrot.slane %v8456_v50, %v9521_v58 }
 0x526   : > { %v7988_v14 = vpop.permute.xlu0 %7987 }
 0x527   : > { %v7993_v15 = vsel %vm10803_vm4, %v7986_v51, %v7988_v14  ;;  %v7994_v16 = vsel %vm10804_vm5, %v7988_v14, %v7990_v10  ;;  %v4806_v51 = vrot.slane %v8450_v26, %v9529_v1 }
 0x528   : > { %v8005_v17 = vsel %vm261_vm1, %v7993_v15, 0  ;;  %8594 = vmatmul.mubr.msk.bf16.vlgmr.msra.gmra.mrb[212].mxu0 %vm257_vm2, %v8592_v42  ;;  %8595 = vmatprep.subr.msk.bf16.mxu1 %vm261_vm1, %v7994_v16  ;;  %v4598_v19 = vpop.f32.mrb[116].mxu0 }
 0x529   : > { %8052 = vmatpush1.bf16.msra.mxu1 %v8005_v17  ;;  %v4668_v21 = vmul.f32 %v4651_v43, %v4598_v19  ;;  %v4600_v23 = vpop.f32.mrb[117].mxu0 }
 0x52a   : > { %v4669_v24 = vmul.f32 %v4655_v60, %v4600_v23  ;;  %v4602_v25 = vpop.f32.mrb[118].mxu0 }
 0x52b   : > { %v4672_v28 = vadd.f32 %v4668_v21, %v4529_v37  ;;  %v4603_v30 = vpop.f32.mrb[119].mxu0 }
 0x52c   : > { %8596 = vmatmul.mubr.msk.bf16.vlgmr.msra.gmra.mrb[212].mxu1 %vm257_vm2, %v8592_v42  ;;  %v4673_v35 = vadd.f32 %v4669_v24, %v4530_v56  ;;  %v4639_v36 = vpop.f32.mrb[116].mxu1  ;;  %v8462_v42 = vld [vmem:[%s10771_s3 + $0x14] sm:$0xf] }
 0x52d   : > { %v4670_v38 = vmul.f32 %v4659_v0, %v4639_v36  ;;  %v4641_v4 = vpop.f32.mrb[117].mxu1  ;;  %v5080_v19 = vrot.slane %v8462_v42, %v9510_v48  ;;  %v5084_v23 = vrot.slane %v8462_v42, %v9517_v52 }
 0x52e   : > { %v4671_v39 = vmul.f32 %v4663_v63, %v4641_v4  ;;  %v4643_v40 = vpop.f32.mrb[118].mxu1 }
 0x52f   : > { %v4674_v44 = vadd.f32 %v4670_v38, %v4531_v57  ;;  %v4644_v45 = vpop.f32.mrb[119].mxu1  ;;  %v5092_v38 = vrot.slane %v8462_v42, %v9529_v1 }
 0x530   : > { %v4675_v46 = vadd.f32 %v4671_v39, %v4532_v41  ;;  %v4741_v62 = vpop.f32.mrb[120].mxu0  ;;  %v4949_v41 = vrot.slane %v8456_v50, %v9529_v1  ;;  %v8474_v50 = vld [vmem:[%s10771_s3 + $0x1c] sm:$0xf] }
 0x531   : > { %v4811_v47 = vmul.f32 %v4794_v59, %v4741_v62  ;;  %v4743_v49 = vpop.f32.mrb[121].mxu0  ;;  %v8468_v62 = vld [vmem:[%s10771_s3 + $0x18] sm:$0xf] }
 0x532   : > { %v4812_v22 = vmul.f32 %v4798_v29, %v4743_v49  ;;  %v4745_v53 = vpop.f32.mrb[122].mxu0 }
 0x533   : > { %v4815_v3 = vadd.f32 %v4811_v47, %v4672_v28  ;;  %v4746_v37 = vpop.f32.mrb[123].mxu0  ;;  %v5227_v53 = vrot.slane %v8468_v62, %v9517_v52 }
 0x534   : > { %v4816_v54 = vadd.f32 %v4812_v22, %v4673_v35  ;;  %v4782_v55 = vpop.f32.mrb[120].mxu1  ;;  %v5088_v35 = vrot.slane %v8462_v42, %v9521_v58 }
 0x535   : > { %v4813_v32 = vmul.f32 %v4802_v31, %v4782_v55  ;;  %v4784_v56 = vpop.f32.mrb[121].mxu1  ;;  %v5231_v55 = vrot.slane %v8468_v62, %v9521_v58 }
 0x536   : > { %v4814_v5 = vmul.f32 %v4806_v51, %v4784_v56  ;;  %v4786_v27 = vpop.f32.mrb[122].mxu1  ;;  %v5223_v51 = vrot.slane %v8468_v62, %v9510_v48  ;;  %v5235_v56 = vrot.slane %v8468_v62, %v9529_v1  ;;  %v8486_v62 = vld [vmem:[%s10771_s3 + $0x24] sm:$0xf] }
 0x537   : > { %v4817_v6 = vadd.f32 %v4813_v32, %v4674_v44  ;;  %v4787_v61 = vpop.f32.mrb[123].mxu1 }
 0x538   : > { %v4818_v7 = vadd.f32 %v4814_v5, %v4675_v46 }
 0x53c   : > { %v4884_v33 = vpop.f32.mrb[124].mxu0 }
 0x53d   : > { %v4954_v57 = vmul.f32 %v4937_v8, %v4884_v33  ;;  %v4886_v34 = vpop.f32.mrb[125].mxu0  ;;  %v5366_v33 = vrot.slane %v8474_v50, %v9510_v48 }
 0x53e   : > { %v4955_v10 = vmul.f32 %v4941_v9, %v4886_v34  ;;  %v4888_v13 = vpop.f32.mrb[126].mxu0  ;;  %v5370_v34 = vrot.slane %v8474_v50, %v9517_v52 }
 0x53f   : > { %v4958_v43 = vadd.f32 %v4954_v57, %v4815_v3  ;;  %v4889_v14 = vpop.f32.mrb[127].mxu0 }
 0x540   : > { %v4959_v60 = vadd.f32 %v4955_v10, %v4816_v54  ;;  %v4925_v15 = vpop.f32.mrb[124].mxu1 }
 0x541   : > { %v4956_v16 = vmul.f32 %v4945_v2, %v4925_v15  ;;  %v4927_v17 = vpop.f32.mrb[125].mxu1 }
 0x542   : > { %v4957_v21 = vmul.f32 %v4949_v41, %v4927_v17  ;;  %v4929_v0 = vpop.f32.mrb[126].mxu1 }
 0x543   : > { %v4960_v24 = vadd.f32 %v4956_v16, %v4817_v6  ;;  %v4930_v25 = vpop.f32.mrb[127].mxu1  ;;  %v5378_v16 = vrot.slane %v8474_v50, %v9529_v1 }
 0x544   : > { %v4961_v63 = vadd.f32 %v4957_v21, %v4818_v7  ;;  %v5027_v26 = vpop.f32.mrb[128].mxu0 }
 0x545   : > { %v5097_v28 = vmul.f32 %v5080_v19, %v5027_v26  ;;  %v5029_v30 = vpop.f32.mrb[129].mxu0  ;;  %v8480_v26 = vld [vmem:[%s10771_s3 + $0x20] sm:$0xf] }
 0x546   : > { %v5098_v36 = vmul.f32 %v5084_v23, %v5029_v30  ;;  %v5031_v4 = vpop.f32.mrb[130].mxu0 }
 0x547   : > { %v5101_v59 = vadd.f32 %v5097_v28, %v4958_v43  ;;  %v5032_v39 = vpop.f32.mrb[131].mxu0  ;;  %v5513_v4 = vrot.slane %v8480_v26, %v9517_v52 }
 0x548   : > { %v5102_v40 = vadd.f32 %v5098_v36, %v4959_v60  ;;  %v5068_v29 = vpop.f32.mrb[128].mxu1  ;;  %v5374_v60 = vrot.slane %v8474_v50, %v9521_v58 }
 0x549   : > { %v5099_v44 = vmul.f32 %v5088_v35, %v5068_v29  ;;  %v5070_v45 = vpop.f32.mrb[129].mxu1  ;;  %v5517_v29 = vrot.slane %v8480_v26, %v9521_v58 }
 0x54a   : > { %v5100_v46 = vmul.f32 %v5092_v38, %v5070_v45  ;;  %v5072_v47 = vpop.f32.mrb[130].mxu1  ;;  %v5509_v38 = vrot.slane %v8480_v26, %v9510_v48  ;;  %v5521_v45 = vrot.slane %v8480_v26, %v9529_v1  ;;  %v8498_v26 = vld [vmem:[%s10771_s3 + $0x2c] sm:$0xf] }
 0x54b   : > { %v5103_v49 = vadd.f32 %v5099_v44, %v4960_v24  ;;  %v5073_v31 = vpop.f32.mrb[131].mxu1 }
 0x54c   : > { %v5104_v22 = vadd.f32 %v5100_v46, %v4961_v63 }
 0x550   : > { %v5170_v3 = vpop.f32.mrb[132].mxu0 }
 0x551   : > { %v5240_v37 = vmul.f32 %v5223_v51, %v5170_v3  ;;  %v5172_v54 = vpop.f32.mrb[133].mxu0  ;;  %v5652_v3 = vrot.slane %v8486_v62, %v9510_v48 }
 0x552   : > { %v5241_v32 = vmul.f32 %v5227_v53, %v5172_v54  ;;  %v5174_v5 = vpop.f32.mrb[134].mxu0  ;;  %v5656_v54 = vrot.slane %v8486_v62, %v9517_v52 }
 0x553   : > { %v5244_v27 = vadd.f32 %v5240_v37, %v5101_v59  ;;  %v5175_v6 = vpop.f32.mrb[135].mxu0 }
 0x554   : > { %v5245_v61 = vadd.f32 %v5241_v32, %v5102_v40  ;;  %v5211_v7 = vpop.f32.mrb[132].mxu1 }
 0x555   : > { %v5242_v8 = vmul.f32 %v5231_v55, %v5211_v7  ;;  %v5213_v9 = vpop.f32.mrb[133].mxu1 }
 0x556   : > { %v5243_v57 = vmul.f32 %v5235_v56, %v5213_v9  ;;  %v5215_v2 = vpop.f32.mrb[134].mxu1 }
 0x557   : > { %v5246_v10 = vadd.f32 %v5242_v8, %v5103_v49  ;;  %v5216_v41 = vpop.f32.mrb[135].mxu1  ;;  %v5664_v8 = vrot.slane %v8486_v62, %v9529_v1 }
 0x558   : > { %v5247_v13 = vadd.f32 %v5243_v57, %v5104_v22  ;;  %v5313_v42 = vpop.f32.mrb[136].mxu0 }
 0x559   : > { %v5383_v43 = vmul.f32 %v5366_v33, %v5313_v42  ;;  %v5315_v14 = vpop.f32.mrb[137].mxu0  ;;  %v8492_v42 = vld [vmem:[%s10771_s3 + $0x28] sm:$0xf] }
 0x55a   : > { %v5384_v15 = vmul.f32 %v5370_v34, %v5315_v14  ;;  %v5317_v17 = vpop.f32.mrb[138].mxu0 }
 0x55b   : > { %v5387_v19 = vadd.f32 %v5383_v43, %v5244_v27  ;;  %v5318_v21 = vpop.f32.mrb[139].mxu0  ;;  %v5799_v17 = vrot.slane %v8492_v42, %v9517_v52 }
 0x55c   : > { %v5388_v23 = vadd.f32 %v5384_v15, %v5245_v61  ;;  %v5354_v0 = vpop.f32.mrb[136].mxu1  ;;  %v5660_v61 = vrot.slane %v8486_v62, %v9521_v58 }
 0x55d   : > { %v5385_v24 = vmul.f32 %v5374_v60, %v5354_v0  ;;  %v5356_v25 = vpop.f32.mrb[137].mxu1  ;;  %v5803_v0 = vrot.slane %v8492_v42, %v9521_v58 }
 0x55e   : > { %v5386_v63 = vmul.f32 %v5378_v16, %v5356_v25  ;;  %v5358_v28 = vpop.f32.mrb[138].mxu1  ;;  %v5795_v16 = vrot.slane %v8492_v42, %v9510_v48  ;;  %v5807_v25 = vrot.slane %v8492_v42, %v9529_v1  ;;  %v8514_v42 = vld [vmem:[%s10771_s3 + $0x34] sm:$0xf] }
 0x55f   : > { %v5389_v30 = vadd.f32 %v5385_v24, %v5246_v10  ;;  %v5359_v35 = vpop.f32.mrb[139].mxu1 }
 0x560   : > { %v5390_v36 = vadd.f32 %v5386_v63, %v5247_v13 }
 0x564   : > { %v5456_v59 = vpop.f32.mrb[140].mxu0 }
 0x565   : > { %v5526_v39 = vmul.f32 %v5509_v38, %v5456_v59  ;;  %v5458_v40 = vpop.f32.mrb[141].mxu0  ;;  %v5938_v59 = vrot.slane %v8498_v26, %v9510_v48 }
 0x566   : > { %v5527_v44 = vmul.f32 %v5513_v4, %v5458_v40  ;;  %v5460_v46 = vpop.f32.mrb[142].mxu0  ;;  %v5942_v40 = vrot.slane %v8498_v26, %v9517_v52 }
 0x567   : > { %v5530_v47 = vadd.f32 %v5526_v39, %v5387_v19  ;;  %v5461_v49 = vpop.f32.mrb[143].mxu0 }
 0x568   : > { %v5531_v31 = vadd.f32 %v5527_v44, %v5388_v23  ;;  %v5497_v22 = vpop.f32.mrb[140].mxu1 }
 0x569   : > { %v5528_v51 = vmul.f32 %v5517_v29, %v5497_v22  ;;  %v5499_v53 = vpop.f32.mrb[141].mxu1 }
 0x56a   : > { %v5529_v37 = vmul.f32 %v5521_v45, %v5499_v53  ;;  %v5501_v55 = vpop.f32.mrb[142].mxu1 }
 0x56b   : > { %v5532_v32 = vadd.f32 %v5528_v51, %v5389_v30  ;;  %v5502_v56 = vpop.f32.mrb[143].mxu1  ;;  %v5950_v51 = vrot.slane %v8498_v26, %v9529_v1 }
 0x56c   : > { %v5533_v5 = vadd.f32 %v5529_v37, %v5390_v36  ;;  %v5599_v50 = vpop.f32.mrb[144].mxu0 }
 0x56d   : > { %v5669_v27 = vmul.f32 %v5652_v3, %v5599_v50  ;;  %v5601_v6 = vpop.f32.mrb[145].mxu0 }
 0x56e   : > { %v5670_v7 = vmul.f32 %v5656_v54, %v5601_v6  ;;  %v5603_v9 = vpop.f32.mrb[146].mxu0 }
 0x56f   : > { %v5673_v33 = vadd.f32 %v5669_v27, %v5530_v47  ;;  %v5604_v57 = vpop.f32.mrb[147].mxu0 }
 0x570   : > { %v5674_v34 = vadd.f32 %v5670_v7, %v5531_v31  ;;  %v5640_v2 = vpop.f32.mrb[144].mxu1  ;;  %v5946_v31 = vrot.slane %v8498_v26, %v9521_v58 }
 0x571   : > { %v5671_v10 = vmul.f32 %v5660_v61, %v5640_v2  ;;  %v5642_v41 = vpop.f32.mrb[145].mxu1 }
 0x572   : > { %v5672_v13 = vmul.f32 %v5664_v8, %v5642_v41  ;;  %v5644_v43 = vpop.f32.mrb[146].mxu1 }
 0x573   : > { %v5675_v14 = vadd.f32 %v5671_v10, %v5532_v32  ;;  %v5645_v60 = vpop.f32.mrb[147].mxu1 }
 0x574   : > { %v5676_v15 = vadd.f32 %v5672_v13, %v5533_v5  ;;  %v8504_v5 = vld [vmem:[%s10771_s3 + $0x30] sm:$0xf] }
 0x575   : > { %v6081_v8 = vrot.slane %v8504_v5, %v9510_v48  ;;  %v6085_v9 = vrot.slane %v8504_v5, %v9517_v52  ;;  %v6089_v2 = vrot.slane %v8504_v5, %v9521_v58  ;;  %v6093_v13 = vrot.slane %v8504_v5, %v9529_v1 }
 0x578   : > { %v5742_v19 = vpop.f32.mrb[148].mxu0 }
 0x579   : > { %v5812_v21 = vmul.f32 %v5795_v16, %v5742_v19  ;;  %v5744_v23 = vpop.f32.mrb[149].mxu0  ;;  %v6222_v19 = vrot.slane %v8514_v42, %v9510_v48 }
 0x57a   : > { %v5813_v24 = vmul.f32 %v5799_v17, %v5744_v23  ;;  %v5746_v63 = vpop.f32.mrb[150].mxu0 }
 0x57b   : > { %v5816_v28 = vadd.f32 %v5812_v21, %v5673_v33  ;;  %v5747_v30 = vpop.f32.mrb[151].mxu0 }
 0x57c   : > { %v5817_v35 = vadd.f32 %v5813_v24, %v5674_v34  ;;  %v5783_v36 = vpop.f32.mrb[148].mxu1 }
 0x57d   : > { %v5814_v38 = vmul.f32 %v5803_v0, %v5783_v36  ;;  %v5785_v4 = vpop.f32.mrb[149].mxu1  ;;  %v6226_v0 = vrot.slane %v8514_v42, %v9517_v52 }
 0x57e   : > { %v5815_v39 = vmul.f32 %v5807_v25, %v5785_v4  ;;  %v5787_v29 = vpop.f32.mrb[150].mxu1  ;;  %v6234_v4 = vrot.slane %v8514_v42, %v9529_v1 }
 0x57f   : > { %v5818_v44 = vadd.f32 %v5814_v38, %v5675_v14  ;;  %v5788_v45 = vpop.f32.mrb[151].mxu1 }
 0x580   : > { %v5819_v46 = vadd.f32 %v5815_v39, %v5676_v15  ;;  %v5885_v62 = vpop.f32.mrb[152].mxu0 }
 0x581   : > { %v5955_v47 = vmul.f32 %v5938_v59, %v5885_v62  ;;  %v5887_v49 = vpop.f32.mrb[153].mxu0  ;;  %v8525_v59 = vld [vmem:[%s10771_s3 + $0x38] sm:$0xf] }
 0x582   : > { %v5956_v22 = vmul.f32 %v5942_v40, %v5887_v49  ;;  %v5889_v53 = vpop.f32.mrb[154].mxu0  ;;  %v6381_v62 = vrot.slane %v8525_v59, %v9510_v48  ;;  %v6393_v5 = vrot.slane %v8525_v59, %v9529_v1 }
 0x583   : > { %v5959_v3 = vadd.f32 %v5955_v47, %v5816_v28  ;;  %v5890_v37 = vpop.f32.mrb[155].mxu0 }
 0x584   : > { %v5960_v54 = vadd.f32 %v5956_v22, %v5817_v35  ;;  %v5926_v55 = vpop.f32.mrb[152].mxu1  ;;  %v6230_v35 = vrot.slane %v8514_v42, %v9521_v58 }
 0x585   : > { %v5957_v32 = vmul.f32 %v5946_v31, %v5926_v55  ;;  %v5928_v56 = vpop.f32.mrb[153].mxu1  ;;  %v6385_v31 = vrot.slane %v8525_v59, %v9517_v52  ;;  %v6389_v55 = vrot.slane %v8525_v59, %v9521_v58 }
 0x586   : > { %v5958_v50 = vmul.f32 %v5950_v51, %v5928_v56  ;;  %v5930_v27 = vpop.f32.mrb[154].mxu1 }
 0x587   : > { %v5961_v6 = vadd.f32 %v5957_v32, %v5818_v44  ;;  %v5931_v61 = vpop.f32.mrb[155].mxu1 }
 0x588   : > { %v5962_v7 = vadd.f32 %v5958_v50, %v5819_v46  ;;  %v8531_v50 = vld [vmem:[%s10771_s3 + $0x3c] sm:$0xf] }
 0x58b   : > { %v6028_v33 = vpop.f32.mrb[156].mxu0 }
 0x58c   : > { %v6098_v57 = vmul.f32 %v6081_v8, %v6028_v33  ;;  %v6030_v34 = vpop.f32.mrb[157].mxu0  ;;  %v6524_v33 = vrot.slane %v8531_v50, %v9510_v48 }
 0x58d   : > { %v6099_v10 = vmul.f32 %v6085_v9, %v6030_v34  ;;  %v6032_v41 = vpop.f32.mrb[158].mxu0 }
 0x58e   : > { %v6102_v43 = vadd.f32 %v6098_v57, %v5959_v3  ;;  %v6033_v14 = vpop.f32.mrb[159].mxu0 }
 0x58f   : > { %v6103_v60 = vadd.f32 %v6099_v10, %v5960_v54  ;;  %v6069_v15 = vpop.f32.mrb[156].mxu1 }
 0x590   : > { %v6100_v16 = vmul.f32 %v6089_v2, %v6069_v15  ;;  %v6071_v17 = vpop.f32.mrb[157].mxu1  ;;  %v6528_v2 = vrot.slane %v8531_v50, %v9517_v52 }
 0x591   : > { %v6101_v21 = vmul.f32 %v6093_v13, %v6071_v17  ;;  %v6073_v23 = vpop.f32.mrb[158].mxu1  ;;  %v6536_v17 = vrot.slane %v8531_v50, %v9529_v1 }
 0x592   : > { %v6104_v24 = vadd.f32 %v6100_v16, %v5961_v6  ;;  %v6074_v25 = vpop.f32.mrb[159].mxu1 }
 0x593   : > { %v6105_v63 = vadd.f32 %v6101_v21, %v5962_v7  ;;  %v6169_v26 = vpop.f32.mrb[160].mxu0 }
 0x594   : > { %v6239_v28 = vmul.f32 %v6222_v19, %v6169_v26  ;;  %v6171_v30 = vpop.f32.mrb[161].mxu0  ;;  %v8537_v19 = vld [vmem:[%s10771_s3 + $0x40] sm:$0xf] }
 0x595   : > { %v6240_v36 = vmul.f32 %v6226_v0, %v6171_v30  ;;  %v6173_v38 = vpop.f32.mrb[162].mxu0  ;;  %v6667_v26 = vrot.slane %v8537_v19, %v9510_v48 }
 0x596   : > { %v6243_v39 = vadd.f32 %v6239_v28, %v6102_v43  ;;  %v6174_v40 = vpop.f32.mrb[163].mxu0 }
 0x597   : > { %v6244_v29 = vadd.f32 %v6240_v36, %v6103_v60  ;;  %v6210_v44 = vpop.f32.mrb[160].mxu1  ;;  %v6532_v60 = vrot.slane %v8531_v50, %v9521_v58 }
 0x598   : > { %v6241_v45 = vmul.f32 %v6230_v35, %v6210_v44  ;;  %v6212_v46 = vpop.f32.mrb[161].mxu1  ;;  %v6671_v35 = vrot.slane %v8537_v19, %v9517_v52 }
 0x599   : > { %v6242_v47 = vmul.f32 %v6234_v4, %v6212_v46  ;;  %v6214_v49 = vpop.f32.mrb[162].mxu1  ;;  %v6679_v46 = vrot.slane %v8537_v19, %v9529_v1 }
 0x59a   : > { %v6245_v22 = vadd.f32 %v6241_v45, %v6104_v24  ;;  %v6215_v51 = vpop.f32.mrb[163].mxu1 }
 0x59b   : > { %v6246_v53 = vadd.f32 %v6242_v47, %v6105_v63  ;;  %v6328_v3 = vpop.f32.mrb[164].mxu0 }
 0x59c   : > { %v6398_v37 = vmul.f32 %v6381_v62, %v6328_v3  ;;  %v6330_v54 = vpop.f32.mrb[165].mxu0  ;;  %v8543_v62 = vld [vmem:[%s10771_s3 + $0x44] sm:$0xf] }
 0x59d   : > { %v6399_v32 = vmul.f32 %v6385_v31, %v6330_v54  ;;  %v6332_v56 = vpop.f32.mrb[166].mxu0  ;;  %v6810_v3 = vrot.slane %v8543_v62, %v9510_v48 }
 0x59e   : > { %v6402_v27 = vadd.f32 %v6398_v37, %v6243_v39  ;;  %v6333_v6 = vpop.f32.mrb[167].mxu0 }
 0x59f   : > { %v6403_v61 = vadd.f32 %v6399_v32, %v6244_v29  ;;  %v6369_v7 = vpop.f32.mrb[164].mxu1  ;;  %v6675_v29 = vrot.slane %v8537_v19, %v9521_v58 }
 0x5a0   : > { %v6400_v8 = vmul.f32 %v6389_v55, %v6369_v7  ;;  %v6371_v9 = vpop.f32.mrb[165].mxu1  ;;  %v6814_v55 = vrot.slane %v8543_v62, %v9517_v52 }
 0x5a1   : > { %v6401_v57 = vmul.f32 %v6393_v5, %v6371_v9  ;;  %v6373_v34 = vpop.f32.mrb[166].mxu1  ;;  %v6822_v9 = vrot.slane %v8543_v62, %v9529_v1 }
 0x5a2   : > { %v6404_v10 = vadd.f32 %v6400_v8, %v6245_v22  ;;  %v6374_v41 = vpop.f32.mrb[167].mxu1 }
 0x5a3   : > { %v6405_v13 = vadd.f32 %v6401_v57, %v6246_v53  ;;  %v6471_v42 = vpop.f32.mrb[168].mxu0 }
 0x5a4   : > { %v6541_v43 = vmul.f32 %v6524_v33, %v6471_v42  ;;  %v6473_v14 = vpop.f32.mrb[169].mxu0  ;;  %v8549_v33 = vld [vmem:[%s10771_s3 + $0x48] sm:$0xf] }
 0x5a5   : > { %v6542_v15 = vmul.f32 %v6528_v2, %v6473_v14  ;;  %v6475_v16 = vpop.f32.mrb[170].mxu0  ;;  %v6953_v42 = vrot.slane %v8549_v33, %v9510_v48 }
 0x5a6   : > { %v6545_v21 = vadd.f32 %v6541_v43, %v6402_v27  ;;  %v6476_v23 = vpop.f32.mrb[171].mxu0 }
 0x5a7   : > { %v6546_v0 = vadd.f32 %v6542_v15, %v6403_v61  ;;  %v6512_v24 = vpop.f32.mrb[168].mxu1  ;;  %v6818_v61 = vrot.slane %v8543_v62, %v9521_v58 }
 0x5a8   : > { %v6543_v25 = vmul.f32 %v6532_v60, %v6512_v24  ;;  %v6514_v63 = vpop.f32.mrb[169].mxu1  ;;  %v6957_v60 = vrot.slane %v8549_v33, %v9517_v52 }
 0x5a9   : > { %v6544_v28 = vmul.f32 %v6536_v17, %v6514_v63  ;;  %v6516_v30 = vpop.f32.mrb[170].mxu1  ;;  %v6965_v63 = vrot.slane %v8549_v33, %v9529_v1 }
 0x5aa   : > { %v6547_v36 = vadd.f32 %v6543_v25, %v6404_v10  ;;  %v6517_v38 = vpop.f32.mrb[171].mxu1 }
 0x5ab   : > { %v6548_v4 = vadd.f32 %v6544_v28, %v6405_v13  ;;  %v6614_v59 = vpop.f32.mrb[172].mxu0 }
 0x5ac   : > { %v6684_v39 = vmul.f32 %v6667_v26, %v6614_v59  ;;  %v6616_v40 = vpop.f32.mrb[173].mxu0  ;;  %v8555_v26 = vld [vmem:[%s10771_s3 + $0x4c] sm:$0xf] }
 0x5ad   : > { %v6685_v44 = vmul.f32 %v6671_v35, %v6616_v40  ;;  %v6618_v45 = vpop.f32.mrb[174].mxu0  ;;  %v7096_v59 = vrot.slane %v8555_v26, %v9510_v48 }
 0x5ae   : > { %v6688_v47 = vadd.f32 %v6684_v39, %v6545_v21  ;;  %v6619_v49 = vpop.f32.mrb[175].mxu0 }
 0x5af   : > { %v6689_v31 = vadd.f32 %v6685_v44, %v6546_v0  ;;  %v6655_v22 = vpop.f32.mrb[172].mxu1  ;;  %v6961_v0 = vrot.slane %v8549_v33, %v9521_v58 }
 0x5b0   : > { %v6686_v51 = vmul.f32 %v6675_v29, %v6655_v22  ;;  %v6657_v53 = vpop.f32.mrb[173].mxu1  ;;  %v7100_v29 = vrot.slane %v8555_v26, %v9517_v52 }
 0x5b1   : > { %v6687_v37 = vmul.f32 %v6679_v46, %v6657_v53  ;;  %v6659_v54 = vpop.f32.mrb[174].mxu1  ;;  %v7108_v53 = vrot.slane %v8555_v26, %v9529_v1 }
 0x5b2   : > { %v6690_v32 = vadd.f32 %v6686_v51, %v6547_v36  ;;  %v6660_v56 = vpop.f32.mrb[175].mxu1 }
 0x5b3   : > { %v6691_v5 = vadd.f32 %v6687_v37, %v6548_v4  ;;  %v6757_v50 = vpop.f32.mrb[176].mxu0 }
 0x5b4   : > { %v6827_v27 = vmul.f32 %v6810_v3, %v6757_v50  ;;  %v6759_v6 = vpop.f32.mrb[177].mxu0  ;;  %v8561_v3 = vld [vmem:[%s10771_s3 + $0x50] sm:$0xf] }
 0x5b5   : > { %v6828_v7 = vmul.f32 %v6814_v55, %v6759_v6  ;;  %v6761_v8 = vpop.f32.mrb[178].mxu0  ;;  %v7239_v50 = vrot.slane %v8561_v3, %v9510_v48 }
 0x5b6   : > { %v6831_v57 = vadd.f32 %v6827_v27, %v6688_v47  ;;  %v6762_v34 = vpop.f32.mrb[179].mxu0 }
 0x5b7   : > { %v6832_v2 = vadd.f32 %v6828_v7, %v6689_v31  ;;  %v6798_v10 = vpop.f32.mrb[176].mxu1  ;;  %v7104_v31 = vrot.slane %v8555_v26, %v9521_v58 }
 0x5b8   : > { %v6829_v41 = vmul.f32 %v6818_v61, %v6798_v10  ;;  %v6800_v13 = vpop.f32.mrb[177].mxu1  ;;  %v7243_v61 = vrot.slane %v8561_v3, %v9517_v52 }
 0x5b9   : > { %v6830_v43 = vmul.f32 %v6822_v9, %v6800_v13  ;;  %v6802_v14 = vpop.f32.mrb[178].mxu1  ;;  %v7251_v13 = vrot.slane %v8561_v3, %v9529_v1 }
 0x5ba   : > { %v6833_v15 = vadd.f32 %v6829_v41, %v6690_v32  ;;  %v6803_v16 = vpop.f32.mrb[179].mxu1 }
 0x5bb   : > { %v6834_v17 = vadd.f32 %v6830_v43, %v6691_v5  ;;  %v6900_v19 = vpop.f32.mrb[180].mxu0 }
 0x5bc   : > { %v6970_v21 = vmul.f32 %v6953_v42, %v6900_v19  ;;  %v6902_v23 = vpop.f32.mrb[181].mxu0  ;;  %v8567_v42 = vld [vmem:[%s10771_s3 + $0x54] sm:$0xf] }
 0x5bd   : > { %v6971_v24 = vmul.f32 %v6957_v60, %v6902_v23  ;;  %v6904_v25 = vpop.f32.mrb[182].mxu0  ;;  %v7382_v19 = vrot.slane %v8567_v42, %v9510_v48 }
 0x5be   : > { %v6974_v28 = vadd.f32 %v6970_v21, %v6831_v57  ;;  %v6905_v30 = vpop.f32.mrb[183].mxu0 }
 0x5bf   : > { %v6975_v35 = vadd.f32 %v6971_v24, %v6832_v2  ;;  %v6941_v36 = vpop.f32.mrb[180].mxu1  ;;  %v7247_v2 = vrot.slane %v8561_v3, %v9521_v58 }
 0x5c0   : > { %v6972_v38 = vmul.f32 %v6961_v0, %v6941_v36  ;;  %v6943_v4 = vpop.f32.mrb[181].mxu1  ;;  %v7386_v0 = vrot.slane %v8567_v42, %v9517_v52 }
 0x5c1   : > { %v6973_v39 = vmul.f32 %v6965_v63, %v6943_v4  ;;  %v6945_v40 = vpop.f32.mrb[182].mxu1  ;;  %v7394_v4 = vrot.slane %v8567_v42, %v9529_v1 }
 0x5c2   : > { %v6976_v44 = vadd.f32 %v6972_v38, %v6833_v15  ;;  %v6946_v45 = vpop.f32.mrb[183].mxu1 }
 0x5c3   : > { %v6977_v46 = vadd.f32 %v6973_v39, %v6834_v17  ;;  %v7043_v62 = vpop.f32.mrb[184].mxu0 }
 0x5c4   : > { %v7113_v47 = vmul.f32 %v7096_v59, %v7043_v62  ;;  %v7045_v49 = vpop.f32.mrb[185].mxu0  ;;  %v8573_v59 = vld [vmem:[%s10771_s3 + $0x58] sm:$0xf] }
 0x5c5   : > { %v7114_v22 = vmul.f32 %v7100_v29, %v7045_v49  ;;  %v7047_v51 = vpop.f32.mrb[186].mxu0  ;;  %v7525_v62 = vrot.slane %v8573_v59, %v9510_v48 }
 0x5c6   : > { %v7117_v37 = vadd.f32 %v7113_v47, %v6974_v28  ;;  %v7048_v54 = vpop.f32.mrb[187].mxu0 }
 0x5c7   : > { %v7118_v55 = vadd.f32 %v7114_v22, %v6975_v35  ;;  %v7084_v32 = vpop.f32.mrb[184].mxu1  ;;  %v7390_v35 = vrot.slane %v8567_v42, %v9521_v58 }
 0x5c8   : > { %v7115_v56 = vmul.f32 %v7104_v31, %v7084_v32  ;;  %v7086_v5 = vpop.f32.mrb[185].mxu1  ;;  %v7529_v31 = vrot.slane %v8573_v59, %v9517_v52 }
 0x5c9   : > { %v7116_v27 = vmul.f32 %v7108_v53, %v7086_v5  ;;  %v7088_v6 = vpop.f32.mrb[186].mxu1  ;;  %v7537_v5 = vrot.slane %v8573_v59, %v9529_v1 }
 0x5ca   : > { %v7119_v7 = vadd.f32 %v7115_v56, %v6976_v44  ;;  %v7089_v8 = vpop.f32.mrb[187].mxu1 }
 0x5cb   : > { %v7120_v9 = vadd.f32 %v7116_v27, %v6977_v46  ;;  %v7186_v33 = vpop.f32.mrb[188].mxu0 }
 0x5cc   : > { %v7256_v57 = vmul.f32 %v7239_v50, %v7186_v33  ;;  %v7188_v34 = vpop.f32.mrb[189].mxu0  ;;  %v8579_v50 = vld [vmem:[%s10771_s3 + $0x5c] sm:$0xf] }
 0x5cd   : > { %v7257_v10 = vmul.f32 %v7243_v61, %v7188_v34  ;;  %v7190_v41 = vpop.f32.mrb[190].mxu0  ;;  %v7668_v33 = vrot.slane %v8579_v50, %v9510_v48 }
 0x5ce   : > { %v7260_v43 = vadd.f32 %v7256_v57, %v7117_v37  ;;  %v7191_v14 = vpop.f32.mrb[191].mxu0 }
 0x5cf   : > { %v7261_v60 = vadd.f32 %v7257_v10, %v7118_v55  ;;  %v7227_v15 = vpop.f32.mrb[188].mxu1  ;;  %v7533_v55 = vrot.slane %v8573_v59, %v9521_v58 }
 0x5d0   : > { %v7258_v16 = vmul.f32 %v7247_v2, %v7227_v15  ;;  %v7229_v17 = vpop.f32.mrb[189].mxu1  ;;  %v7672_v2 = vrot.slane %v8579_v50, %v9517_v52 }
 0x5d1   : > { %v7259_v21 = vmul.f32 %v7251_v13, %v7229_v17  ;;  %v7231_v23 = vpop.f32.mrb[190].mxu1  ;;  %v7680_v17 = vrot.slane %v8579_v50, %v9529_v1 }
 0x5d2   : > { %v7262_v24 = vadd.f32 %v7258_v16, %v7119_v7  ;;  %v7232_v25 = vpop.f32.mrb[191].mxu1 }
 0x5d3   : > { %v7263_v63 = vadd.f32 %v7259_v21, %v7120_v9  ;;  %v7329_v26 = vpop.f32.mrb[192].mxu0 }
 0x5d4   : > { %v7399_v28 = vmul.f32 %v7382_v19, %v7329_v26  ;;  %v7331_v30 = vpop.f32.mrb[193].mxu0  ;;  %v8585_v19 = vld [vmem:[%s10771_s3 + $0x60] sm:$0xf] }
 0x5d5   : > { %v7400_v36 = vmul.f32 %v7386_v0, %v7331_v30  ;;  %v7333_v38 = vpop.f32.mrb[194].mxu0  ;;  %v7811_v26 = vrot.slane %v8585_v19, %v9510_v48 }
 0x5d6   : > { %v7403_v39 = vadd.f32 %v7399_v28, %v7260_v43  ;;  %v7334_v40 = vpop.f32.mrb[195].mxu0 }
 0x5d7   : > { %v7404_v29 = vadd.f32 %v7400_v36, %v7261_v60  ;;  %v7370_v44 = vpop.f32.mrb[192].mxu1  ;;  %v7676_v60 = vrot.slane %v8579_v50, %v9521_v58 }
 0x5d8   : > { %v7401_v45 = vmul.f32 %v7390_v35, %v7370_v44  ;;  %v7372_v46 = vpop.f32.mrb[193].mxu1  ;;  %v7815_v35 = vrot.slane %v8585_v19, %v9517_v52 }
 0x5d9   : > { %v7402_v47 = vmul.f32 %v7394_v4, %v7372_v46  ;;  %v7374_v49 = vpop.f32.mrb[194].mxu1  ;;  %v7823_v46 = vrot.slane %v8585_v19, %v9529_v1 }
 0x5da   : > { %v7405_v22 = vadd.f32 %v7401_v45, %v7262_v24  ;;  %v7375_v51 = vpop.f32.mrb[195].mxu1 }
 0x5db   : > { %v7406_v53 = vadd.f32 %v7402_v47, %v7263_v63  ;;  %v7472_v3 = vpop.f32.mrb[196].mxu0 }
 0x5dc   : > { %v7542_v37 = vmul.f32 %v7525_v62, %v7472_v3  ;;  %v7474_v54 = vpop.f32.mrb[197].mxu0  ;;  %v8591_v62 = vld [vmem:[%s10771_s3 + $0x64] sm:$0xf] }
 0x5dd   : > { %v7543_v32 = vmul.f32 %v7529_v31, %v7474_v54  ;;  %v7476_v56 = vpop.f32.mrb[198].mxu0  ;;  %v7954_v3 = vrot.slane %v8591_v62, %v9510_v48 }
 0x5de   : > { %v7546_v27 = vadd.f32 %v7542_v37, %v7403_v39  ;;  %v7477_v6 = vpop.f32.mrb[199].mxu0 }
 0x5df   : > { %v7547_v61 = vadd.f32 %v7543_v32, %v7404_v29  ;;  %v7513_v7 = vpop.f32.mrb[196].mxu1  ;;  %v7819_v29 = vrot.slane %v8585_v19, %v9521_v58 }
 0x5e0   : > { %v7544_v8 = vmul.f32 %v7533_v55, %v7513_v7  ;;  %v7515_v9 = vpop.f32.mrb[197].mxu1  ;;  %v7958_v55 = vrot.slane %v8591_v62, %v9517_v52 }
 0x5e1   : > { %v7545_v57 = vmul.f32 %v7537_v5, %v7515_v9  ;;  %v7517_v34 = vpop.f32.mrb[198].mxu1  ;;  %v7966_v9 = vrot.slane %v8591_v62, %v9529_v1 }
 0x5e2   : > { %v7548_v10 = vadd.f32 %v7544_v8, %v7405_v22  ;;  %v7518_v41 = vpop.f32.mrb[199].mxu1 }
 0x5e3   : > { %v7549_v13 = vadd.f32 %v7545_v57, %v7406_v53  ;;  %v7615_v42 = vpop.f32.mrb[200].mxu0 }
 0x5e4   : > { %v7685_v43 = vmul.f32 %v7668_v33, %v7615_v42  ;;  %v7617_v14 = vpop.f32.mrb[201].mxu0  ;;  %v8597_v33 = vld [vmem:[%s10771_s3 + $0x68] sm:$0xf] }
 0x5e5   : > { %v7686_v15 = vmul.f32 %v7672_v2, %v7617_v14  ;;  %v7619_v16 = vpop.f32.mrb[202].mxu0  ;;  %v8097_v42 = vrot.slane %v8597_v33, %v9510_v48 }
 0x5e6   : > { %v7689_v21 = vadd.f32 %v7685_v43, %v7546_v27  ;;  %v7620_v23 = vpop.f32.mrb[203].mxu0 }
 0x5e7   : > { %v7690_v0 = vadd.f32 %v7686_v15, %v7547_v61  ;;  %v7656_v24 = vpop.f32.mrb[200].mxu1  ;;  %v7962_v61 = vrot.slane %v8591_v62, %v9521_v58 }
 0x5e8   : > { %v7687_v25 = vmul.f32 %v7676_v60, %v7656_v24  ;;  %v7658_v63 = vpop.f32.mrb[201].mxu1  ;;  %v8101_v60 = vrot.slane %v8597_v33, %v9517_v52 }
 0x5e9   : > { %v7688_v28 = vmul.f32 %v7680_v17, %v7658_v63  ;;  %v7660_v30 = vpop.f32.mrb[202].mxu1  ;;  %v8109_v63 = vrot.slane %v8597_v33, %v9529_v1 }
 0x5ea   : > { %v7691_v36 = vadd.f32 %v7687_v25, %v7548_v10  ;;  %v7661_v38 = vpop.f32.mrb[203].mxu1 }
 0x5eb   : > { %v7692_v4 = vadd.f32 %v7688_v28, %v7549_v13  ;;  %v7758_v59 = vpop.f32.mrb[204].mxu0 }
 0x5ec   : > { %v7828_v39 = vmul.f32 %v7811_v26, %v7758_v59  ;;  %v7760_v40 = vpop.f32.mrb[205].mxu0 }
 0x5ed   : > { %v7829_v44 = vmul.f32 %v7815_v35, %v7760_v40  ;;  %v7762_v45 = vpop.f32.mrb[206].mxu0 }
 0x5ee   : > { %v7832_v47 = vadd.f32 %v7828_v39, %v7689_v21  ;;  %v7763_v49 = vpop.f32.mrb[207].mxu0 }
 0x5ef   : > { %v7833_v31 = vadd.f32 %v7829_v44, %v7690_v0  ;;  %v7799_v22 = vpop.f32.mrb[204].mxu1  ;;  %v8105_v0 = vrot.slane %v8597_v33, %v9521_v58  ;;  %v8684_v33 = vld [vmem:[%s8861_s5 + $0x10] sm:$0xff] }
 0x5f0   : > { %v7830_v51 = vmul.f32 %v7819_v29, %v7799_v22  ;;  %v7801_v53 = vpop.f32.mrb[205].mxu1 }
 0x5f1   : > { %v7831_v37 = vmul.f32 %v7823_v46, %v7801_v53  ;;  %v7803_v54 = vpop.f32.mrb[206].mxu1 }
 0x5f2   : > { %v7834_v32 = vadd.f32 %v7830_v51, %v7691_v36  ;;  %v7804_v56 = vpop.f32.mrb[207].mxu1 }
 0x5f3   : > { %v7835_v5 = vadd.f32 %v7831_v37, %v7692_v4  ;;  %v7901_v50 = vpop.f32.mrb[208].mxu0 }
 0x5f4   : > { %v7971_v27 = vmul.f32 %v7954_v3, %v7901_v50  ;;  %v7903_v6 = vpop.f32.mrb[209].mxu0 }
 0x5f5   : > { %v7972_v7 = vmul.f32 %v7958_v55, %v7903_v6  ;;  %v7905_v8 = vpop.f32.mrb[210].mxu0 }
 0x5f6   : > { %v7975_v57 = vadd.f32 %v7971_v27, %v7832_v47  ;;  %v7906_v34 = vpop.f32.mrb[211].mxu0  ;;  %v8683_v8 = vld [vmem:[%s8861_s5 + $0x8] sm:$0xff] }
 0x5f7   : > { %v7976_v2 = vadd.f32 %v7972_v7, %v7833_v31  ;;  %v7942_v10 = vpop.f32.mrb[208].mxu1  ;;  %v8685_v34 = vld [vmem:[%s8861_s5 + $0x18] sm:$0xff] }
 0x5f8   : > { %v7973_v41 = vmul.f32 %v7962_v61, %v7942_v10  ;;  %v7944_v13 = vpop.f32.mrb[209].mxu1 }
 0x5f9   : > { %v7974_v43 = vmul.f32 %v7966_v9, %v7944_v13  ;;  %v7946_v14 = vpop.f32.mrb[210].mxu1 }
 0x5fa   : > { %v7977_v15 = vadd.f32 %v7973_v41, %v7834_v32  ;;  %v7947_v16 = vpop.f32.mrb[211].mxu1 }
 0x5fb   : > { %v7978_v17 = vadd.f32 %v7974_v43, %v7835_v5  ;;  %v8044_v19 = vpop.f32.mrb[212].mxu0 }
 0x5fc   : > { %v8114_v21 = vmul.f32 %v8097_v42, %v8044_v19  ;;  %v8046_v23 = vpop.f32.mrb[213].mxu0 }
 0x5fd   : > { %v8115_v24 = vmul.f32 %v8101_v60, %v8046_v23  ;;  %v8048_v25 = vpop.f32.mrb[214].mxu0 }
 0x5fe   : > { %v8118_v26 = vadd.f32 %v8114_v21, %v7975_v57  ;;  %v8049_v28 = vpop.f32.mrb[215].mxu0 }
 0x5ff   : > { %v8119_v30 = vadd.f32 %v8115_v24, %v7976_v2  ;;  %v8085_v48 = vpop.f32.mrb[212].mxu1 }
 0x600   : > { %v8116_v35 = vmul.f32 %v8105_v0, %v8085_v48  ;;  %v8087_v36 = vpop.f32.mrb[213].mxu1 }
 0x601   : > { %v8122_v38 = vadd.f32 %v8119_v30, %v8118_v26  ;;  %v8117_v52 = vmul.f32 %v8109_v63, %v8087_v36  ;;  %v8089_v4 = vpop.f32.mrb[214].mxu1 }
 0x602   : > { %v8120_v59 = vadd.f32 %v8116_v35, %v7977_v15  ;;  %v8090_v39 = vpop.f32.mrb[215].mxu1 }
 0x603   : > { %v8121_v40 = vadd.f32 %v8117_v52, %v7978_v17 }
 0x604   : > { %v8123_v29 = vadd.f32 %v8122_v38, %v8120_v59 }
 0x606   : > { %v8124_v44 = vadd.f32 %v8123_v29, %v8121_v40 }
 0x608   : > { %8125 = vadd.xlane.f32.xlu0 %v8124_v44 }
 0x695   : > { %v8126_v58 = vpop.xlane.xlu0 %8125 }
 0x696   : > { %v8127_v45 = vmul.f32 0.001953125, %v8126_v58 }
 0x698   : > { %v8128_v46 = vsub.f32 %v8118_v26, %v8127_v45  ;;  %v8129_v62 = vsub.f32 %v8119_v30, %v8127_v45  ;;  %v8130_v1 = vsub.f32 %v8120_v59, %v8127_v45  ;;  %v8131_v47 = vsub.f32 %v8121_v40, %v8127_v45 }
 0x69a   : > { %v8132_v49 = vmul.f32 %v8128_v46, %v8128_v46  ;;  %v8133_v31 = vmul.f32 %v8129_v62, %v8129_v62  ;;  %v8134_v22 = vmul.f32 %v8130_v1, %v8130_v1  ;;  %v8135_v51 = vmul.f32 %v8131_v47, %v8131_v47 }
 0x69c   : > { %v8136_v53 = vmul.f32 %v8132_v49, %v9773_v11  ;;  %v8137_v3 = vmul.f32 %v8133_v31, %v9776_v12  ;;  %v8138_v37 = vmul.f32 %v8134_v22, %v9779_v18  ;;  %v8139_v55 = vmul.f32 %v8135_v51, %v9782_v20  ;;  %v8682_v20 = vld [vmem:[%s8861_s5] sm:$0xff]  ;;  %s8694_s5 = scalar_lea.vmem %s10728_s8, 512 }
 0x69d   : > { %p8695_p11 = scmp.ne.s32.totalorder %s10728_s8, %s8694_s5  ;;  %p8702_p1 = scmp.lt.s32.totalorder %s8700_s12, %s8694_s5 }
 0x69e   : > { %v8140_v54 = vadd.f32 %v8137_v3, %v8136_v53 }
 0x69f   : > { %p8696_p12 = pnand %p8695_p11, %p8840_p5  ;;  %p8703_p2 = por %p8702_p1, %p8701_p0 }
 0x6a0   : > { %v8141_v32 = vadd.f32 %v8140_v54, %v8138_v37 }
 0x6a1   : > { %p8697_p13 = pneg %p8696_p12 }
 0x6a2   : > { %v8142_v56 = vadd.f32 %v8141_v32, %v8139_v55 }
 0x6a3   : > { %p8704_p3 = pnand %p8703_p2, %p8697_p13 }
 0x6a4   : > { %8143 = vadd.xlane.f32.xlu1 %v8142_v56 }
 0x731   : > { %v8144_v5 = vpop.xlane.xlu1 %8143 }
 0x732   : > { %v8145_v50 = vmul.f32 0.001953125, %v8144_v5 }
 0x734   : > { %v8146_v27 = vadd.f32 1e-05, %v8145_v50 }
 0x736   : > { %8680 = vrsqrt.f32 %v8146_v27 }
 0x740   : > { %v8681_v11 = vpop.eup %8680 }
 0x741   : > { %v8148_v12 = vmul.f32 %v8681_v11, %v8128_v46  ;;  %v8149_v18 = vmul.f32 %v8681_v11, %v8129_v62  ;;  %v8150_v6 = vmul.f32 %v8681_v11, %v8130_v1  ;;  %v8151_v61 = vmul.f32 %v8681_v11, %v8131_v47 }
 0x743   : > { %v8152_v7 = vadd.f32 %v8682_v20, %v8148_v12  ;;  %v8153_v9 = vadd.f32 %v8683_v8, %v8149_v18  ;;  %v8154_v57 = vadd.f32 %v8684_v33, %v8150_v6  ;;  %v8155_v2 = vadd.f32 %v8685_v34, %v8151_v61 }
 0x745   : > { %v8156_v10 = vmax.f32 %v8152_v7, 0.0  ;;  %v8157_v41 = vmax.f32 %v8153_v9, 0.0  ;;  %v8158_v13 = vmax.f32 %v8154_v57, 0.0  ;;  %v8159_v42 = vmax.f32 %v8155_v2, 0.0 }
 0x747   : > { %8160 = vst [vmem:[%s190_s30] sm:$0xff] %v8156_v10  ;;  %8161 = vst [vmem:[%s190_s30 + $0x8] sm:$0xff] %v8157_v41 }
 0x748   : > { %8162 = vst [vmem:[%s190_s30 + $0x10] sm:$0xff] %v8158_v13  ;;  %8163 = vst [vmem:[%s190_s30 + $0x18] sm:$0xff] %v8159_v42 }
 0x749   : > { %8707 = shalt.err (!%p8704_p3)
}
 0x74a   : > { %s8708_s27 = scalar_lea.hbm %s10726_s20, 512  ;;  %s8712_s22 = scalar_lea.hbm %s10772_s4, 1024 }
 0x74b   : > { %p8709_p4 = scmp.ne.s32.totalorder %s10726_s20, %s8708_s27  ;;  %p8713_p9 = scmp.lt.u32.totalorder %s10726_s20, %s10772_s4 }
 0x74c   : > { %p8714_p10 = scmp.lt.u32.totalorder %s8712_s22, %s8708_s27  ;;  %p8716_p12 = scmp.lt.u32.totalorder %s8708_s27, %s10726_s20 }
 0x74d   : > { %p8710_p7 = pnand %p8709_p4, %p8840_p5 }
 0x74e   : > { %p8715_p11 = por %p8714_p10, %p8713_p9 }
 0x74f   : > { %p8711_p8 = pneg %p8710_p7 }
 0x750   : > { %p8717_p13 = por %p8716_p12, %p8715_p11 }
 0x752   : > { %p8718_p0 = pnand %p8717_p13, %p8711_p8 }
 0x754   : > { %8721 = shalt.err (!%p8718_p0)
}
 0x755   : > { %8609 = dma.vmem_to_hbm [thread:$0]  (%p8840_p5), %s10728_s8, 512, %s10726_s20, %s8165_s19  }
 0x756 PF: > { %p8615_p1 = scmp.ge.s32.totalorder %s8756_s18, 2  ;;  %s8191_s14 = sand.u32 1, %s8744_s15  }
 0x757   : > { %s8192_s7 = scalar_lea.sflag [#allocation5], %s8191_s14 }
 0x758   : > { %p8612_p2 = pnand %p8615_p1, %p8844_p6 }
 0x75a   : > { %8739 = dma.done.wait (!%p8612_p2), %s8192_s7, 512  }
 0x75b   : > { %8741 = vsyncadd (!%p8612_p2), %s8192_s7, 4294966784  ;;  %p14_p3 = scmp.ge.s32.totalorder %s8827_s21, 4   ;;  %s10805_s15 = smov %s8748_s16 }
 0x75c   : > { %s10806_s16 = smov %s8752_s17  ;;  %s10807_s17 = smov %s8838_s24 }
 0x75d   : > { %s10808_s18 = smov %s8827_s21  ;;  %16 = sbr.rel (!%p14_p3) target bundleno = 3 (0x3), region = 149 }
 0x764   :  { %8197 = vsyncpa [#allocation5], 1 }
 0x765   :  { %8199 = vsyncpa [#allocation5 + $0x1], 1 }

</bundles_post_ra>
